<compile_context>
chip_gen: v7x
topology: tpu7x:2x2x1
jax: 0.10.0
libtpu: 0.0.40
codegen_flags: <defaults>
</compile_context>

<pallas_src>
import functools

import jax
import jax.numpy as jnp
from jax.experimental import pallas as pl
from jax.experimental.pallas import tpu as pltpu

SCALES = 4
PYRAMID = 4


# ---------------------------------------------------------------------------
# Fused kernel: one (or a few) batch image(s) per grid step
# ---------------------------------------------------------------------------
def _res2net_kernel(x_ref,        # (B, H, W*C)  planar, f32
                    w1_ref,       # (3, W*C, W*C)           bf16, bn1 scale folded
                    w2_ref,       # ((scales-1)*3, Wc, Wc)  bf16, bn2 scales folded
                    wp_ref,       # (sum(2p+3), Wc, Wc)     bf16, bn2p scales folded
                    vc_ref,       # (4 + 2*Cr, W*C)  packed planar vectors, f32
                    vb_ref,       # (scales-1+pyramid, Wc)  branch bn biases, f32
                    fc1b_ref,     # (Cr, 1)                 SE fc1 bias, f32
                    o_ref,        # (B, H, W*C)  planar, f32
                    xpad_ref,     # (H+2, W*C)        scratch: conv1 vertical pad
                    bpad_ref,     # (H+2*pyramid, Wc) scratch: shared branch pad
                    obuf_ref,     # (H, W*C)          scratch: output accumulator
                    *, H, W, C, c8, scales, pyramid, Cr):
  WC = W * C
  Wc = W * c8
  PMAX = pyramid                      # largest pyramid pad (9x9 kernel -> pad 4)
  nb = x_ref.shape[0]                 # images folded into this grid step (static)

  # vc_ref row map (all rows planar-tiled over lanes):
  #   0: bn1 bias   1: bn3 scale   2: bn3 bias   3: fc2 bias
  #   4 .. 4+Cr  : SE fc1 weight (pre-divided by H*W)    4+Cr .. 4+2Cr : SE fc2 weight
  R_BN1B, R_BN3S, R_BN3B, R_FC2B, R_FC1W = 0, 1, 2, 3, 4
  R_FC2W = 4 + Cr

  zero_row = jnp.zeros((1, WC), jnp.float32)        # hoisted broadcasts
  zero_ring = jnp.zeros((PMAX, Wc), jnp.float32)

  def branch_conv(inp, w_ref, base, k, pad, bias_row):
    """3x3 / pyramid branch: banded conv over the shared pad buffer, bn bias + ReLU."""
    bpad_ref[PMAX:PMAX + H, :] = inp                # interior only; border stays zero
    acc = jnp.zeros((H, Wc), jnp.float32)
    for kh in range(k):
      r0 = PMAX - pad + kh
      lhs = bpad_ref[r0:r0 + H, :].astype(jnp.bfloat16)
      acc += jnp.dot(lhs, w_ref[base + kh], preferred_element_type=jnp.float32)
    return jnp.maximum(acc + bias_row, 0.0)

  for b in range(nb):                 # static unroll over images in this block
    xrow = x_ref[b]                                       # (H, W*C) planar, f32

    # ---- conv1 (3x3, pad 1) + bn1 + ReLU: 3 banded dots, one f32 accumulator ----
    xpad_ref[0:1, :] = zero_row                           # thin border, per step
    xpad_ref[H + 1:H + 2, :] = zero_row
    xpad_ref[1:H + 1, :] = xrow
    acc = jnp.zeros((H, WC), jnp.float32)
    for kh in range(3):
      lhs = xpad_ref[kh:kh + H, :].astype(jnp.bfloat16)
      acc += jnp.dot(lhs, w1_ref[kh], preferred_element_type=jnp.float32)
    h = jnp.maximum(acc + vc_ref[R_BN1B:R_BN1B + 1, :], 0.0)   # (H, W*C)

    # ---- hierarchical (res2net) + pyramid branches ------------------------------
    bpad_ref[0:PMAX, :] = zero_ring                       # thin border rings only
    bpad_ref[PMAX + H:PMAX + H + PMAX, :] = zero_ring

    obuf_ref[:, 0:Wc] = h[:, 0:Wc]                        # chunk 0 pass-through

    prev = None
    for s in range(1, scales):                            # sequential 3x3 branches
      inp = h[:, s * Wc:(s + 1) * Wc]
      if s > 1:
        inp = inp + prev
      prev = branch_conv(inp, w2_ref, (s - 1) * 3, 3, 1, vb_ref[s - 1:s, :])
      obuf_ref[:, s * Wc:(s + 1) * Wc] = prev

    off = 0
    for p in range(pyramid):                              # kernels 3/5/7/9, pad p+1
      k = 2 * p + 3
      y = branch_conv(h[:, (scales + p) * Wc:(scales + p + 1) * Wc],
                      wp_ref, off, k, p + 1,
                      vb_ref[scales - 1 + p:scales + p, :])
      obuf_ref[:, (scales + p) * Wc:(scales + p + 1) * Wc] = y
      off += k

    # ---- bn3 + SE (VPU only) + residual + final ReLU -----------------------------
    out = obuf_ref[...] * vc_ref[R_BN3S:R_BN3S + 1, :] + vc_ref[R_BN3B:R_BN3B + 1, :]
    pooled = jnp.sum(out, axis=0, keepdims=True)          # (1, W*C); 1/(H*W) in fc1 wts
    hid = jnp.maximum(
        jnp.sum(pooled * vc_ref[R_FC1W:R_FC1W + Cr, :], axis=1, keepdims=True)
        + fc1b_ref[...], 0.0)                             # (Cr, 1)
    gate = jax.nn.sigmoid(
        jnp.sum(hid * vc_ref[R_FC2W:R_FC2W + Cr, :], axis=0, keepdims=True)
        + vc_ref[R_FC2B:R_FC2B + 1, :])                   # (1, W*C), planar-tiled
    o_ref[b] = jnp.maximum(out * gate + xrow, 0.0).astype(o_ref.dtype)


# ---------------------------------------------------------------------------
# Host-side weight packing (one-time layout plumbing)
# ---------------------------------------------------------------------------
def _banded_conv_weight(w, pad, W, out_scale):
  """w: (k, k, cin, cout). Returns (k, W*cin, W*cout) banded matrices, one per kernel
  row, with M[kh][wi*cin+ci, wo*cout+co] = w[kh, wi-wo+pad, ci, co] (zero outside the
  band -> horizontal 'same' padding folded in) and the bn output scale folded in."""
  k, _, cin, cout = w.shape
  blocks = w * out_scale[None, None, None, :]
  mats = []
  for kh in range(k):
    m = jnp.zeros((W * cin, W * cout), jnp.float32)
    for kw in range(k):
      band = jnp.eye(W, W, k=-(kw - pad), dtype=jnp.float32)
      m = m + jnp.kron(band, blocks[kh, kw])
    mats.append(m)
  return jnp.stack(mats)


def _planar_mat(m, W, nchunk, c8):
  """Permute rows & cols of (k, W*C, W*C) from natural (w, chunk, c) lane order to the
  planar (chunk, w, c) order used inside the kernel."""
  k = m.shape[0]
  K = W * nchunk * c8
  m = m.reshape(k, W, nchunk, c8, W, nchunk, c8)
  return m.transpose(0, 2, 1, 3, 5, 4, 6).reshape(k, K, K)


def _planar_vec(v, W, nchunk, c8):
  """Per-channel (C,) vector -> planar (W*C,) lane vector."""
  v = jnp.broadcast_to(v.reshape(nchunk, 1, c8), (nchunk, W, c8))
  return v.reshape(W * nchunk * c8)


def _chunk_vec(v, W):
  """Per-chunk-channel (c8,) vector -> (W*c8,) lane vector (w-major)."""
  return jnp.tile(v, W)


def pack_params(p, *, H, W, scales=SCALES, pyramid=PYRAMID):
  """Pack torch-layout parameters into the kernel's lane-dense planar layouts.
  BN scales are folded into the (bf16) conv weights; biases / SE weights stay f32."""
  C = p["conv1_w"].shape[0]
  nchunk = scales + pyramid
  c8 = C // nchunk
  Cr = p["fc1_w"].shape[0]

  def t(w):                     # torch (cout, cin, kh, kw) -> (kh, kw, cin, cout)
    return jnp.transpose(w, (2, 3, 1, 0))

  # conv1 (+ bn1 scale): banded over w, both axes permuted to the planar order.
  w1 = _banded_conv_weight(t(p["conv1_w"]), 1, W, p["bn1_scale"])
  w1 = _planar_mat(w1, W, nchunk, c8).astype(jnp.bfloat16)

  # scale-branch 3x3 convs (+ bn2 scales): (scales-1)*3 banded (W*c8, W*c8) mats.
  w2 = jnp.concatenate(
      [_banded_conv_weight(t(p["conv2_w"][i]), 1, W, p["bn2_scale"][i])
       for i in range(scales - 1)], axis=0).astype(jnp.bfloat16)

  # pyramid convs 3/5/7/9 (+ bn scales): 3+5+7+9 banded mats.
  wp = jnp.concatenate(
      [_banded_conv_weight(t(p["conv2p_w"][i]), i + 1, W, p["bn2p_scale"][i])
       for i in range(pyramid)], axis=0).astype(jnp.bfloat16)

  # Consolidated per-(W*C)-lane vectors (feedback #11).
  fc1_wp = jnp.stack([_planar_vec(p["fc1_w"][r], W, nchunk, c8)
                      for r in range(Cr)]) / float(H * W)
  fc2_wp = jnp.stack([_planar_vec(p["fc2_w"][:, r], W, nchunk, c8)   # torch (C, Cr)
                      for r in range(Cr)])
  vc = jnp.concatenate([
      jnp.stack([_planar_vec(p["bn1_bias"], W, nchunk, c8),
                 _planar_vec(p["bn3_scale"], W, nchunk, c8),
                 _planar_vec(p["bn3_bias"], W, nchunk, c8),
                 _planar_vec(p["fc2_b"], W, nchunk, c8)]),
      fc1_wp, fc2_wp], axis=0).astype(jnp.float32)

  vb = jnp.stack([_chunk_vec(p["bn2_bias"][i], W) for i in range(scales - 1)]
                 + [_chunk_vec(p["bn2p_bias"][i], W) for i in range(pyramid)]
                 ).astype(jnp.float32)

  return {"w1": w1, "w2": w2, "wp": wp, "vc": vc, "vb": vb,
          "fc1_b": p["fc1_b"].reshape(Cr, 1).astype(jnp.float32)}


# ---------------------------------------------------------------------------
# Forward (NCHW in / NCHW out).  stride=1, no-downsample path.
# ---------------------------------------------------------------------------
def res2net_forward(x_nchw, packed, *, scales=SCALES, pyramid=PYRAMID,
                    images_per_step=1):
  N, C, H, W = x_nchw.shape
  nchunk = scales + pyramid
  assert C % nchunk == 0, "channels must be divisible by scales + pyramid"
  c8 = C // nchunk
  Cr = packed["fc1_b"].shape[0]
  WC = W * C
  Wc = W * c8
  KSUM = sum(2 * i + 3 for i in range(pyramid))
  B = images_per_step
  assert N % B == 0
  assert packed["vc"].shape[1] == WC, "packed params do not match input W*C"

  # NCHW -> lane-dense planar (N, H, W*C): lane = chunk*(W*c8) + w*c8 + c
  x = jnp.transpose(x_nchw, (0, 2, 3, 1)).reshape(N, H, W, nchunk, c8)
  x = x.transpose(0, 1, 3, 2, 4).reshape(N, H, WC).astype(jnp.float32)

  kernel = functools.partial(_res2net_kernel, H=H, W=W, C=C, c8=c8,
                             scales=scales, pyramid=pyramid, Cr=Cr)
  out = pl.pallas_call(
      kernel,
      out_shape=jax.ShapeDtypeStruct((N, H, WC), jnp.float32),
      grid_spec=pltpu.PrefetchScalarGridSpec(
          num_scalar_prefetch=0,
          grid=(N // B,),
          in_specs=[
              pl.BlockSpec((B, H, WC), lambda n: (n, 0, 0)),            # x (lane-dense)
              pl.BlockSpec((3, WC, WC), lambda n: (0, 0, 0)),           # conv1 banded
              pl.BlockSpec(((scales - 1) * 3, Wc, Wc), lambda n: (0, 0, 0)),
              pl.BlockSpec((KSUM, Wc, Wc), lambda n: (0, 0, 0)),
              pl.BlockSpec((4 + 2 * Cr, WC), lambda n: (0, 0)),         # packed vectors
              pl.BlockSpec((scales - 1 + pyramid, Wc), lambda n: (0, 0)),
              pl.BlockSpec((Cr, 1), lambda n: (0, 0)),
          ],
          out_specs=pl.BlockSpec((B, H, WC), lambda n: (n, 0, 0)),
          scratch_shapes=[
              pltpu.VMEM((H + 2, WC), jnp.float32),            # conv1 vertical pad
              pltpu.VMEM((H + 2 * pyramid, Wc), jnp.float32),  # shared branch pad
              pltpu.VMEM((H, WC), jnp.float32),                # output accumulator
          ],
      ),
      compiler_params=pltpu.CompilerParams(
          dimension_semantics=("parallel",)),   # >= 2 steps -> both v7x TCs busy
  )(x, packed["w1"], packed["w2"], packed["wp"], packed["vc"], packed["vb"],
    packed["fc1_b"])

  # planar (N, H, W*C) -> NCHW (wrapper-side layout plumbing only)
  out = out.reshape(N, H, nchunk, W, c8).transpose(0, 1, 3, 2, 4).reshape(N, H, W, C)
  return jnp.transpose(out, (0, 3, 1, 2))


# ---------------------------------------------------------------------------
# Deterministic synthetic parameters (torch layouts; eval-mode BN pre-folded)
# ---------------------------------------------------------------------------
def _fold_bn(key, c, eps=1e-5):
  k1, k2, k3, k4 = jax.random.split(key, 4)
  gamma = jax.random.uniform(k1, (c,), jnp.float32, 0.5, 1.5)
  beta = 0.1 * jax.random.normal(k2, (c,), jnp.float32)
  mean = 0.1 * jax.random.normal(k3, (c,), jnp.float32)
  var = jax.random.uniform(k4, (c,), jnp.float32, 0.5, 1.5)
  scale = gamma / jnp.sqrt(var + eps)
  return scale, beta - mean * scale


def init_params(key, inplanes, planes, scales=SCALES, pyramid=PYRAMID, reduction=16):
  C = planes                           # bottleneck_planes (groups=1), expansion=1
  c8 = C // (scales + pyramid)
  Cr = max(C // reduction, 1)
  ks = iter(jax.random.split(key, 64))

  def conv_w(k, cout, cin, kh, kw):    # torch conv layout (cout, cin, kh, kw)
    return jax.random.normal(k, (cout, cin, kh, kw), jnp.float32) / jnp.sqrt(kh * kw * cin)

  p = {}
  p["conv1_w"] = conv_w(next(ks), C, inplanes, 3, 3)
  p["bn1_scale"], p["bn1_bias"] = _fold_bn(next(ks), C)
  p["conv2_w"] = [conv_w(next(ks), c8, c8, 3, 3) for _ in range(scales - 1)]
  bn2 = [_fold_bn(next(ks), c8) for _ in range(scales - 1)]
  p["bn2_scale"] = [s for s, _ in bn2]
  p["bn2_bias"] = [b for _, b in bn2]
  p["conv2p_w"] = [conv_w(next(ks), c8, c8, 2 * i + 3, 2 * i + 3) for i in range(pyramid)]
  bn2p = [_fold_bn(next(ks), c8) for _ in range(pyramid)]
  p["bn2p_scale"] = [s for s, _ in bn2p]
  p["bn2p_bias"] = [b for _, b in bn2p]
  p["bn3_scale"], p["bn3_bias"] = _fold_bn(next(ks), C)
  p["fc1_w"] = 0.2 * jax.random.normal(next(ks), (Cr, C), jnp.float32)   # torch (Cr,C,1,1)
  p["fc1_b"] = 0.1 * jax.random.normal(next(ks), (Cr,), jnp.float32)
  p["fc2_w"] = 0.2 * jax.random.normal(next(ks), (C, Cr), jnp.float32)   # torch (C,Cr,1,1)
  p["fc2_b"] = 0.1 * jax.random.normal(next(ks), (C,), jnp.float32)
  return p


if __name__ == "__main__":
  key = jax.random.PRNGKey(0)
  kx, kp = jax.random.split(key)
  N, C, H, W = 2, 32, 16, 16           # inplanes == planes, stride=1, no downsample
  x = jax.random.normal(kx, (N, C, H, W), jnp.float32)
  params = init_params(kp, inplanes=C, planes=C)
  packed = pack_params(params, H=H, W=W)          # one-time layout packing

  fwd = jax.jit(res2net_forward)
  out = fwd(x, packed)
  jax.block_until_ready(out)
  assert out.shape == (N, C, H, W) and out.dtype == jnp.float32
  print("KERNEL_OK")
</pallas_src>

<mosaic_0001>
module attributes {stable_mosaic.version = 11 : i64} {
  func.func @_res2net_kernel(%arg0: i32, %arg1: memref<1x16x512xf32, #tpu.memory_space<vmem>>, %arg2: memref<3x512x512xbf16, #tpu.memory_space<vmem>>, %arg3: memref<9x64x64xbf16, #tpu.memory_space<vmem>>, %arg4: memref<24x64x64xbf16, #tpu.memory_space<vmem>>, %arg5: memref<8x512xf32, #tpu.memory_space<vmem>>, %arg6: memref<7x64xf32, #tpu.memory_space<vmem>>, %arg7: memref<2x1xf32, #tpu.memory_space<vmem>>, %arg8: memref<1x16x512xf32, #tpu.memory_space<vmem>>, %arg9: memref<18x512xf32, #tpu.memory_space<vmem>>, %arg10: memref<24x64xf32, #tpu.memory_space<vmem>>, %arg11: memref<16x512xf32, #tpu.memory_space<vmem>>) attributes {dimension_semantics = [#tpu.dimension_semantics<parallel>], iteration_bounds = array<i64: 2>, scalar_prefetch = 0 : i64, scratch_operands = 3 : i64, tpu.core_type = #tpu.core_type<tc>, window_params = [{transform_indices = @transform_0, window_bounds = array<i64: 1, 16, 512>}, {pipeline_mode = #tpu.pipeline_mode<synchronous>, transform_indices = @transform_1, window_bounds = array<i64: 3, 512, 512>}, {pipeline_mode = #tpu.pipeline_mode<synchronous>, transform_indices = @transform_2, window_bounds = array<i64: 9, 64, 64>}, {pipeline_mode = #tpu.pipeline_mode<synchronous>, transform_indices = @transform_3, window_bounds = array<i64: 24, 64, 64>}, {pipeline_mode = #tpu.pipeline_mode<synchronous>, transform_indices = @transform_4, window_bounds = array<i64: 8, 512>}, {pipeline_mode = #tpu.pipeline_mode<synchronous>, transform_indices = @transform_5, window_bounds = array<i64: 7, 64>}, {pipeline_mode = #tpu.pipeline_mode<synchronous>, transform_indices = @transform_6, window_bounds = array<i64: 2, 1>}, {transform_indices = @transform_7, window_bounds = array<i64: 1, 16, 512>}]} {
    %cst = arith.constant 0.000000e+00 : f32
    %0 = vector.broadcast %cst : f32 to vector<1x512xf32>
    %cst_0 = arith.constant 0.000000e+00 : f32
    %1 = vector.broadcast %cst_0 : f32 to vector<4x64xf32>
    %c0 = arith.constant 0 : index
    %c0_1 = arith.constant 0 : index
    %c0_2 = arith.constant 0 : index
    %2 = vector.load %arg1[%c0, %c0_1, %c0_2] : memref<1x16x512xf32, #tpu.memory_space<vmem>>, vector<1x16x512xf32>
    %3 = vector.shape_cast %2 : vector<1x16x512xf32> to vector<16x512xf32>
    %c0_3 = arith.constant 0 : index
    %c0_4 = arith.constant 0 : index
    %4 = vector.load %arg9[%c0_3, %c0_4] : memref<18x512xf32, #tpu.memory_space<vmem>>, vector<1x512xf32>
    tpu.vector_store %arg9[%c0_3, %c0_4], %0 {strides = array<i32>} : memref<18x512xf32, #tpu.memory_space<vmem>>, vector<1x512xf32>,
    %c17 = arith.constant 17 : index
    %c0_5 = arith.constant 0 : index
    %5 = vector.load %arg9[%c17, %c0_5] : memref<18x512xf32, #tpu.memory_space<vmem>>, vector<1x512xf32>
    tpu.vector_store %arg9[%c17, %c0_5], %0 {strides = array<i32>} : memref<18x512xf32, #tpu.memory_space<vmem>>, vector<1x512xf32>,
    %c1 = arith.constant 1 : index
    %c0_6 = arith.constant 0 : index
    %6 = vector.load %arg9[%c1, %c0_6] : memref<18x512xf32, #tpu.memory_space<vmem>>, vector<16x512xf32>
    tpu.vector_store %arg9[%c1, %c0_6], %3 {strides = array<i32>} : memref<18x512xf32, #tpu.memory_space<vmem>>, vector<16x512xf32>,
    %cst_7 = arith.constant 0.000000e+00 : f32
    %7 = vector.broadcast %cst_7 : f32 to vector<16x512xf32>
    %c0_8 = arith.constant 0 : index
    %c0_9 = arith.constant 0 : index
    %8 = vector.load %arg9[%c0_8, %c0_9] : memref<18x512xf32, #tpu.memory_space<vmem>>, vector<16x512xf32>
    %9 = arith.truncf %8 : vector<16x512xf32> to vector<16x512xbf16>
    %c0_10 = arith.constant 0 : index
    %c0_11 = arith.constant 0 : index
    %c0_12 = arith.constant 0 : index
    %10 = vector.load %arg2[%c0_10, %c0_11, %c0_12] : memref<3x512x512xbf16, #tpu.memory_space<vmem>>, vector<1x512x512xbf16>
    %11 = vector.shape_cast %10 : vector<1x512x512xbf16> to vector<512x512xbf16>
    %cst_13 = arith.constant dense<0.000000e+00> : vector<16x512xf32>
    %12 = tpu.matmul %9, %11, %cst_13 {dimension_numbers = #tpu.dot_dimension_numbers<[1], [0], [0], [1], [0, 0, 1, 1], [], []>} : vector<16x512xbf16>, vector<512x512xbf16>, vector<16x512xf32> -> vector<16x512xf32>
    %13 = arith.addf %7, %12 : vector<16x512xf32>
    %c1_14 = arith.constant 1 : index
    %c0_15 = arith.constant 0 : index
    %14 = vector.load %arg9[%c1_14, %c0_15] : memref<18x512xf32, #tpu.memory_space<vmem>>, vector<16x512xf32>
    %15 = arith.truncf %14 : vector<16x512xf32> to vector<16x512xbf16>
    %c1_16 = arith.constant 1 : index
    %c0_17 = arith.constant 0 : index
    %c0_18 = arith.constant 0 : index
    %16 = vector.load %arg2[%c1_16, %c0_17, %c0_18] : memref<3x512x512xbf16, #tpu.memory_space<vmem>>, vector<1x512x512xbf16>
    %17 = vector.shape_cast %16 : vector<1x512x512xbf16> to vector<512x512xbf16>
    %cst_19 = arith.constant dense<0.000000e+00> : vector<16x512xf32>
    %18 = tpu.matmul %15, %17, %cst_19 {dimension_numbers = #tpu.dot_dimension_numbers<[1], [0], [0], [1], [0, 0, 1, 1], [], []>} : vector<16x512xbf16>, vector<512x512xbf16>, vector<16x512xf32> -> vector<16x512xf32>
    %19 = arith.addf %13, %18 : vector<16x512xf32>
    %c2 = arith.constant 2 : index
    %c0_20 = arith.constant 0 : index
    %20 = vector.load %arg9[%c2, %c0_20] : memref<18x512xf32, #tpu.memory_space<vmem>>, vector<16x512xf32>
    %21 = arith.truncf %20 : vector<16x512xf32> to vector<16x512xbf16>
    %c2_21 = arith.constant 2 : index
    %c0_22 = arith.constant 0 : index
    %c0_23 = arith.constant 0 : index
    %22 = vector.load %arg2[%c2_21, %c0_22, %c0_23] : memref<3x512x512xbf16, #tpu.memory_space<vmem>>, vector<1x512x512xbf16>
    %23 = vector.shape_cast %22 : vector<1x512x512xbf16> to vector<512x512xbf16>
    %cst_24 = arith.constant dense<0.000000e+00> : vector<16x512xf32>
    %24 = tpu.matmul %21, %23, %cst_24 {dimension_numbers = #tpu.dot_dimension_numbers<[1], [0], [0], [1], [0, 0, 1, 1], [], []>} : vector<16x512xbf16>, vector<512x512xbf16>, vector<16x512xf32> -> vector<16x512xf32>
    %25 = arith.addf %19, %24 : vector<16x512xf32>
    %c0_25 = arith.constant 0 : index
    %c0_26 = arith.constant 0 : index
    %26 = vector.load %arg5[%c0_25, %c0_26] : memref<8x512xf32, #tpu.memory_space<vmem>>, vector<1x512xf32>
    %27 = vector.broadcast %26 : vector<1x512xf32> to vector<16x512xf32>
    %28 = arith.addf %25, %27 : vector<16x512xf32>
    %cst_27 = arith.constant 0.000000e+00 : f32
    %29 = vector.broadcast %cst_27 : f32 to vector<16x512xf32>
    %30 = arith.maximumf %28, %29 : vector<16x512xf32>
    %c0_28 = arith.constant 0 : index
    %c0_29 = arith.constant 0 : index
    %31 = vector.load %arg10[%c0_28, %c0_29] : memref<24x64xf32, #tpu.memory_space<vmem>>, vector<4x64xf32>
    tpu.vector_store %arg10[%c0_28, %c0_29], %1 {strides = array<i32>} : memref<24x64xf32, #tpu.memory_space<vmem>>, vector<4x64xf32>,
    %c20 = arith.constant 20 : index
    %c0_30 = arith.constant 0 : index
    %32 = vector.load %arg10[%c20, %c0_30] : memref<24x64xf32, #tpu.memory_space<vmem>>, vector<4x64xf32>
    tpu.vector_store %arg10[%c20, %c0_30], %1 {strides = array<i32>} : memref<24x64xf32, #tpu.memory_space<vmem>>, vector<4x64xf32>,
    %33 = vector.extract_strided_slice %30 {offsets = [0, 0], sizes = [16, 64], strides = [1, 1]} : vector<16x512xf32> to vector<16x64xf32>
    %c0_31 = arith.constant 0 : index
    %c0_32 = arith.constant 0 : index
    %34 = vector.load %arg11[%c0_31, %c0_32] : memref<16x512xf32, #tpu.memory_space<vmem>>, vector<16x64xf32>
    tpu.vector_store %arg11[%c0_31, %c0_32], %33 {strides = array<i32>} : memref<16x512xf32, #tpu.memory_space<vmem>>, vector<16x64xf32>,
    %35 = vector.extract_strided_slice %30 {offsets = [0, 64], sizes = [16, 64], strides = [1, 1]} : vector<16x512xf32> to vector<16x64xf32>
    %c0_33 = arith.constant 0 : index
    %c0_34 = arith.constant 0 : index
    %36 = vector.load %arg6[%c0_33, %c0_34] : memref<7x64xf32, #tpu.memory_space<vmem>>, vector<1x64xf32>
    %c4 = arith.constant 4 : index
    %c0_35 = arith.constant 0 : index
    %37 = vector.load %arg10[%c4, %c0_35] : memref<24x64xf32, #tpu.memory_space<vmem>>, vector<16x64xf32>
    tpu.vector_store %arg10[%c4, %c0_35], %35 {strides = array<i32>} : memref<24x64xf32, #tpu.memory_space<vmem>>, vector<16x64xf32>,
    %cst_36 = arith.constant 0.000000e+00 : f32
    %38 = vector.broadcast %cst_36 : f32 to vector<16x64xf32>
    %c3 = arith.constant 3 : index
    %c0_37 = arith.constant 0 : index
    %39 = vector.load %arg10[%c3, %c0_37] : memref<24x64xf32, #tpu.memory_space<vmem>>, vector<16x64xf32>
    %40 = arith.truncf %39 : vector<16x64xf32> to vector<16x64xbf16>
    %c0_38 = arith.constant 0 : index
    %c0_39 = arith.constant 0 : index
    %c0_40 = arith.constant 0 : index
    %41 = vector.load %arg3[%c0_38, %c0_39, %c0_40] : memref<9x64x64xbf16, #tpu.memory_space<vmem>>, vector<1x64x64xbf16>
    %42 = vector.shape_cast %41 : vector<1x64x64xbf16> to vector<64x64xbf16>
    %cst_41 = arith.constant dense<0.000000e+00> : vector<16x64xf32>
    %43 = tpu.matmul %40, %42, %cst_41 {dimension_numbers = #tpu.dot_dimension_numbers<[1], [0], [0], [1], [0, 0, 1, 1], [], []>} : vector<16x64xbf16>, vector<64x64xbf16>, vector<16x64xf32> -> vector<16x64xf32>
    %44 = arith.addf %38, %43 : vector<16x64xf32>
    %c4_42 = arith.constant 4 : index
    %c0_43 = arith.constant 0 : index
    %45 = vector.load %arg10[%c4_42, %c0_43] : memref<24x64xf32, #tpu.memory_space<vmem>>, vector<16x64xf32>
    %46 = arith.truncf %45 : vector<16x64xf32> to vector<16x64xbf16>
    %c1_44 = arith.constant 1 : index
    %c0_45 = arith.constant 0 : index
    %c0_46 = arith.constant 0 : index
    %47 = vector.load %arg3[%c1_44, %c0_45, %c0_46] : memref<9x64x64xbf16, #tpu.memory_space<vmem>>, vector<1x64x64xbf16>
    %48 = vector.shape_cast %47 : vector<1x64x64xbf16> to vector<64x64xbf16>
    %cst_47 = arith.constant dense<0.000000e+00> : vector<16x64xf32>
    %49 = tpu.matmul %46, %48, %cst_47 {dimension_numbers = #tpu.dot_dimension_numbers<[1], [0], [0], [1], [0, 0, 1, 1], [], []>} : vector<16x64xbf16>, vector<64x64xbf16>, vector<16x64xf32> -> vector<16x64xf32>
    %50 = arith.addf %44, %49 : vector<16x64xf32>
    %c5 = arith.constant 5 : index
    %c0_48 = arith.constant 0 : index
    %51 = vector.load %arg10[%c5, %c0_48] : memref<24x64xf32, #tpu.memory_space<vmem>>, vector<16x64xf32>
    %52 = arith.truncf %51 : vector<16x64xf32> to vector<16x64xbf16>
    %c2_49 = arith.constant 2 : index
    %c0_50 = arith.constant 0 : index
    %c0_51 = arith.constant 0 : index
    %53 = vector.load %arg3[%c2_49, %c0_50, %c0_51] : memref<9x64x64xbf16, #tpu.memory_space<vmem>>, vector<1x64x64xbf16>
    %54 = vector.shape_cast %53 : vector<1x64x64xbf16> to vector<64x64xbf16>
    %cst_52 = arith.constant dense<0.000000e+00> : vector<16x64xf32>
    %55 = tpu.matmul %52, %54, %cst_52 {dimension_numbers = #tpu.dot_dimension_numbers<[1], [0], [0], [1], [0, 0, 1, 1], [], []>} : vector<16x64xbf16>, vector<64x64xbf16>, vector<16x64xf32> -> vector<16x64xf32>
    %56 = arith.addf %50, %55 : vector<16x64xf32>
    %57 = vector.broadcast %36 : vector<1x64xf32> to vector<16x64xf32>
    %58 = arith.addf %56, %57 : vector<16x64xf32>
    %cst_53 = arith.constant 0.000000e+00 : f32
    %59 = vector.broadcast %cst_53 : f32 to vector<16x64xf32>
    %60 = arith.maximumf %58, %59 : vector<16x64xf32>
    %c0_54 = arith.constant 0 : index
    %c64 = arith.constant 64 : index
    %61 = vector.load %arg11[%c0_54, %c64] : memref<16x512xf32, #tpu.memory_space<vmem>>, vector<16x64xf32>
    tpu.vector_store %arg11[%c0_54, %c64], %60 {strides = array<i32>} : memref<16x512xf32, #tpu.memory_space<vmem>>, vector<16x64xf32>,
    %62 = vector.extract_strided_slice %30 {offsets = [0, 128], sizes = [16, 64], strides = [1, 1]} : vector<16x512xf32> to vector<16x64xf32>
    %63 = arith.addf %62, %60 : vector<16x64xf32>
    %c1_55 = arith.constant 1 : index
    %c0_56 = arith.constant 0 : index
    %64 = vector.load %arg6[%c1_55, %c0_56] : memref<7x64xf32, #tpu.memory_space<vmem>>, vector<1x64xf32>
    %c4_57 = arith.constant 4 : index
    %c0_58 = arith.constant 0 : index
    %65 = vector.load %arg10[%c4_57, %c0_58] : memref<24x64xf32, #tpu.memory_space<vmem>>, vector<16x64xf32>
    tpu.vector_store %arg10[%c4_57, %c0_58], %63 {strides = array<i32>} : memref<24x64xf32, #tpu.memory_space<vmem>>, vector<16x64xf32>,
    %cst_59 = arith.constant 0.000000e+00 : f32
    %66 = vector.broadcast %cst_59 : f32 to vector<16x64xf32>
    %c3_60 = arith.constant 3 : index
    %c0_61 = arith.constant 0 : index
    %67 = vector.load %arg10[%c3_60, %c0_61] : memref<24x64xf32, #tpu.memory_space<vmem>>, vector<16x64xf32>
    %68 = arith.truncf %67 : vector<16x64xf32> to vector<16x64xbf16>
    %c3_62 = arith.constant 3 : index
    %c0_63 = arith.constant 0 : index
    %c0_64 = arith.constant 0 : index
    %69 = vector.load %arg3[%c3_62, %c0_63, %c0_64] : memref<9x64x64xbf16, #tpu.memory_space<vmem>>, vector<1x64x64xbf16>
    %70 = vector.shape_cast %69 : vector<1x64x64xbf16> to vector<64x64xbf16>
    %cst_65 = arith.constant dense<0.000000e+00> : vector<16x64xf32>
    %71 = tpu.matmul %68, %70, %cst_65 {dimension_numbers = #tpu.dot_dimension_numbers<[1], [0], [0], [1], [0, 0, 1, 1], [], []>} : vector<16x64xbf16>, vector<64x64xbf16>, vector<16x64xf32> -> vector<16x64xf32>
    %72 = arith.addf %66, %71 : vector<16x64xf32>
    %c4_66 = arith.constant 4 : index
    %c0_67 = arith.constant 0 : index
    %73 = vector.load %arg10[%c4_66, %c0_67] : memref<24x64xf32, #tpu.memory_space<vmem>>, vector<16x64xf32>
    %74 = arith.truncf %73 : vector<16x64xf32> to vector<16x64xbf16>
    %c4_68 = arith.constant 4 : index
    %c0_69 = arith.constant 0 : index
    %c0_70 = arith.constant 0 : index
    %75 = vector.load %arg3[%c4_68, %c0_69, %c0_70] : memref<9x64x64xbf16, #tpu.memory_space<vmem>>, vector<1x64x64xbf16>
    %76 = vector.shape_cast %75 : vector<1x64x64xbf16> to vector<64x64xbf16>
    %cst_71 = arith.constant dense<0.000000e+00> : vector<16x64xf32>
    %77 = tpu.matmul %74, %76, %cst_71 {dimension_numbers = #tpu.dot_dimension_numbers<[1], [0], [0], [1], [0, 0, 1, 1], [], []>} : vector<16x64xbf16>, vector<64x64xbf16>, vector<16x64xf32> -> vector<16x64xf32>
    %78 = arith.addf %72, %77 : vector<16x64xf32>
    %c5_72 = arith.constant 5 : index
    %c0_73 = arith.constant 0 : index
    %79 = vector.load %arg10[%c5_72, %c0_73] : memref<24x64xf32, #tpu.memory_space<vmem>>, vector<16x64xf32>
    %80 = arith.truncf %79 : vector<16x64xf32> to vector<16x64xbf16>
    %c5_74 = arith.constant 5 : index
    %c0_75 = arith.constant 0 : index
    %c0_76 = arith.constant 0 : index
    %81 = vector.load %arg3[%c5_74, %c0_75, %c0_76] : memref<9x64x64xbf16, #tpu.memory_space<vmem>>, vector<1x64x64xbf16>
    %82 = vector.shape_cast %81 : vector<1x64x64xbf16> to vector<64x64xbf16>
    %cst_77 = arith.constant dense<0.000000e+00> : vector<16x64xf32>
    %83 = tpu.matmul %80, %82, %cst_77 {dimension_numbers = #tpu.dot_dimension_numbers<[1], [0], [0], [1], [0, 0, 1, 1], [], []>} : vector<16x64xbf16>, vector<64x64xbf16>, vector<16x64xf32> -> vector<16x64xf32>
    %84 = arith.addf %78, %83 : vector<16x64xf32>
    %85 = vector.broadcast %64 : vector<1x64xf32> to vector<16x64xf32>
    %86 = arith.addf %84, %85 : vector<16x64xf32>
    %cst_78 = arith.constant 0.000000e+00 : f32
    %87 = vector.broadcast %cst_78 : f32 to vector<16x64xf32>
    %88 = arith.maximumf %86, %87 : vector<16x64xf32>
    %c0_79 = arith.constant 0 : index
    %c128 = arith.constant 128 : index
    %89 = vector.load %arg11[%c0_79, %c128] : memref<16x512xf32, #tpu.memory_space<vmem>>, vector<16x64xf32>
    tpu.vector_store %arg11[%c0_79, %c128], %88 {strides = array<i32>} : memref<16x512xf32, #tpu.memory_space<vmem>>, vector<16x64xf32>,
    %90 = vector.extract_strided_slice %30 {offsets = [0, 192], sizes = [16, 64], strides = [1, 1]} : vector<16x512xf32> to vector<16x64xf32>
    %91 = arith.addf %90, %88 : vector<16x64xf32>
    %c2_80 = arith.constant 2 : index
    %c0_81 = arith.constant 0 : index
    %92 = vector.load %arg6[%c2_80, %c0_81] : memref<7x64xf32, #tpu.memory_space<vmem>>, vector<1x64xf32>
    %c4_82 = arith.constant 4 : index
    %c0_83 = arith.constant 0 : index
    %93 = vector.load %arg10[%c4_82, %c0_83] : memref<24x64xf32, #tpu.memory_space<vmem>>, vector<16x64xf32>
    tpu.vector_store %arg10[%c4_82, %c0_83], %91 {strides = array<i32>} : memref<24x64xf32, #tpu.memory_space<vmem>>, vector<16x64xf32>,
    %cst_84 = arith.constant 0.000000e+00 : f32
    %94 = vector.broadcast %cst_84 : f32 to vector<16x64xf32>
    %c3_85 = arith.constant 3 : index
    %c0_86 = arith.constant 0 : index
    %95 = vector.load %arg10[%c3_85, %c0_86] : memref<24x64xf32, #tpu.memory_space<vmem>>, vector<16x64xf32>
    %96 = arith.truncf %95 : vector<16x64xf32> to vector<16x64xbf16>
    %c6 = arith.constant 6 : index
    %c0_87 = arith.constant 0 : index
    %c0_88 = arith.constant 0 : index
    %97 = vector.load %arg3[%c6, %c0_87, %c0_88] : memref<9x64x64xbf16, #tpu.memory_space<vmem>>, vector<1x64x64xbf16>
    %98 = vector.shape_cast %97 : vector<1x64x64xbf16> to vector<64x64xbf16>
    %cst_89 = arith.constant dense<0.000000e+00> : vector<16x64xf32>
    %99 = tpu.matmul %96, %98, %cst_89 {dimension_numbers = #tpu.dot_dimension_numbers<[1], [0], [0], [1], [0, 0, 1, 1], [], []>} : vector<16x64xbf16>, vector<64x64xbf16>, vector<16x64xf32> -> vector<16x64xf32>
    %100 = arith.addf %94, %99 : vector<16x64xf32>
    %c4_90 = arith.constant 4 : index
    %c0_91 = arith.constant 0 : index
    %101 = vector.load %arg10[%c4_90, %c0_91] : memref<24x64xf32, #tpu.memory_space<vmem>>, vector<16x64xf32>
    %102 = arith.truncf %101 : vector<16x64xf32> to vector<16x64xbf16>
    %c7 = arith.constant 7 : index
    %c0_92 = arith.constant 0 : index
    %c0_93 = arith.constant 0 : index
    %103 = vector.load %arg3[%c7, %c0_92, %c0_93] : memref<9x64x64xbf16, #tpu.memory_space<vmem>>, vector<1x64x64xbf16>
    %104 = vector.shape_cast %103 : vector<1x64x64xbf16> to vector<64x64xbf16>
    %cst_94 = arith.constant dense<0.000000e+00> : vector<16x64xf32>
    %105 = tpu.matmul %102, %104, %cst_94 {dimension_numbers = #tpu.dot_dimension_numbers<[1], [0], [0], [1], [0, 0, 1, 1], [], []>} : vector<16x64xbf16>, vector<64x64xbf16>, vector<16x64xf32> -> vector<16x64xf32>
    %106 = arith.addf %100, %105 : vector<16x64xf32>
    %c5_95 = arith.constant 5 : index
    %c0_96 = arith.constant 0 : index
    %107 = vector.load %arg10[%c5_95, %c0_96] : memref<24x64xf32, #tpu.memory_space<vmem>>, vector<16x64xf32>
    %108 = arith.truncf %107 : vector<16x64xf32> to vector<16x64xbf16>
    %c8 = arith.constant 8 : index
    %c0_97 = arith.constant 0 : index
    %c0_98 = arith.constant 0 : index
    %109 = vector.load %arg3[%c8, %c0_97, %c0_98] : memref<9x64x64xbf16, #tpu.memory_space<vmem>>, vector<1x64x64xbf16>
    %110 = vector.shape_cast %109 : vector<1x64x64xbf16> to vector<64x64xbf16>
    %cst_99 = arith.constant dense<0.000000e+00> : vector<16x64xf32>
    %111 = tpu.matmul %108, %110, %cst_99 {dimension_numbers = #tpu.dot_dimension_numbers<[1], [0], [0], [1], [0, 0, 1, 1], [], []>} : vector<16x64xbf16>, vector<64x64xbf16>, vector<16x64xf32> -> vector<16x64xf32>
    %112 = arith.addf %106, %111 : vector<16x64xf32>
    %113 = vector.broadcast %92 : vector<1x64xf32> to vector<16x64xf32>
    %114 = arith.addf %112, %113 : vector<16x64xf32>
    %cst_100 = arith.constant 0.000000e+00 : f32
    %115 = vector.broadcast %cst_100 : f32 to vector<16x64xf32>
    %116 = arith.maximumf %114, %115 : vector<16x64xf32>
    %c0_101 = arith.constant 0 : index
    %c192 = arith.constant 192 : index
    %117 = vector.load %arg11[%c0_101, %c192] : memref<16x512xf32, #tpu.memory_space<vmem>>, vector<16x64xf32>
    tpu.vector_store %arg11[%c0_101, %c192], %116 {strides = array<i32>} : memref<16x512xf32, #tpu.memory_space<vmem>>, vector<16x64xf32>,
    %118 = vector.extract_strided_slice %30 {offsets = [0, 256], sizes = [16, 64], strides = [1, 1]} : vector<16x512xf32> to vector<16x64xf32>
    %c3_102 = arith.constant 3 : index
    %c0_103 = arith.constant 0 : index
    %119 = vector.load %arg6[%c3_102, %c0_103] : memref<7x64xf32, #tpu.memory_space<vmem>>, vector<1x64xf32>
    %c4_104 = arith.constant 4 : index
    %c0_105 = arith.constant 0 : index
    %120 = vector.load %arg10[%c4_104, %c0_105] : memref<24x64xf32, #tpu.memory_space<vmem>>, vector<16x64xf32>
    tpu.vector_store %arg10[%c4_104, %c0_105], %118 {strides = array<i32>} : memref<24x64xf32, #tpu.memory_space<vmem>>, vector<16x64xf32>,
    %cst_106 = arith.constant 0.000000e+00 : f32
    %121 = vector.broadcast %cst_106 : f32 to vector<16x64xf32>
    %c3_107 = arith.constant 3 : index
    %c0_108 = arith.constant 0 : index
    %122 = vector.load %arg10[%c3_107, %c0_108] : memref<24x64xf32, #tpu.memory_space<vmem>>, vector<16x64xf32>
    %123 = arith.truncf %122 : vector<16x64xf32> to vector<16x64xbf16>
    %c0_109 = arith.constant 0 : index
    %c0_110 = arith.constant 0 : index
    %c0_111 = arith.constant 0 : index
    %124 = vector.load %arg4[%c0_109, %c0_110, %c0_111] : memref<24x64x64xbf16, #tpu.memory_space<vmem>>, vector<1x64x64xbf16>
    %125 = vector.shape_cast %124 : vector<1x64x64xbf16> to vector<64x64xbf16>
    %cst_112 = arith.constant dense<0.000000e+00> : vector<16x64xf32>
    %126 = tpu.matmul %123, %125, %cst_112 {dimension_numbers = #tpu.dot_dimension_numbers<[1], [0], [0], [1], [0, 0, 1, 1], [], []>} : vector<16x64xbf16>, vector<64x64xbf16>, vector<16x64xf32> -> vector<16x64xf32>
    %127 = arith.addf %121, %126 : vector<16x64xf32>
    %c4_113 = arith.constant 4 : index
    %c0_114 = arith.constant 0 : index
    %128 = vector.load %arg10[%c4_113, %c0_114] : memref<24x64xf32, #tpu.memory_space<vmem>>, vector<16x64xf32>
    %129 = arith.truncf %128 : vector<16x64xf32> to vector<16x64xbf16>
    %c1_115 = arith.constant 1 : index
    %c0_116 = arith.constant 0 : index
    %c0_117 = arith.constant 0 : index
    %130 = vector.load %arg4[%c1_115, %c0_116, %c0_117] : memref<24x64x64xbf16, #tpu.memory_space<vmem>>, vector<1x64x64xbf16>
    %131 = vector.shape_cast %130 : vector<1x64x64xbf16> to vector<64x64xbf16>
    %cst_118 = arith.constant dense<0.000000e+00> : vector<16x64xf32>
    %132 = tpu.matmul %129, %131, %cst_118 {dimension_numbers = #tpu.dot_dimension_numbers<[1], [0], [0], [1], [0, 0, 1, 1], [], []>} : vector<16x64xbf16>, vector<64x64xbf16>, vector<16x64xf32> -> vector<16x64xf32>
    %133 = arith.addf %127, %132 : vector<16x64xf32>
    %c5_119 = arith.constant 5 : index
    %c0_120 = arith.constant 0 : index
    %134 = vector.load %arg10[%c5_119, %c0_120] : memref<24x64xf32, #tpu.memory_space<vmem>>, vector<16x64xf32>
    %135 = arith.truncf %134 : vector<16x64xf32> to vector<16x64xbf16>
    %c2_121 = arith.constant 2 : index
    %c0_122 = arith.constant 0 : index
    %c0_123 = arith.constant 0 : index
    %136 = vector.load %arg4[%c2_121, %c0_122, %c0_123] : memref<24x64x64xbf16, #tpu.memory_space<vmem>>, vector<1x64x64xbf16>
    %137 = vector.shape_cast %136 : vector<1x64x64xbf16> to vector<64x64xbf16>
    %cst_124 = arith.constant dense<0.000000e+00> : vector<16x64xf32>
    %138 = tpu.matmul %135, %137, %cst_124 {dimension_numbers = #tpu.dot_dimension_numbers<[1], [0], [0], [1], [0, 0, 1, 1], [], []>} : vector<16x64xbf16>, vector<64x64xbf16>, vector<16x64xf32> -> vector<16x64xf32>
    %139 = arith.addf %133, %138 : vector<16x64xf32>
    %140 = vector.broadcast %119 : vector<1x64xf32> to vector<16x64xf32>
    %141 = arith.addf %139, %140 : vector<16x64xf32>
    %cst_125 = arith.constant 0.000000e+00 : f32
    %142 = vector.broadcast %cst_125 : f32 to vector<16x64xf32>
    %143 = arith.maximumf %141, %142 : vector<16x64xf32>
    %c0_126 = arith.constant 0 : index
    %c256 = arith.constant 256 : index
    %144 = vector.load %arg11[%c0_126, %c256] : memref<16x512xf32, #tpu.memory_space<vmem>>, vector<16x64xf32>
    tpu.vector_store %arg11[%c0_126, %c256], %143 {strides = array<i32>} : memref<16x512xf32, #tpu.memory_space<vmem>>, vector<16x64xf32>,
    %145 = vector.extract_strided_slice %30 {offsets = [0, 320], sizes = [16, 64], strides = [1, 1]} : vector<16x512xf32> to vector<16x64xf32>
    %c4_127 = arith.constant 4 : index
    %c0_128 = arith.constant 0 : index
    %146 = vector.load %arg6[%c4_127, %c0_128] : memref<7x64xf32, #tpu.memory_space<vmem>>, vector<1x64xf32>
    %c4_129 = arith.constant 4 : index
    %c0_130 = arith.constant 0 : index
    %147 = vector.load %arg10[%c4_129, %c0_130] : memref<24x64xf32, #tpu.memory_space<vmem>>, vector<16x64xf32>
    tpu.vector_store %arg10[%c4_129, %c0_130], %145 {strides = array<i32>} : memref<24x64xf32, #tpu.memory_space<vmem>>, vector<16x64xf32>,
    %cst_131 = arith.constant 0.000000e+00 : f32
    %148 = vector.broadcast %cst_131 : f32 to vector<16x64xf32>
    %c2_132 = arith.constant 2 : index
    %c0_133 = arith.constant 0 : index
    %149 = vector.load %arg10[%c2_132, %c0_133] : memref<24x64xf32, #tpu.memory_space<vmem>>, vector<16x64xf32>
    %150 = arith.truncf %149 : vector<16x64xf32> to vector<16x64xbf16>
    %c3_134 = arith.constant 3 : index
    %c0_135 = arith.constant 0 : index
    %c0_136 = arith.constant 0 : index
    %151 = vector.load %arg4[%c3_134, %c0_135, %c0_136] : memref<24x64x64xbf16, #tpu.memory_space<vmem>>, vector<1x64x64xbf16>
    %152 = vector.shape_cast %151 : vector<1x64x64xbf16> to vector<64x64xbf16>
    %cst_137 = arith.constant dense<0.000000e+00> : vector<16x64xf32>
    %153 = tpu.matmul %150, %152, %cst_137 {dimension_numbers = #tpu.dot_dimension_numbers<[1], [0], [0], [1], [0, 0, 1, 1], [], []>} : vector<16x64xbf16>, vector<64x64xbf16>, vector<16x64xf32> -> vector<16x64xf32>
    %154 = arith.addf %148, %153 : vector<16x64xf32>
    %c3_138 = arith.constant 3 : index
    %c0_139 = arith.constant 0 : index
    %155 = vector.load %arg10[%c3_138, %c0_139] : memref<24x64xf32, #tpu.memory_space<vmem>>, vector<16x64xf32>
    %156 = arith.truncf %155 : vector<16x64xf32> to vector<16x64xbf16>
    %c4_140 = arith.constant 4 : index
    %c0_141 = arith.constant 0 : index
    %c0_142 = arith.constant 0 : index
    %157 = vector.load %arg4[%c4_140, %c0_141, %c0_142] : memref<24x64x64xbf16, #tpu.memory_space<vmem>>, vector<1x64x64xbf16>
    %158 = vector.shape_cast %157 : vector<1x64x64xbf16> to vector<64x64xbf16>
    %cst_143 = arith.constant dense<0.000000e+00> : vector<16x64xf32>
    %159 = tpu.matmul %156, %158, %cst_143 {dimension_numbers = #tpu.dot_dimension_numbers<[1], [0], [0], [1], [0, 0, 1, 1], [], []>} : vector<16x64xbf16>, vector<64x64xbf16>, vector<16x64xf32> -> vector<16x64xf32>
    %160 = arith.addf %154, %159 : vector<16x64xf32>
    %c4_144 = arith.constant 4 : index
    %c0_145 = arith.constant 0 : index
    %161 = vector.load %arg10[%c4_144, %c0_145] : memref<24x64xf32, #tpu.memory_space<vmem>>, vector<16x64xf32>
    %162 = arith.truncf %161 : vector<16x64xf32> to vector<16x64xbf16>
    %c5_146 = arith.constant 5 : index
    %c0_147 = arith.constant 0 : index
    %c0_148 = arith.constant 0 : index
    %163 = vector.load %arg4[%c5_146, %c0_147, %c0_148] : memref<24x64x64xbf16, #tpu.memory_space<vmem>>, vector<1x64x64xbf16>
    %164 = vector.shape_cast %163 : vector<1x64x64xbf16> to vector<64x64xbf16>
    %cst_149 = arith.constant dense<0.000000e+00> : vector<16x64xf32>
    %165 = tpu.matmul %162, %164, %cst_149 {dimension_numbers = #tpu.dot_dimension_numbers<[1], [0], [0], [1], [0, 0, 1, 1], [], []>} : vector<16x64xbf16>, vector<64x64xbf16>, vector<16x64xf32> -> vector<16x64xf32>
    %166 = arith.addf %160, %165 : vector<16x64xf32>
    %c5_150 = arith.constant 5 : index
    %c0_151 = arith.constant 0 : index
    %167 = vector.load %arg10[%c5_150, %c0_151] : memref<24x64xf32, #tpu.memory_space<vmem>>, vector<16x64xf32>
    %168 = arith.truncf %167 : vector<16x64xf32> to vector<16x64xbf16>
    %c6_152 = arith.constant 6 : index
    %c0_153 = arith.constant 0 : index
    %c0_154 = arith.constant 0 : index
    %169 = vector.load %arg4[%c6_152, %c0_153, %c0_154] : memref<24x64x64xbf16, #tpu.memory_space<vmem>>, vector<1x64x64xbf16>
    %170 = vector.shape_cast %169 : vector<1x64x64xbf16> to vector<64x64xbf16>
    %cst_155 = arith.constant dense<0.000000e+00> : vector<16x64xf32>
    %171 = tpu.matmul %168, %170, %cst_155 {dimension_numbers = #tpu.dot_dimension_numbers<[1], [0], [0], [1], [0, 0, 1, 1], [], []>} : vector<16x64xbf16>, vector<64x64xbf16>, vector<16x64xf32> -> vector<16x64xf32>
    %172 = arith.addf %166, %171 : vector<16x64xf32>
    %c6_156 = arith.constant 6 : index
    %c0_157 = arith.constant 0 : index
    %173 = vector.load %arg10[%c6_156, %c0_157] : memref<24x64xf32, #tpu.memory_space<vmem>>, vector<16x64xf32>
    %174 = arith.truncf %173 : vector<16x64xf32> to vector<16x64xbf16>
    %c7_158 = arith.constant 7 : index
    %c0_159 = arith.constant 0 : index
    %c0_160 = arith.constant 0 : index
    %175 = vector.load %arg4[%c7_158, %c0_159, %c0_160] : memref<24x64x64xbf16, #tpu.memory_space<vmem>>, vector<1x64x64xbf16>
    %176 = vector.shape_cast %175 : vector<1x64x64xbf16> to vector<64x64xbf16>
    %cst_161 = arith.constant dense<0.000000e+00> : vector<16x64xf32>
    %177 = tpu.matmul %174, %176, %cst_161 {dimension_numbers = #tpu.dot_dimension_numbers<[1], [0], [0], [1], [0, 0, 1, 1], [], []>} : vector<16x64xbf16>, vector<64x64xbf16>, vector<16x64xf32> -> vector<16x64xf32>
    %178 = arith.addf %172, %177 : vector<16x64xf32>
    %179 = vector.broadcast %146 : vector<1x64xf32> to vector<16x64xf32>
    %180 = arith.addf %178, %179 : vector<16x64xf32>
    %cst_162 = arith.constant 0.000000e+00 : f32
    %181 = vector.broadcast %cst_162 : f32 to vector<16x64xf32>
    %182 = arith.maximumf %180, %181 : vector<16x64xf32>
    %c0_163 = arith.constant 0 : index
    %c320 = arith.constant 320 : index
    %183 = vector.load %arg11[%c0_163, %c320] : memref<16x512xf32, #tpu.memory_space<vmem>>, vector<16x64xf32>
    tpu.vector_store %arg11[%c0_163, %c320], %182 {strides = array<i32>} : memref<16x512xf32, #tpu.memory_space<vmem>>, vector<16x64xf32>,
    %184 = vector.extract_strided_slice %30 {offsets = [0, 384], sizes = [16, 64], strides = [1, 1]} : vector<16x512xf32> to vector<16x64xf32>
    %c5_164 = arith.constant 5 : index
    %c0_165 = arith.constant 0 : index
    %185 = vector.load %arg6[%c5_164, %c0_165] : memref<7x64xf32, #tpu.memory_space<vmem>>, vector<1x64xf32>
    %c4_166 = arith.constant 4 : index
    %c0_167 = arith.constant 0 : index
    %186 = vector.load %arg10[%c4_166, %c0_167] : memref<24x64xf32, #tpu.memory_space<vmem>>, vector<16x64xf32>
    tpu.vector_store %arg10[%c4_166, %c0_167], %184 {strides = array<i32>} : memref<24x64xf32, #tpu.memory_space<vmem>>, vector<16x64xf32>,
    %cst_168 = arith.constant 0.000000e+00 : f32
    %187 = vector.broadcast %cst_168 : f32 to vector<16x64xf32>
    %c1_169 = arith.constant 1 : index
    %c0_170 = arith.constant 0 : index
    %188 = vector.load %arg10[%c1_169, %c0_170] : memref<24x64xf32, #tpu.memory_space<vmem>>, vector<16x64xf32>
    %189 = arith.truncf %188 : vector<16x64xf32> to vector<16x64xbf16>
    %c8_171 = arith.constant 8 : index
    %c0_172 = arith.constant 0 : index
    %c0_173 = arith.constant 0 : index
    %190 = vector.load %arg4[%c8_171, %c0_172, %c0_173] : memref<24x64x64xbf16, #tpu.memory_space<vmem>>, vector<1x64x64xbf16>
    %191 = vector.shape_cast %190 : vector<1x64x64xbf16> to vector<64x64xbf16>
    %cst_174 = arith.constant dense<0.000000e+00> : vector<16x64xf32>
    %192 = tpu.matmul %189, %191, %cst_174 {dimension_numbers = #tpu.dot_dimension_numbers<[1], [0], [0], [1], [0, 0, 1, 1], [], []>} : vector<16x64xbf16>, vector<64x64xbf16>, vector<16x64xf32> -> vector<16x64xf32>
    %193 = arith.addf %187, %192 : vector<16x64xf32>
    %c2_175 = arith.constant 2 : index
    %c0_176 = arith.constant 0 : index
    %194 = vector.load %arg10[%c2_175, %c0_176] : memref<24x64xf32, #tpu.memory_space<vmem>>, vector<16x64xf32>
    %195 = arith.truncf %194 : vector<16x64xf32> to vector<16x64xbf16>
    %c9 = arith.constant 9 : index
    %c0_177 = arith.constant 0 : index
    %c0_178 = arith.constant 0 : index
    %196 = vector.load %arg4[%c9, %c0_177, %c0_178] : memref<24x64x64xbf16, #tpu.memory_space<vmem>>, vector<1x64x64xbf16>
    %197 = vector.shape_cast %196 : vector<1x64x64xbf16> to vector<64x64xbf16>
    %cst_179 = arith.constant dense<0.000000e+00> : vector<16x64xf32>
    %198 = tpu.matmul %195, %197, %cst_179 {dimension_numbers = #tpu.dot_dimension_numbers<[1], [0], [0], [1], [0, 0, 1, 1], [], []>} : vector<16x64xbf16>, vector<64x64xbf16>, vector<16x64xf32> -> vector<16x64xf32>
    %199 = arith.addf %193, %198 : vector<16x64xf32>
    %c3_180 = arith.constant 3 : index
    %c0_181 = arith.constant 0 : index
    %200 = vector.load %arg10[%c3_180, %c0_181] : memref<24x64xf32, #tpu.memory_space<vmem>>, vector<16x64xf32>
    %201 = arith.truncf %200 : vector<16x64xf32> to vector<16x64xbf16>
    %c10 = arith.constant 10 : index
    %c0_182 = arith.constant 0 : index
    %c0_183 = arith.constant 0 : index
    %202 = vector.load %arg4[%c10, %c0_182, %c0_183] : memref<24x64x64xbf16, #tpu.memory_space<vmem>>, vector<1x64x64xbf16>
    %203 = vector.shape_cast %202 : vector<1x64x64xbf16> to vector<64x64xbf16>
    %cst_184 = arith.constant dense<0.000000e+00> : vector<16x64xf32>
    %204 = tpu.matmul %201, %203, %cst_184 {dimension_numbers = #tpu.dot_dimension_numbers<[1], [0], [0], [1], [0, 0, 1, 1], [], []>} : vector<16x64xbf16>, vector<64x64xbf16>, vector<16x64xf32> -> vector<16x64xf32>
    %205 = arith.addf %199, %204 : vector<16x64xf32>
    %c4_185 = arith.constant 4 : index
    %c0_186 = arith.constant 0 : index
    %206 = vector.load %arg10[%c4_185, %c0_186] : memref<24x64xf32, #tpu.memory_space<vmem>>, vector<16x64xf32>
    %207 = arith.truncf %206 : vector<16x64xf32> to vector<16x64xbf16>
    %c11 = arith.constant 11 : index
    %c0_187 = arith.constant 0 : index
    %c0_188 = arith.constant 0 : index
    %208 = vector.load %arg4[%c11, %c0_187, %c0_188] : memref<24x64x64xbf16, #tpu.memory_space<vmem>>, vector<1x64x64xbf16>
    %209 = vector.shape_cast %208 : vector<1x64x64xbf16> to vector<64x64xbf16>
    %cst_189 = arith.constant dense<0.000000e+00> : vector<16x64xf32>
    %210 = tpu.matmul %207, %209, %cst_189 {dimension_numbers = #tpu.dot_dimension_numbers<[1], [0], [0], [1], [0, 0, 1, 1], [], []>} : vector<16x64xbf16>, vector<64x64xbf16>, vector<16x64xf32> -> vector<16x64xf32>
    %211 = arith.addf %205, %210 : vector<16x64xf32>
    %c5_190 = arith.constant 5 : index
    %c0_191 = arith.constant 0 : index
    %212 = vector.load %arg10[%c5_190, %c0_191] : memref<24x64xf32, #tpu.memory_space<vmem>>, vector<16x64xf32>
    %213 = arith.truncf %212 : vector<16x64xf32> to vector<16x64xbf16>
    %c12 = arith.constant 12 : index
    %c0_192 = arith.constant 0 : index
    %c0_193 = arith.constant 0 : index
    %214 = vector.load %arg4[%c12, %c0_192, %c0_193] : memref<24x64x64xbf16, #tpu.memory_space<vmem>>, vector<1x64x64xbf16>
    %215 = vector.shape_cast %214 : vector<1x64x64xbf16> to vector<64x64xbf16>
    %cst_194 = arith.constant dense<0.000000e+00> : vector<16x64xf32>
    %216 = tpu.matmul %213, %215, %cst_194 {dimension_numbers = #tpu.dot_dimension_numbers<[1], [0], [0], [1], [0, 0, 1, 1], [], []>} : vector<16x64xbf16>, vector<64x64xbf16>, vector<16x64xf32> -> vector<16x64xf32>
    %217 = arith.addf %211, %216 : vector<16x64xf32>
    %c6_195 = arith.constant 6 : index
    %c0_196 = arith.constant 0 : index
    %218 = vector.load %arg10[%c6_195, %c0_196] : memref<24x64xf32, #tpu.memory_space<vmem>>, vector<16x64xf32>
    %219 = arith.truncf %218 : vector<16x64xf32> to vector<16x64xbf16>
    %c13 = arith.constant 13 : index
    %c0_197 = arith.constant 0 : index
    %c0_198 = arith.constant 0 : index
    %220 = vector.load %arg4[%c13, %c0_197, %c0_198] : memref<24x64x64xbf16, #tpu.memory_space<vmem>>, vector<1x64x64xbf16>
    %221 = vector.shape_cast %220 : vector<1x64x64xbf16> to vector<64x64xbf16>
    %cst_199 = arith.constant dense<0.000000e+00> : vector<16x64xf32>
    %222 = tpu.matmul %219, %221, %cst_199 {dimension_numbers = #tpu.dot_dimension_numbers<[1], [0], [0], [1], [0, 0, 1, 1], [], []>} : vector<16x64xbf16>, vector<64x64xbf16>, vector<16x64xf32> -> vector<16x64xf32>
    %223 = arith.addf %217, %222 : vector<16x64xf32>
    %c7_200 = arith.constant 7 : index
    %c0_201 = arith.constant 0 : index
    %224 = vector.load %arg10[%c7_200, %c0_201] : memref<24x64xf32, #tpu.memory_space<vmem>>, vector<16x64xf32>
    %225 = arith.truncf %224 : vector<16x64xf32> to vector<16x64xbf16>
    %c14 = arith.constant 14 : index
    %c0_202 = arith.constant 0 : index
    %c0_203 = arith.constant 0 : index
    %226 = vector.load %arg4[%c14, %c0_202, %c0_203] : memref<24x64x64xbf16, #tpu.memory_space<vmem>>, vector<1x64x64xbf16>
    %227 = vector.shape_cast %226 : vector<1x64x64xbf16> to vector<64x64xbf16>
    %cst_204 = arith.constant dense<0.000000e+00> : vector<16x64xf32>
    %228 = tpu.matmul %225, %227, %cst_204 {dimension_numbers = #tpu.dot_dimension_numbers<[1], [0], [0], [1], [0, 0, 1, 1], [], []>} : vector<16x64xbf16>, vector<64x64xbf16>, vector<16x64xf32> -> vector<16x64xf32>
    %229 = arith.addf %223, %228 : vector<16x64xf32>
    %230 = vector.broadcast %185 : vector<1x64xf32> to vector<16x64xf32>
    %231 = arith.addf %229, %230 : vector<16x64xf32>
    %cst_205 = arith.constant 0.000000e+00 : f32
    %232 = vector.broadcast %cst_205 : f32 to vector<16x64xf32>
    %233 = arith.maximumf %231, %232 : vector<16x64xf32>
    %c0_206 = arith.constant 0 : index
    %c384 = arith.constant 384 : index
    %234 = vector.load %arg11[%c0_206, %c384] : memref<16x512xf32, #tpu.memory_space<vmem>>, vector<16x64xf32>
    tpu.vector_store %arg11[%c0_206, %c384], %233 {strides = array<i32>} : memref<16x512xf32, #tpu.memory_space<vmem>>, vector<16x64xf32>,
    %235 = vector.extract_strided_slice %30 {offsets = [0, 448], sizes = [16, 64], strides = [1, 1]} : vector<16x512xf32> to vector<16x64xf32>
    %c6_207 = arith.constant 6 : index
    %c0_208 = arith.constant 0 : index
    %236 = vector.load %arg6[%c6_207, %c0_208] : memref<7x64xf32, #tpu.memory_space<vmem>>, vector<1x64xf32>
    %c4_209 = arith.constant 4 : index
    %c0_210 = arith.constant 0 : index
    %237 = vector.load %arg10[%c4_209, %c0_210] : memref<24x64xf32, #tpu.memory_space<vmem>>, vector<16x64xf32>
    tpu.vector_store %arg10[%c4_209, %c0_210], %235 {strides = array<i32>} : memref<24x64xf32, #tpu.memory_space<vmem>>, vector<16x64xf32>,
    %cst_211 = arith.constant 0.000000e+00 : f32
    %238 = vector.broadcast %cst_211 : f32 to vector<16x64xf32>
    %c0_212 = arith.constant 0 : index
    %c0_213 = arith.constant 0 : index
    %239 = vector.load %arg10[%c0_212, %c0_213] : memref<24x64xf32, #tpu.memory_space<vmem>>, vector<16x64xf32>
    %240 = arith.truncf %239 : vector<16x64xf32> to vector<16x64xbf16>
    %c15 = arith.constant 15 : index
    %c0_214 = arith.constant 0 : index
    %c0_215 = arith.constant 0 : index
    %241 = vector.load %arg4[%c15, %c0_214, %c0_215] : memref<24x64x64xbf16, #tpu.memory_space<vmem>>, vector<1x64x64xbf16>
    %242 = vector.shape_cast %241 : vector<1x64x64xbf16> to vector<64x64xbf16>
    %cst_216 = arith.constant dense<0.000000e+00> : vector<16x64xf32>
    %243 = tpu.matmul %240, %242, %cst_216 {dimension_numbers = #tpu.dot_dimension_numbers<[1], [0], [0], [1], [0, 0, 1, 1], [], []>} : vector<16x64xbf16>, vector<64x64xbf16>, vector<16x64xf32> -> vector<16x64xf32>
    %244 = arith.addf %238, %243 : vector<16x64xf32>
    %c1_217 = arith.constant 1 : index
    %c0_218 = arith.constant 0 : index
    %245 = vector.load %arg10[%c1_217, %c0_218] : memref<24x64xf32, #tpu.memory_space<vmem>>, vector<16x64xf32>
    %246 = arith.truncf %245 : vector<16x64xf32> to vector<16x64xbf16>
    %c16 = arith.constant 16 : index
    %c0_219 = arith.constant 0 : index
    %c0_220 = arith.constant 0 : index
    %247 = vector.load %arg4[%c16, %c0_219, %c0_220] : memref<24x64x64xbf16, #tpu.memory_space<vmem>>, vector<1x64x64xbf16>
    %248 = vector.shape_cast %247 : vector<1x64x64xbf16> to vector<64x64xbf16>
    %cst_221 = arith.constant dense<0.000000e+00> : vector<16x64xf32>
    %249 = tpu.matmul %246, %248, %cst_221 {dimension_numbers = #tpu.dot_dimension_numbers<[1], [0], [0], [1], [0, 0, 1, 1], [], []>} : vector<16x64xbf16>, vector<64x64xbf16>, vector<16x64xf32> -> vector<16x64xf32>
    %250 = arith.addf %244, %249 : vector<16x64xf32>
    %c2_222 = arith.constant 2 : index
    %c0_223 = arith.constant 0 : index
    %251 = vector.load %arg10[%c2_222, %c0_223] : memref<24x64xf32, #tpu.memory_space<vmem>>, vector<16x64xf32>
    %252 = arith.truncf %251 : vector<16x64xf32> to vector<16x64xbf16>
    %c17_224 = arith.constant 17 : index
    %c0_225 = arith.constant 0 : index
    %c0_226 = arith.constant 0 : index
    %253 = vector.load %arg4[%c17_224, %c0_225, %c0_226] : memref<24x64x64xbf16, #tpu.memory_space<vmem>>, vector<1x64x64xbf16>
    %254 = vector.shape_cast %253 : vector<1x64x64xbf16> to vector<64x64xbf16>
    %cst_227 = arith.constant dense<0.000000e+00> : vector<16x64xf32>
    %255 = tpu.matmul %252, %254, %cst_227 {dimension_numbers = #tpu.dot_dimension_numbers<[1], [0], [0], [1], [0, 0, 1, 1], [], []>} : vector<16x64xbf16>, vector<64x64xbf16>, vector<16x64xf32> -> vector<16x64xf32>
    %256 = arith.addf %250, %255 : vector<16x64xf32>
    %c3_228 = arith.constant 3 : index
    %c0_229 = arith.constant 0 : index
    %257 = vector.load %arg10[%c3_228, %c0_229] : memref<24x64xf32, #tpu.memory_space<vmem>>, vector<16x64xf32>
    %258 = arith.truncf %257 : vector<16x64xf32> to vector<16x64xbf16>
    %c18 = arith.constant 18 : index
    %c0_230 = arith.constant 0 : index
    %c0_231 = arith.constant 0 : index
    %259 = vector.load %arg4[%c18, %c0_230, %c0_231] : memref<24x64x64xbf16, #tpu.memory_space<vmem>>, vector<1x64x64xbf16>
    %260 = vector.shape_cast %259 : vector<1x64x64xbf16> to vector<64x64xbf16>
    %cst_232 = arith.constant dense<0.000000e+00> : vector<16x64xf32>
    %261 = tpu.matmul %258, %260, %cst_232 {dimension_numbers = #tpu.dot_dimension_numbers<[1], [0], [0], [1], [0, 0, 1, 1], [], []>} : vector<16x64xbf16>, vector<64x64xbf16>, vector<16x64xf32> -> vector<16x64xf32>
    %262 = arith.addf %256, %261 : vector<16x64xf32>
    %c4_233 = arith.constant 4 : index
    %c0_234 = arith.constant 0 : index
    %263 = vector.load %arg10[%c4_233, %c0_234] : memref<24x64xf32, #tpu.memory_space<vmem>>, vector<16x64xf32>
    %264 = arith.truncf %263 : vector<16x64xf32> to vector<16x64xbf16>
    %c19 = arith.constant 19 : index
    %c0_235 = arith.constant 0 : index
    %c0_236 = arith.constant 0 : index
    %265 = vector.load %arg4[%c19, %c0_235, %c0_236] : memref<24x64x64xbf16, #tpu.memory_space<vmem>>, vector<1x64x64xbf16>
    %266 = vector.shape_cast %265 : vector<1x64x64xbf16> to vector<64x64xbf16>
    %cst_237 = arith.constant dense<0.000000e+00> : vector<16x64xf32>
    %267 = tpu.matmul %264, %266, %cst_237 {dimension_numbers = #tpu.dot_dimension_numbers<[1], [0], [0], [1], [0, 0, 1, 1], [], []>} : vector<16x64xbf16>, vector<64x64xbf16>, vector<16x64xf32> -> vector<16x64xf32>
    %268 = arith.addf %262, %267 : vector<16x64xf32>
    %c5_238 = arith.constant 5 : index
    %c0_239 = arith.constant 0 : index
    %269 = vector.load %arg10[%c5_238, %c0_239] : memref<24x64xf32, #tpu.memory_space<vmem>>, vector<16x64xf32>
    %270 = arith.truncf %269 : vector<16x64xf32> to vector<16x64xbf16>
    %c20_240 = arith.constant 20 : index
    %c0_241 = arith.constant 0 : index
    %c0_242 = arith.constant 0 : index
    %271 = vector.load %arg4[%c20_240, %c0_241, %c0_242] : memref<24x64x64xbf16, #tpu.memory_space<vmem>>, vector<1x64x64xbf16>
    %272 = vector.shape_cast %271 : vector<1x64x64xbf16> to vector<64x64xbf16>
    %cst_243 = arith.constant dense<0.000000e+00> : vector<16x64xf32>
    %273 = tpu.matmul %270, %272, %cst_243 {dimension_numbers = #tpu.dot_dimension_numbers<[1], [0], [0], [1], [0, 0, 1, 1], [], []>} : vector<16x64xbf16>, vector<64x64xbf16>, vector<16x64xf32> -> vector<16x64xf32>
    %274 = arith.addf %268, %273 : vector<16x64xf32>
    %c6_244 = arith.constant 6 : index
    %c0_245 = arith.constant 0 : index
    %275 = vector.load %arg10[%c6_244, %c0_245] : memref<24x64xf32, #tpu.memory_space<vmem>>, vector<16x64xf32>
    %276 = arith.truncf %275 : vector<16x64xf32> to vector<16x64xbf16>
    %c21 = arith.constant 21 : index
    %c0_246 = arith.constant 0 : index
    %c0_247 = arith.constant 0 : index
    %277 = vector.load %arg4[%c21, %c0_246, %c0_247] : memref<24x64x64xbf16, #tpu.memory_space<vmem>>, vector<1x64x64xbf16>
    %278 = vector.shape_cast %277 : vector<1x64x64xbf16> to vector<64x64xbf16>
    %cst_248 = arith.constant dense<0.000000e+00> : vector<16x64xf32>
    %279 = tpu.matmul %276, %278, %cst_248 {dimension_numbers = #tpu.dot_dimension_numbers<[1], [0], [0], [1], [0, 0, 1, 1], [], []>} : vector<16x64xbf16>, vector<64x64xbf16>, vector<16x64xf32> -> vector<16x64xf32>
    %280 = arith.addf %274, %279 : vector<16x64xf32>
    %c7_249 = arith.constant 7 : index
    %c0_250 = arith.constant 0 : index
    %281 = vector.load %arg10[%c7_249, %c0_250] : memref<24x64xf32, #tpu.memory_space<vmem>>, vector<16x64xf32>
    %282 = arith.truncf %281 : vector<16x64xf32> to vector<16x64xbf16>
    %c22 = arith.constant 22 : index
    %c0_251 = arith.constant 0 : index
    %c0_252 = arith.constant 0 : index
    %283 = vector.load %arg4[%c22, %c0_251, %c0_252] : memref<24x64x64xbf16, #tpu.memory_space<vmem>>, vector<1x64x64xbf16>
    %284 = vector.shape_cast %283 : vector<1x64x64xbf16> to vector<64x64xbf16>
    %cst_253 = arith.constant dense<0.000000e+00> : vector<16x64xf32>
    %285 = tpu.matmul %282, %284, %cst_253 {dimension_numbers = #tpu.dot_dimension_numbers<[1], [0], [0], [1], [0, 0, 1, 1], [], []>} : vector<16x64xbf16>, vector<64x64xbf16>, vector<16x64xf32> -> vector<16x64xf32>
    %286 = arith.addf %280, %285 : vector<16x64xf32>
    %c8_254 = arith.constant 8 : index
    %c0_255 = arith.constant 0 : index
    %287 = vector.load %arg10[%c8_254, %c0_255] : memref<24x64xf32, #tpu.memory_space<vmem>>, vector<16x64xf32>
    %288 = arith.truncf %287 : vector<16x64xf32> to vector<16x64xbf16>
    %c23 = arith.constant 23 : index
    %c0_256 = arith.constant 0 : index
    %c0_257 = arith.constant 0 : index
    %289 = vector.load %arg4[%c23, %c0_256, %c0_257] : memref<24x64x64xbf16, #tpu.memory_space<vmem>>, vector<1x64x64xbf16>
    %290 = vector.shape_cast %289 : vector<1x64x64xbf16> to vector<64x64xbf16>
    %cst_258 = arith.constant dense<0.000000e+00> : vector<16x64xf32>
    %291 = tpu.matmul %288, %290, %cst_258 {dimension_numbers = #tpu.dot_dimension_numbers<[1], [0], [0], [1], [0, 0, 1, 1], [], []>} : vector<16x64xbf16>, vector<64x64xbf16>, vector<16x64xf32> -> vector<16x64xf32>
    %292 = arith.addf %286, %291 : vector<16x64xf32>
    %293 = vector.broadcast %236 : vector<1x64xf32> to vector<16x64xf32>
    %294 = arith.addf %292, %293 : vector<16x64xf32>
    %cst_259 = arith.constant 0.000000e+00 : f32
    %295 = vector.broadcast %cst_259 : f32 to vector<16x64xf32>
    %296 = arith.maximumf %294, %295 : vector<16x64xf32>
    %c0_260 = arith.constant 0 : index
    %c448 = arith.constant 448 : index
    %297 = vector.load %arg11[%c0_260, %c448] : memref<16x512xf32, #tpu.memory_space<vmem>>, vector<16x64xf32>
    tpu.vector_store %arg11[%c0_260, %c448], %296 {strides = array<i32>} : memref<16x512xf32, #tpu.memory_space<vmem>>, vector<16x64xf32>,
    %c0_261 = arith.constant 0 : index
    %c0_262 = arith.constant 0 : index
    %298 = vector.load %arg11[%c0_261, %c0_262] : memref<16x512xf32, #tpu.memory_space<vmem>>, vector<16x512xf32>
    %c1_263 = arith.constant 1 : index
    %c0_264 = arith.constant 0 : index
    %299 = vector.load %arg5[%c1_263, %c0_264] : memref<8x512xf32, #tpu.memory_space<vmem>>, vector<1x512xf32>
    %300 = vector.broadcast %299 : vector<1x512xf32> to vector<16x512xf32>
    %301 = arith.mulf %298, %300 : vector<16x512xf32>
    %c2_265 = arith.constant 2 : index
    %c0_266 = arith.constant 0 : index
    %302 = vector.load %arg5[%c2_265, %c0_266] : memref<8x512xf32, #tpu.memory_space<vmem>>, vector<1x512xf32>
    %303 = vector.broadcast %302 : vector<1x512xf32> to vector<16x512xf32>
    %304 = arith.addf %301, %303 : vector<16x512xf32>
    %cst_267 = arith.constant dense<0.000000e+00> : vector<512xf32>
    %305 = vector.multi_reduction <add>, %304, %cst_267 [0] : vector<16x512xf32> to vector<512xf32>
    %306 = vector.shape_cast %305 : vector<512xf32> to vector<1x512xf32>
    %c4_268 = arith.constant 4 : index
    %c0_269 = arith.constant 0 : index
    %307 = vector.load %arg5[%c4_268, %c0_269] : memref<8x512xf32, #tpu.memory_space<vmem>>, vector<2x512xf32>
    %308 = vector.broadcast %306 : vector<1x512xf32> to vector<2x512xf32>
    %309 = arith.mulf %308, %307 : vector<2x512xf32>
    %cst_270 = arith.constant dense<0.000000e+00> : vector<2xf32>
    %310 = vector.multi_reduction <add>, %309, %cst_270 [1] : vector<2x512xf32> to vector<2xf32>
    %311 = vector.shape_cast %310 : vector<2xf32> to vector<2x1xf32>
    %c0_271 = arith.constant 0 : index
    %c0_272 = arith.constant 0 : index
    %312 = vector.load %arg7[%c0_271, %c0_272] : memref<2x1xf32, #tpu.memory_space<vmem>>, vector<2x1xf32>
    %313 = arith.addf %311, %312 : vector<2x1xf32>
    %cst_273 = arith.constant 0.000000e+00 : f32
    %314 = vector.broadcast %cst_273 : f32 to vector<2x1xf32>
    %315 = arith.maximumf %313, %314 : vector<2x1xf32>
    %c6_274 = arith.constant 6 : index
    %c0_275 = arith.constant 0 : index
    %316 = vector.load %arg5[%c6_274, %c0_275] : memref<8x512xf32, #tpu.memory_space<vmem>>, vector<2x512xf32>
    %317 = vector.broadcast %315 : vector<2x1xf32> to vector<2x512xf32>
    %318 = arith.mulf %317, %316 : vector<2x512xf32>
    %cst_276 = arith.constant dense<0.000000e+00> : vector<512xf32>
    %319 = vector.multi_reduction <add>, %318, %cst_276 [0] : vector<2x512xf32> to vector<512xf32>
    %320 = vector.shape_cast %319 : vector<512xf32> to vector<1x512xf32>
    %c3_277 = arith.constant 3 : index
    %c0_278 = arith.constant 0 : index
    %321 = vector.load %arg5[%c3_277, %c0_278] : memref<8x512xf32, #tpu.memory_space<vmem>>, vector<1x512xf32>
    %322 = arith.addf %320, %321 : vector<1x512xf32>
    %323 = arith.negf %322 : vector<1x512xf32>
    %324 = math.exp %323 : vector<1x512xf32>
    %cst_279 = arith.constant 1.000000e+00 : f32
    %325 = vector.broadcast %cst_279 : f32 to vector<1x512xf32>
    %326 = arith.addf %325, %324 : vector<1x512xf32>
    %327 = arith.divf %325, %326 : vector<1x512xf32>
    %328 = vector.broadcast %327 : vector<1x512xf32> to vector<16x512xf32>
    %329 = arith.mulf %304, %328 : vector<16x512xf32>
    %330 = arith.addf %329, %3 : vector<16x512xf32>
    %cst_280 = arith.constant 0.000000e+00 : f32
    %331 = vector.broadcast %cst_280 : f32 to vector<16x512xf32>
    %332 = arith.maximumf %330, %331 : vector<16x512xf32>
    %c0_281 = arith.constant 0 : index
    %c0_282 = arith.constant 0 : index
    %c0_283 = arith.constant 0 : index
    %333 = vector.load %arg8[%c0_281, %c0_282, %c0_283] : memref<1x16x512xf32, #tpu.memory_space<vmem>>, vector<1x16x512xf32>
    %334 = vector.shape_cast %333 : vector<1x16x512xf32> to vector<16x512xf32>
    %335 = vector.shape_cast %332 : vector<16x512xf32> to vector<1x16x512xf32>
    tpu.vector_store %arg8[%c0_281, %c0_282, %c0_283], %335 {strides = array<i32>} : memref<1x16x512xf32, #tpu.memory_space<vmem>>, vector<1x16x512xf32>,
    return
  }
  func.func @transform_0(%arg0: i32) -> (i32, i32, i32) {
    %c0_i32 = arith.constant 0 : i32
    %c0_i32_0 = arith.constant 0 : i32
    %c0_i32_1 = arith.constant 0 : i32
    return %arg0, %c0_i32, %c0_i32_0 : i32, i32, i32
  }
  func.func @transform_1(%arg0: i32) -> (i32, i32, i32) {
    %c0_i32 = arith.constant 0 : i32
    %c0_i32_0 = arith.constant 0 : i32
    %c0_i32_1 = arith.constant 0 : i32
    %c0_i32_2 = arith.constant 0 : i32
    return %c0_i32, %c0_i32_0, %c0_i32_1 : i32, i32, i32
  }
  func.func @transform_2(%arg0: i32) -> (i32, i32, i32) {
    %c0_i32 = arith.constant 0 : i32
    %c0_i32_0 = arith.constant 0 : i32
    %c0_i32_1 = arith.constant 0 : i32
    %c0_i32_2 = arith.constant 0 : i32
    return %c0_i32, %c0_i32_0, %c0_i32_1 : i32, i32, i32
  }
  func.func @transform_3(%arg0: i32) -> (i32, i32, i32) {
    %c0_i32 = arith.constant 0 : i32
    %c0_i32_0 = arith.constant 0 : i32
    %c0_i32_1 = arith.constant 0 : i32
    %c0_i32_2 = arith.constant 0 : i32
    return %c0_i32, %c0_i32_0, %c0_i32_1 : i32, i32, i32
  }
  func.func @transform_4(%arg0: i32) -> (i32, i32) {
    %c0_i32 = arith.constant 0 : i32
    %c0_i32_0 = arith.constant 0 : i32
    %c0_i32_1 = arith.constant 0 : i32
    return %c0_i32, %c0_i32_0 : i32, i32
  }
  func.func @transform_5(%arg0: i32) -> (i32, i32) {
    %c0_i32 = arith.constant 0 : i32
    %c0_i32_0 = arith.constant 0 : i32
    %c0_i32_1 = arith.constant 0 : i32
    return %c0_i32, %c0_i32_0 : i32, i32
  }
  func.func @transform_6(%arg0: i32) -> (i32, i32) {
    %c0_i32 = arith.constant 0 : i32
    %c0_i32_0 = arith.constant 0 : i32
    %c0_i32_1 = arith.constant 0 : i32
    return %c0_i32, %c0_i32_0 : i32, i32
  }
  func.func @transform_7(%arg0: i32) -> (i32, i32, i32) {
    %c0_i32 = arith.constant 0 : i32
    %c0_i32_0 = arith.constant 0 : i32
    %c0_i32_1 = arith.constant 0 : i32
    return %arg0, %c0_i32, %c0_i32_0 : i32, i32, i32
  }
}

</mosaic_0001>

<bundles_post_ra>
// kernel: res2net_forward.1
= control target key start
LH: loop header
LB: loop body
LE: loop exit
PB: predicated region body
PF: predicated region fallthrough
CT: control target
= control target key end

     0   :  { %s9008_s24 = smov 0   ;;  %s11209_s0 = inlined_call_operand.vmem [shape: f32[2,16,512], index: 0, kind: input, shape index: {}]   ;;  %s11210_s1 = inlined_call_operand.vmem [shape: bf16[3,512,512], index: 1, kind: input, shape index: {}]   ;;  %s11211_s2 = inlined_call_operand.vmem [shape: bf16[9,64,64], index: 2, kind: input, shape index: {}]   ;;  %s11212_s3 = inlined_call_operand.vmem [shape: bf16[24,64,64], index: 3, kind: input, shape index: {}]   ;;  %s11213_s4 = inlined_call_operand.vmem [shape: f32[8,512], index: 4, kind: input, shape index: {}]   ;;  %s11214_s5 = inlined_call_operand.vmem [shape: f32[7,64], index: 5, kind: input, shape index: {}]   ;;  %s11215_s6 = inlined_call_operand.vmem [shape: f32[2,1], index: 6, kind: input, shape index: {}]   ;;  %s11216_s7 = inlined_call_operand.vmem [shape: f32[2,16,512], index: 7, kind: output, shape index: {}]  }
   0x1 LB: > { %s6524_s25 = sadd.s32 4294967295, %s8962_s24   ;;  %p6528_p0 = scmp.ge.s32.totalorder %s8962_s24, 1  ;;  %s8962_s24 = sphi %s9008_s24, %s17_s24  }
   0x2   : > { %p237_p1 = scmp.lt.s32.totalorder %s8962_s24, 3 }
   0x4   : > { %p238_p2 = pnand %p6528_p0, %p237_p1 }
   0x5   : > { %v8219_v0 = vld [vmem:[%s11210_s1 + $0x404] ss:$16 sps:$4 sm:$0xff] (!%p238_p2)   ;;  %v8221_v1 = vld [vmem:[%s11210_s1 + $0x400] ss:$16 sps:$4 sm:$0xff] (!%p238_p2)   ;;  %v8236_v7 = vld [vmem:[%s11210_s1 + $0x40c] ss:$16 sps:$4 sm:$0xff] (!%p238_p2)  }
   0x6   : > { %241 = sbr.rel (%p238_p2) target bundleno = 2369 (0x941), region = 48  ;;  %1320 = vmatprep.subr.bf16.mxu0 (!%p238_p2), %v8219_v0  ;;  %v8222_v2 = vld [vmem:[%s11210_s1 + $0x424] ss:$16 sps:$4 sm:$0xff] (!%p238_p2)   ;;  %v8224_v3 = vld [vmem:[%s11210_s1 + $0x420] ss:$16 sps:$4 sm:$0xff] (!%p238_p2)   ;;  %1406 = vmatprep.subr.bf16.mxu1 (!%p238_p2), %v8236_v7  ;;  %p269_p3 = scmp.lt.s32.totalorder (!%p238_p2), %s6524_s25, 1 }
   0x7   : > { %1321 = vmatpush1.bf16.msra.mxu0 (!%p238_p2), %v8221_v1  ;;  %v8225_v4 = vld [vmem:[%s11210_s1 + $0x444] ss:$16 sps:$4 sm:$0xff] (!%p238_p2)   ;;  %v8227_v5 = vld [vmem:[%s11210_s1 + $0x440] ss:$16 sps:$4 sm:$0xff] (!%p238_p2)   ;;  %v8239_v8 = vld [vmem:[%s11210_s1 + $0x408] ss:$16 sps:$4 sm:$0xff] (!%p238_p2)  }
   0x8   : > { %1322 = vmatprep.subr.bf16.mxu0 (!%p238_p2), %v8222_v2  ;;  %v8228_v6 = vld [vmem:[%s11210_s1 + $0x464] ss:$16 sps:$4 sm:$0xff] (!%p238_p2)   ;;  %v8230_v9 = vld [vmem:[%s11210_s1 + $0x460] ss:$16 sps:$4 sm:$0xff] (!%p238_p2)   ;;  %1407 = vmatpush1.bf16.msra.mxu1 (!%p238_p2), %v8239_v8  ;;  %v8242_v10 = vld [vmem:[%s11210_s1 + $0x42c] ss:$16 sps:$4 sm:$0xff] (!%p238_p2)  }
   0x9   : > { %v8245_v11 = vld [vmem:[%s11210_s1 + $0x428] ss:$16 sps:$4 sm:$0xff] (!%p238_p2)   ;;  %v8231_v12 = vld [vmem:[%s11210_s1 + $0x484] ss:$16 sps:$4 sm:$0xff] (!%p238_p2)   ;;  %1408 = vmatprep.subr.bf16.mxu1 (!%p238_p2), %v8242_v10  ;;  %v8248_v13 = vld [vmem:[%s11210_s1 + $0x44c] ss:$16 sps:$4 sm:$0xff] (!%p238_p2)  }
   0xa   : > { %v8233_v14 = vld [vmem:[%s11210_s1 + $0x480] ss:$16 sps:$4 sm:$0xff] (!%p238_p2)   ;;  %v8251_v15 = vld [vmem:[%s11210_s1 + $0x448] ss:$16 sps:$4 sm:$0xff] (!%p238_p2)   ;;  %v8234_v16 = vld [vmem:[%s11210_s1 + $0x4a4] ss:$16 sps:$4 sm:$0xff] (!%p238_p2)  }
   0xb   : > { %1323 = vmatpush1.bf16.msra.mxu0 (!%p238_p2), %v8224_v3  ;;  %v8254_v17 = vld [vmem:[%s11210_s1 + $0x46c] ss:$16 sps:$4 sm:$0xff] (!%p238_p2)   ;;  %v8238_v18 = vld [vmem:[%s11210_s1 + $0x4a0] ss:$16 sps:$4 sm:$0xff] (!%p238_p2)   ;;  %v8240_v19 = vld [vmem:[%s11210_s1 + $0x4c4] ss:$16 sps:$4 sm:$0xff] (!%p238_p2)  }
   0xc   : > { %1324 = vmatprep.subr.bf16.mxu0 (!%p238_p2), %v8225_v4  ;;  %1409 = vmatpush1.bf16.msra.mxu1 (!%p238_p2), %v8245_v11  ;;  %v8257_v20 = vld [vmem:[%s11210_s1 + $0x468] ss:$16 sps:$4 sm:$0xff] (!%p238_p2)   ;;  %v8260_v21 = vld [vmem:[%s11210_s1 + $0x48c] ss:$16 sps:$4 sm:$0xff] (!%p238_p2)   ;;  %v8244_v22 = vld [vmem:[%s11210_s1 + $0x4c0] ss:$16 sps:$4 sm:$0xff] (!%p238_p2)  }
   0xd   : > { %1410 = vmatprep.subr.bf16.mxu1 %v8248_v13  ;;  %v8263_v23 = vld [vmem:[%s11210_s1 + $0x488] ss:$16 sps:$4 sm:$0xff]   ;;  %v8246_v24 = vld [vmem:[%s11210_s1 + $0x4e4] ss:$16 sps:$4 sm:$0xff]   ;;  %v8266_v25 = vld [vmem:[%s11210_s1 + $0x4ac] ss:$16 sps:$4 sm:$0xff]  }
   0xe   : > { %s11218_s25 = smov (!%p269_p3, %s6524_s25), 1  ;;  %v8250_v26 = vld [vmem:[%s11210_s1 + $0x4e0] ss:$16 sps:$4 sm:$0xff]   ;;  %v8252_v27 = vld [vmem:[%s11210_s1 + $0x504] ss:$16 sps:$4 sm:$0xff]   ;;  %vm305_vm0 = vcmask 1040384  }
   0xf   : > { %1325 = vmatpush1.bf16.msra.mxu0 %v8227_v5  ;;  %v8269_v28 = vld [vmem:[%s11210_s1 + $0x4a8] ss:$16 sps:$4 sm:$0xff]   ;;  %v8272_v29 = vld [vmem:[%s11210_s1 + $0x4cc] ss:$16 sps:$4 sm:$0xff]   ;;  %v8256_v30 = vld [vmem:[%s11210_s1 + $0x500] ss:$16 sps:$4 sm:$0xff]  }
  0x10   : > { %1326 = vmatprep.subr.bf16.mxu0 %v8228_v6  ;;  %1411 = vmatpush1.bf16.msra.mxu1 %v8251_v15  ;;  %s7602_s23 = sshll.u32 %s11218_s25, 6  ;;  %v8275_v31 = vld [vmem:[%s11210_s1 + $0x4c8] ss:$16 sps:$4 sm:$0xff]   ;;  %v8258_v32 = vld [vmem:[%s11210_s1 + $0x524] ss:$16 sps:$4 sm:$0xff]   ;;  %vm2457_vm3 = vcmask 1046528  }
  0x11   : > { %1412 = vmatprep.subr.bf16.mxu1 %v8254_v17  ;;  %v8278_v33 = vld [vmem:[%s11210_s1 + $0x4ec] ss:$16 sps:$4 sm:$0xff]   ;;  %s9130_s11 = scalar_lea.vmem %s11209_s0, %s7602_s23  ;;  %v8262_v34 = vld [vmem:[%s11210_s1 + $0x520] ss:$16 sps:$4 sm:$0xff]   ;;  %v8264_v35 = vld [vmem:[%s11210_s1 + $0x544] ss:$16 sps:$4 sm:$0xff]   ;;  %s278_s28 = scalar_lea.vmem %s11216_s7, %s7602_s23 }
  0x12   : > { %v8281_v36 = vld [vmem:[%s11210_s1 + $0x4e8] ss:$16 sps:$4 sm:$0xff]   ;;  %v8284_v37 = vld [vmem:[%s11210_s1 + $0x50c] ss:$16 sps:$4 sm:$0xff]   ;;  %v8268_v42 = vld [vmem:[%s11210_s1 + $0x540] ss:$16 sps:$4 sm:$0xff]  }
  0x13   : > { %1327 = vmatpush1.bf16.msra.mxu0 %v8230_v9  ;;  %v281_v38 = vld [vmem:[%s9130_s11 + $0x8] sm:$0xff]  ;;  %v8270_v43 = vld [vmem:[%s11210_s1 + $0x564] ss:$16 sps:$4 sm:$0xff]   ;;  %v8274_v51 = vld [vmem:[%s11210_s1 + $0x560] ss:$16 sps:$4 sm:$0xff]   ;;  %vm3332_vm4 = vcmask 519168  }
  0x14   : > { %1328 = vmatprep.subr.bf16.mxu0 %v8231_v12  ;;  %1413 = vmatpush1.bf16.msra.mxu1 %v8257_v20  ;;  %v285_v39 = vld [vmem:[%s9130_s11 + $0x28] sm:$0xff]  ;;  %v307_v40 = vrot.slane %v281_v38, 7  ;;  %v280_v46 = vld [vmem:[%s9130_s11] sm:$0xff]  ;;  %vm627_vm1 = vsmask.f32 7424  ;;  %vm3335_vm5 = vcmask 523264  }
  0x15   : > { %1414 = vmatprep.subr.bf16.mxu1 %v8260_v21  ;;  %v312_v41 = vrot.slane %v285_v39, 7  ;;  %v8287_v44 = vld [vmem:[%s11210_s1 + $0x508] ss:$16 sps:$4 sm:$0xff]   ;;  %v284_v47 = vld [vmem:[%s9130_s11 + $0x20] sm:$0xff]  ;;  %v8290_v48 = vld [vmem:[%s11210_s1 + $0x52c] ss:$16 sps:$4 sm:$0xff]  }
  0x16   : > { %331 = vst [vmem:[#allocation2 + $0x8] sm:$0xfe] %v307_v40  ;;  %v306_v49 = vrot.slane %v280_v46, 7  ;;  %v310_v50 = vrot.slane %v284_v47, 7  ;;  %v8276_v53 = vld [vmem:[%s11210_s1 + $0x584] ss:$16 sps:$4 sm:$0xff]  }
  0x17   : > { %1329 = vmatpush1.bf16.msra.mxu0 %v8233_v14  ;;  %v9156_v45 = vsel %vm305_vm0, %v307_v40, %v312_v41  ;;  %339 = vst [vmem:[#allocation2 + $0x48] sm:$0x1] %v312_v41  ;;  %v8293_v54 = vld [vmem:[%s11210_s1 + $0x528] ss:$16 sps:$4 sm:$0xff]   ;;  %v8296_v55 = vld [vmem:[%s11210_s1 + $0x54c] ss:$16 sps:$4 sm:$0xff]  }
  0x18   : > { %1330 = vmatprep.subr.bf16.mxu0 %v8234_v16  ;;  %1415 = vmatpush1.bf16.msra.mxu1 %v8263_v23  ;;  %335 = vst [vmem:[#allocation2 + $0x28] sm:$0xff] %v9156_v45  ;;  %v311_v52 = vsel %vm305_vm0, %v306_v49, %v310_v50  ;;  %330 = vst [vmem:[#allocation2] sm:$0xfe] %v306_v49  ;;  %v8280_v56 = vld [vmem:[%s11210_s1 + $0x580] ss:$16 sps:$4 sm:$0xff]   ;;  %v288_v16 = vlaneseq  ;;  %vm8965_vm6 = vmmov 0  }
  0x19   : > { %1416 = vmatprep.subr.bf16.mxu1 %v8266_v25  ;;  %338 = vst [vmem:[#allocation2 + $0x40] sm:$0x1] %v310_v50  ;;  %334 = vst [vmem:[#allocation2 + $0x20] sm:$0xff] %v311_v52  ;;  %v8299_v59 = vld [vmem:[%s11210_s1 + $0x548] ss:$16 sps:$4 sm:$0xff]   ;;  %s8966_s30 = smov 64  }
  0x1a   : > { %v8282_v62 = vld [vmem:[%s11210_s1 + $0x5a4] ss:$16 sps:$4 sm:$0xff]   ;;  %v8303_v63 = vld [vmem:[%s11210_s1 + $0x56c] ss:$16 sps:$4 sm:$0xff]   ;;  %v8286_v4 = vld [vmem:[%s11210_s1 + $0x5a0] ss:$16 sps:$4 sm:$0xff]  }
  0x1b   : > { %1331 = vmatpush1.bf16.msra.mxu0 %v8238_v18  ;;  %v8305_v10 = vld [vmem:[%s11210_s1 + $0x568] ss:$16 sps:$4 sm:$0xff]   ;;  %v8288_v11 = vld [vmem:[%s11210_s1 + $0x5c4] ss:$16 sps:$4 sm:$0xff]   ;;  %v8292_v13 = vld [vmem:[%s11210_s1 + $0x5c0] ss:$16 sps:$4 sm:$0xff]  }
  0x1c   : > { %1332 = vmatprep.subr.bf16.mxu0 %v8240_v19  ;;  %1417 = vmatpush1.bf16.msra.mxu1 %v8269_v28  ;;  %v8309_v15 = vld [vmem:[%s11210_s1 + $0x58c] ss:$16 sps:$4 sm:$0xff]   ;;  %v8294_v17 = vld [vmem:[%s11210_s1 + $0x5e4] ss:$16 sps:$4 sm:$0xff]   ;;  %v8311_v19 = vld [vmem:[%s11210_s1 + $0x588] ss:$16 sps:$4 sm:$0xff]  }
  0x1d   : > { %1418 = vmatprep.subr.bf16.mxu1 %v8272_v29  ;;  %v483_v57 = vld [vmem:[#allocation2 + $0x8] sm:$0xfe]  ;;  %vm290_vm2 = vcmp.lt.s32.totalorder %v288_v16, 512  ;;  %v8298_v25 = vld [vmem:[%s11210_s1 + $0x5e0] ss:$16 sps:$4 sm:$0xff]   ;;  %vm3606_vm7 = vcmask 1048064  }
  0x1e   : > { %v487_v58 = vld [vmem:[#allocation2 + $0x48] sm:$0x1]  ;;  %v491_v60 = vpack.c.bf16 %v9156_v45, %v483_v57  ;;  %v8315_v23 = vld [vmem:[%s11210_s1 + $0x5ac] ss:$16 sps:$4 sm:$0xff]   ;;  %v8312_v40 = vld [vmem:[%s11210_s1 + $0x640] ss:$16 sps:$4 sm:$0xff]  }
  0x1f   : > { %1333 = vmatpush1.bf16.msra.mxu0 %v8244_v22  ;;  %v495_v61 = vpack.c.bf16 %v487_v58, %v487_v58  ;;  %v482_v3 = vld [vmem:[#allocation2] sm:$0xfe]  ;;  %v8317_v29 = vld [vmem:[%s11210_s1 + $0x5a8] ss:$16 sps:$4 sm:$0xff]   ;;  %v8335_v39 = vld [vmem:[%s11210_s1 + $0x60c] ss:$16 sps:$4 sm:$0xff]  }
  0x20   : > { %1334 = vmatprep.subr.bf16.mxu0 %v8246_v24  ;;  %1419 = vmatpush1.bf16.msra.mxu1 %v8275_v31  ;;  %v641_v0 = vshrl.u32 %v491_v60, 16  ;;  %v643_v1 = vshll.u32 %v491_v60, 16  ;;  %v486_v5 = vld [vmem:[#allocation2 + $0x40] sm:$0x1]  ;;  %v490_v6 = vpack.c.bf16 %v311_v52, %v482_v3  ;;  %v8964_v24 = vmov 0.0  }
  0x21   : > { %1420 = vmatprep.subr.bf16.mxu1 %v8278_v33  ;;  %v648_v2 = vshll.u32 %v495_v61, 16  ;;  %v494_v9 = vpack.c.bf16 %v486_v5, %v486_v5  ;;  %292 = vst.msk [vmem:[#allocation2] ss:$8 sm:$0xf] %vm290_vm2, %v8964_v24  ;;  %v8300_v31 = vld [vmem:[%s11210_s1 + $0x600] ss:$16 sps:$4 sm:$0xff]  }
  0x22   : > { %v645_v7 = vrot.slane %v643_v1, 1  ;;  %v631_v12 = vshll.u32 %v490_v6, 16  ;;  %v629_v18 = vshrl.u32 %v490_v6, 16  ;;  %295 = vst.msk [vmem:[#allocation2 + $0x41] ss:$8 sm:$0xf] %vm290_vm2, %v8964_v24 }
  0x23   : > { %1335 = vmatpush1.bf16.msra.mxu0 %v8250_v26  ;;  %v650_v8 = vrot.slane %v648_v2, 1  ;;  %v636_v22 = vshll.u32 %v494_v9, 16  ;;  %v8302_v26 = vld [vmem:[%s11210_s1 + $0x604] ss:$16 sps:$4 sm:$0xff]   ;;  %v8329_v38 = vld [vmem:[%s11210_s1 + $0x5e8] ss:$16 sps:$4 sm:$0xff]  }
  0x24   : > { %1336 = vmatprep.subr.bf16.mxu0 %v8252_v27  ;;  %1421 = vmatpush1.bf16.msra.mxu1 %v8281_v36  ;;  %v646_v14 = vor.u32 %v645_v7, %v641_v0  ;;  %v633_v21 = vrot.slane %v631_v12, 1  ;;  %v8306_v36 = vld [vmem:[%s11210_s1 + $0x620] ss:$16 sps:$4 sm:$0xff]   ;;  %v8320_v41 = vld [vmem:[%s11210_s1 + $0x664] ss:$16 sps:$4 sm:$0xff]   ;;  %vm6288_vm8 = vcmask 1045508  }
  0x25   : > { %1422 = vmatprep.subr.bf16.mxu1 %v8284_v37  ;;  %v638_v28 = vrot.slane %v636_v22, 1  ;;  %v8314_v37 = vld [vmem:[%s11210_s1 + $0x644] ss:$16 sps:$4 sm:$0xff]   ;;  %v8339_v47 = vld [vmem:[%s11210_s1 + $0x628] ss:$16 sps:$4 sm:$0xff]   ;;  %vm6341_vm9 = vcmask 1041408  }
  0x26   : > { %v651_v20 = vsel %vm627_vm1, %v646_v14, %v650_v8  ;;  %v634_v27 = vor.u32 %v633_v21, %v629_v18  ;;  %v8326_v46 = vld [vmem:[%s11210_s1 + $0x684] ss:$16 sps:$4 sm:$0xff]   ;;  %v8324_v49 = vld [vmem:[%s11210_s1 + $0x680] ss:$16 sps:$4 sm:$0xff]   ;;  %v8353_v52 = vld [vmem:[%s11210_s1 + $0x66c] ss:$16 sps:$4 sm:$0xff]  }
  0x27   : > { %1337 = vmatpush1.bf16.msra.mxu0 %v8256_v30  ;;  %1352 = vmatprep.mubr.bf16.mxu0 %v651_v20  ;;  %v8321_v30 = vld [vmem:[%s11210_s1 + $0x5cc] ss:$16 sps:$4 sm:$0xff]   ;;  %v8332_v50 = vld [vmem:[%s11210_s1 + $0x6a4] ss:$16 sps:$4 sm:$0xff]   ;;  %v8351_v57 = vld [vmem:[%s11210_s1 + $0x668] ss:$16 sps:$4 sm:$0xff]  }
  0x28   : > { %1338 = vmatprep.subr.bf16.mxu0 %v8258_v32  ;;  %1423 = vmatpush1.bf16.msra.mxu1 %v8287_v44  ;;  %v8308_v32 = vld [vmem:[%s11210_s1 + $0x624] ss:$16 sps:$4 sm:$0xff]   ;;  %v639_v33 = vsel %vm627_vm1, %v634_v27, %v638_v28  ;;  %v8318_v44 = vld [vmem:[%s11210_s1 + $0x660] ss:$16 sps:$4 sm:$0xff]   ;;  %v8359_v60 = vld [vmem:[%s11210_s1 + $0x68c] ss:$16 sps:$4 sm:$0xff]  }
  0x29   : > { %1424 = vmatprep.subr.bf16.mxu1 %v8290_v48  ;;  %1438 = vmatprep.mubr.bf16.mxu1 %v651_v20  ;;  %v8347_v48 = vld [vmem:[%s11210_s1 + $0x64c] ss:$16 sps:$4 sm:$0xff]   ;;  %v8336_v0 = vld [vmem:[%s11210_s1 + $0x6c0] ss:$16 sps:$4 sm:$0xff]   ;;  %v8344_v3 = vld [vmem:[%s11210_s1 + $0x6e4] ss:$16 sps:$4 sm:$0xff]  }
  0x2a   : > { %v8365_v5 = vld [vmem:[%s11210_s1 + $0x6ac] ss:$16 sps:$4 sm:$0xff]   ;;  %v8342_v7 = vld [vmem:[%s11210_s1 + $0x6e0] ss:$16 sps:$4 sm:$0xff]   ;;  %v8363_v8 = vld [vmem:[%s11210_s1 + $0x6a8] ss:$16 sps:$4 sm:$0xff]  }
  0x2b   : > { %1339 = vmatpush1.bf16.msra.mxu0 %v8262_v34  ;;  %v8323_v34 = vld [vmem:[%s11210_s1 + $0x5c8] ss:$16 sps:$4 sm:$0xff]   ;;  %v8348_v18 = vld [vmem:[%s11210_s1 + $0x700] ss:$16 sps:$4 sm:$0xff]   ;;  %v8356_v21 = vld [vmem:[%s11210_s1 + $0x724] ss:$16 sps:$4 sm:$0xff]  }
  0x2c   : > { %1340 = vmatprep.subr.bf16.mxu0 %v8264_v35  ;;  %1425 = vmatpush1.bf16.msra.mxu1 %v8293_v54  ;;  %v8327_v35 = vld [vmem:[%s11210_s1 + $0x5ec] ss:$16 sps:$4 sm:$0xff]   ;;  %v8375_v28 = vld [vmem:[%s11210_s1 + $0x6e8] ss:$16 sps:$4 sm:$0xff]   ;;  %3333 = vst.msk [vmem:[#allocation3] sm:$0xf] %vm3332_vm4, %v8964_v24 }
  0x2d   : > { %1426 = vmatprep.subr.bf16.mxu1 %v8296_v55  ;;  %v287_v54 = vld [vmem:[%s9130_s11 + $0x38] sm:$0xff]  ;;  %3334 = vst.msk [vmem:[#allocation3 + $0x14] sm:$0xf] %vm3332_vm4, %v8964_v24 }
  0x2e   : > { %v316_v58 = vrot.slane %v287_v54, 7  ;;  %v8377_v22 = vld [vmem:[%s11210_s1 + $0x6ec] ss:$16 sps:$4 sm:$0xff]   ;;  %v8384_v54 = vld [vmem:[%s11210_s1 + $0x7c0] ss:$16 sps:$4 sm:$0xff]  }
  0x2f   : > { %1341 = vmatpush1.bf16.msra.mxu0 %v8268_v42  ;;  %v8333_v42 = vld [vmem:[%s11210_s1 + $0x608] ss:$16 sps:$4 sm:$0xff]  }
  0x30   : > { %1342 = vmatprep.subr.bf16.mxu0 %v8270_v43  ;;  %1427 = vmatpush1.bf16.msra.mxu1 %v8299_v59  ;;  %v8341_v43 = vld [vmem:[%s11210_s1 + $0x62c] ss:$16 sps:$4 sm:$0xff]   ;;  %v8338_v59 = vld [vmem:[%s11210_s1 + $0x6c4] ss:$16 sps:$4 sm:$0xff]   ;;  %341 = vst [vmem:[#allocation2 + $0x58] sm:$0x1] %v316_v58 }
  0x31   : > { %1428 = vmatprep.subr.bf16.mxu1 %v8303_v63  ;;  %v286_v63 = vld [vmem:[%s9130_s11 + $0x30] sm:$0xff] }
  0x32   : > { %v314_v2 = vrot.slane %v286_v63, 7 }
  0x33   : > { %1343 = vmatpush1.bf16.msra.mxu0 %v8274_v51  ;;  %v8345_v51 = vld [vmem:[%s11210_s1 + $0x648] ss:$16 sps:$4 sm:$0xff]  }
  0x34   : > { %1344 = vmatprep.subr.bf16.mxu0 %v8276_v53  ;;  %1429 = vmatpush1.bf16.msra.mxu1 %v8305_v10  ;;  %v283_v53 = vld [vmem:[%s9130_s11 + $0x18] sm:$0xff]  ;;  %340 = vst [vmem:[#allocation2 + $0x50] sm:$0x1] %v314_v2  ;;  %v8350_v10 = vld [vmem:[%s11210_s1 + $0x704] ss:$16 sps:$4 sm:$0xff]  }
  0x35   : > { %1430 = vmatprep.subr.bf16.mxu1 %v8309_v15  ;;  %v309_v55 = vrot.slane %v283_v53, 7  ;;  %v8404_v53 = vld [vmem:[%s11210_s1 + $0x78c] ss:$16 sps:$4 sm:$0xff]  }
  0x37   : > { %1345 = vmatpush1.bf16.msra.mxu0 %v8280_v56  ;;  %v8330_v56 = vld [vmem:[%s11210_s1 + $0x6a0] ss:$16 sps:$4 sm:$0xff]   ;;  %333 = vst [vmem:[#allocation2 + $0x18] sm:$0xfe] %v309_v55  ;;  %v9306_v61 = vsel %vm305_vm0, %v309_v55, %v316_v58  ;;  %v489_v12 = vld [vmem:[#allocation2 + $0x58] sm:$0x1] }
  0x38   : > { %1346 = vmatprep.subr.bf16.mxu0 %v8282_v62  ;;  %1431 = vmatpush1.bf16.msra.mxu1 %v8311_v19  ;;  %v282_v62 = vld [vmem:[%s9130_s11 + $0x10] sm:$0xff]  ;;  %337 = vst [vmem:[#allocation2 + $0x38] sm:$0xff] %v9306_v61  ;;  %v497_v14 = vpack.c.bf16 %v489_v12, %v489_v12  ;;  %v8369_v19 = vld [vmem:[%s11210_s1 + $0x6c8] ss:$16 sps:$4 sm:$0xff]  }
  0x39   : > { %1432 = vmatprep.subr.bf16.mxu1 %v8315_v23  ;;  %v308_v1 = vrot.slane %v282_v62, 7  ;;  %v8402_v58 = vld [vmem:[%s11210_s1 + $0x788] ss:$16 sps:$4 sm:$0xff]   ;;  %v8390_v62 = vld [vmem:[%s11210_s1 + $0x7e0] ss:$16 sps:$4 sm:$0xff]  }
  0x3a   : > { %v672_v20 = vshll.u32 %v497_v14, 16  ;;  %v8413_v12 = vld [vmem:[%s11210_s1 + $0x44] ss:$16 sps:$4 sm:$0xff]   ;;  %v8411_v14 = vld [vmem:[%s11210_s1 + $0x40] ss:$16 sps:$4 sm:$0xff]  }
  0x3b   : > { %1347 = vmatpush1.bf16.msra.mxu0 %v8286_v4  ;;  %v8357_v4 = vld [vmem:[%s11210_s1 + $0x688] ss:$16 sps:$4 sm:$0xff]   ;;  %v9324_v6 = vsel %vm305_vm0, %v308_v1, %v314_v2  ;;  %332 = vst [vmem:[#allocation2 + $0x10] sm:$0xfe] %v308_v1  ;;  %v8401_v2 = vld [vmem:[%s11210_s1 + $0x4] ss:$16 sps:$4 sm:$0xff]  }
  0x3c   : > { %1348 = vmatprep.subr.bf16.mxu0 %v8288_v11  ;;  %1433 = vmatpush1.bf16.msra.mxu1 %v8317_v29  ;;  %336 = vst [vmem:[#allocation2 + $0x30] sm:$0xff] %v9324_v6  ;;  %v8371_v11 = vld [vmem:[%s11210_s1 + $0x6cc] ss:$16 sps:$4 sm:$0xff]   ;;  %v8362_v29 = vld [vmem:[%s11210_s1 + $0x744] ss:$16 sps:$4 sm:$0xff]  }
  0x3d   : > { %1434 = vmatprep.subr.bf16.mxu1 %v8321_v30  ;;  %v8383_v30 = vld [vmem:[%s11210_s1 + $0x70c] ss:$16 sps:$4 sm:$0xff]   ;;  %v8408_v1 = vld [vmem:[%s11210_s1 + $0x7a8] ss:$16 sps:$4 sm:$0xff]  }
  0x3e   : > { %v485_v9 = vld [vmem:[#allocation2 + $0x18] sm:$0xfe] }
  0x3f   : > { %1349 = vmatpush1.bf16.msra.mxu0 %v8292_v13  ;;  %v493_v13 = vpack.c.bf16 %v9306_v61, %v485_v9  ;;  %v8422_v9 = vld [vmem:[%s11210_s1 + $0x7ec] ss:$16 sps:$4 sm:$0xff]  }
  0x40   : > { %1350 = vmatprep.subr.bf16.mxu0 %v8294_v17  ;;  %1435 = vmatpush1.bf16.msra.mxu1 %v8323_v34  ;;  %v8368_v34 = vld [vmem:[%s11210_s1 + $0x764] ss:$16 sps:$4 sm:$0xff]  }
  0x41   : > { %1436 = vmatprep.subr.bf16.mxu1 %v8327_v35  ;;  %v665_v15 = vshrl.u32 %v493_v13, 16  ;;  %v667_v17 = vshll.u32 %v493_v13, 16  ;;  %v8389_v35 = vld [vmem:[%s11210_s1 + $0x72c] ss:$16 sps:$4 sm:$0xff]   ;;  %v8420_v13 = vld [vmem:[%s11210_s1 + $0x7e8] ss:$16 sps:$4 sm:$0xff]  }
  0x43   : > { %1351 = vmatpush1.bf16.msra.mxu0 %v8298_v25  ;;  %v669_v23 = vrot.slane %v667_v17, 1  ;;  %v674_v25 = vrot.slane %v672_v20, 1  ;;  %v8429_v17 = vld [vmem:[%s11210_s1 + $0x8] ss:$16 sps:$4 sm:$0xff]   ;;  %v8425_v20 = vld [vmem:[%s11210_s1 + $0x84] ss:$16 sps:$4 sm:$0xff]  }
  0x44   : > { %1363 = vmatprep.subr.bf16.mxu0 %v8302_v26  ;;  %1437 = vmatpush1.bf16.msra.mxu1 %v8329_v38  ;;  %v8354_v26 = vld [vmem:[%s11210_s1 + $0x720] ss:$16 sps:$4 sm:$0xff]   ;;  %v8387_v38 = vld [vmem:[%s11210_s1 + $0x728] ss:$16 sps:$4 sm:$0xff]  }
  0x45   : > { %1449 = vmatprep.subr.bf16.mxu1 %v8335_v39  ;;  %v670_v27 = vor.u32 %v669_v23, %v665_v15  ;;  %v8395_v39 = vld [vmem:[%s11210_s1 + $0x74c] ss:$16 sps:$4 sm:$0xff]   ;;  %v8419_v15 = vld [vmem:[%s11210_s1 + $0x64] ss:$16 sps:$4 sm:$0xff]   ;;  %v8423_v23 = vld [vmem:[%s11210_s1 + $0x80] ss:$16 sps:$4 sm:$0xff]  }
  0x46   : > { %1353 = vmatmul.mubr.bf16.vlgmr.msra.gmra.mrb[0].mxu0 %v639_v33 }
  0x47   : > { %1364 = vmatpush1.bf16.msra.mxu0 %v8300_v31  ;;  %1439 = vmatmul.mubr.bf16.vlgmr.msra.gmra.mrb[0].mxu1 %v639_v33  ;;  %v675_v31 = vsel %vm627_vm1, %v670_v27, %v674_v25  ;;  %v8381_v33 = vld [vmem:[%s11210_s1 + $0x708] ss:$16 sps:$4 sm:$0xff]   ;;  %v8428_v25 = vld [vmem:[%s11210_s1 + $0xa4] ss:$16 sps:$4 sm:$0xff]   ;;  %v8449_v27 = vld [vmem:[%s11210_s1 + $0x6c] ss:$16 sps:$4 sm:$0xff]  }
  0x48   : > { %1365 = vmatprep.subr.bf16.mxu0 %v8308_v32  ;;  %1450 = vmatpush1.bf16.msra.mxu1 %v8333_v42  ;;  %v8360_v32 = vld [vmem:[%s11210_s1 + $0x740] ss:$16 sps:$4 sm:$0xff]   ;;  %v8380_v42 = vld [vmem:[%s11210_s1 + $0x7a4] ss:$16 sps:$4 sm:$0xff]  }
  0x49   : > { %1451 = vmatprep.subr.bf16.mxu1 %v8341_v43  ;;  %1395 = vmatprep.mubr.bf16.mxu0 %v675_v31  ;;  %v8393_v43 = vld [vmem:[%s11210_s1 + $0x748] ss:$16 sps:$4 sm:$0xff]  }
  0x4a   : > { %1481 = vmatprep.mubr.bf16.mxu1 %v675_v31  ;;  %v8455_v31 = vld [vmem:[%s11210_s1 + $0x8c] ss:$16 sps:$4 sm:$0xff]  }
  0x4b   : > { %1366 = vmatpush1.bf16.msra.mxu0 %v8306_v36  ;;  %v8366_v36 = vld [vmem:[%s11210_s1 + $0x760] ss:$16 sps:$4 sm:$0xff]  }
  0x4c   : > { %1367 = vmatprep.subr.bf16.mxu0 %v8314_v37  ;;  %1452 = vmatpush1.bf16.msra.mxu1 %v8339_v47  ;;  %v8374_v37 = vld [vmem:[%s11210_s1 + $0x784] ss:$16 sps:$4 sm:$0xff]   ;;  %v488_v47 = vld [vmem:[#allocation2 + $0x50] sm:$0x1] }
  0x4d   : > { %1453 = vmatprep.subr.bf16.mxu1 %v8347_v48  ;;  %v8378_v48 = vld [vmem:[%s11210_s1 + $0x7a0] ss:$16 sps:$4 sm:$0xff]  }
  0x4f   : > { %1368 = vmatpush1.bf16.msra.mxu0 %v8312_v40  ;;  %v484_v40 = vld [vmem:[#allocation2 + $0x10] sm:$0xfe] }
  0x50   : > { %1369 = vmatprep.subr.bf16.mxu0 %v8320_v41  ;;  %1454 = vmatpush1.bf16.msra.mxu1 %v8345_v51  ;;  %v8372_v41 = vld [vmem:[%s11210_s1 + $0x780] ss:$16 sps:$4 sm:$0xff]  }
  0x51   : > { %1455 = vmatprep.subr.bf16.mxu1 %v8353_v52  ;;  %v8386_v52 = vld [vmem:[%s11210_s1 + $0x7c4] ss:$16 sps:$4 sm:$0xff]  }
  0x53   : > { %1370 = vmatpush1.bf16.msra.mxu0 %v8318_v44  ;;  %v492_v44 = vpack.c.bf16 %v9324_v6, %v484_v40  ;;  %v8407_v6 = vld [vmem:[%s11210_s1 + $0x24] ss:$16 sps:$4 sm:$0xff]   ;;  %v8444_v40 = vld [vmem:[%s11210_s1 + $0x100] ss:$16 sps:$4 sm:$0xff]  }
  0x54   : > { %1371 = vmatprep.subr.bf16.mxu0 %v8326_v46  ;;  %1456 = vmatpush1.bf16.msra.mxu1 %v8351_v57  ;;  %v8398_v46 = vld [vmem:[%s11210_s1 + $0x76c] ss:$16 sps:$4 sm:$0xff]  }
  0x55   : > { %1457 = vmatprep.subr.bf16.mxu1 %v8359_v60  ;;  %v655_v51 = vshll.u32 %v492_v44, 16  ;;  %v653_v55 = vshrl.u32 %v492_v44, 16  ;;  %v8410_v60 = vld [vmem:[%s11210_s1 + $0x7ac] ss:$16 sps:$4 sm:$0xff]   ;;  %v8450_v44 = vld [vmem:[%s11210_s1 + $0x120] ss:$16 sps:$4 sm:$0xff]  }
  0x57   : > { %1372 = vmatpush1.bf16.msra.mxu0 %v8324_v49  ;;  %v8396_v49 = vld [vmem:[%s11210_s1 + $0x768] ss:$16 sps:$4 sm:$0xff]  }
  0x58   : > { %1373 = vmatprep.subr.bf16.mxu0 %v8332_v50  ;;  %1458 = vmatpush1.bf16.msra.mxu1 %v8357_v4  ;;  %v496_v50 = vpack.c.bf16 %v488_v47, %v488_v47  ;;  %v8399_v4 = vld [vmem:[%s11210_s1] ss:$16 sps:$4 sm:$0xff]   ;;  %v8471_v47 = vld [vmem:[%s11210_s1 + $0xe8] ss:$16 sps:$4 sm:$0xff]  }
  0x59   : > { %1459 = vmatprep.subr.bf16.mxu1 %v8365_v5 }
  0x5a   : > { %v660_v57 = vshll.u32 %v496_v50, 16  ;;  %v8464_v50 = vld [vmem:[%s11210_s1 + $0x164] ss:$16 sps:$4 sm:$0xff]  }
  0x5b   : > { %1374 = vmatpush1.bf16.msra.mxu0 %v8330_v56  ;;  %v657_v56 = vrot.slane %v655_v51, 1  ;;  %v8477_v51 = vld [vmem:[%s11210_s1 + $0x108] ss:$16 sps:$4 sm:$0xff]  }
  0x5c   : > { %1375 = vmatprep.subr.bf16.mxu0 %v8338_v59  ;;  %1460 = vmatpush1.bf16.msra.mxu1 %v8363_v8  ;;  %v8392_v59 = vld [vmem:[%s11210_s1 + $0x7e4] ss:$16 sps:$4 sm:$0xff]   ;;  %v343_v8 = vld [vmem:[#allocation2 + $0x8] sm:$0xff] }
  0x5d   : > { %1461 = vmatprep.subr.bf16.mxu1 %v8371_v11  ;;  %v658_v63 = vor.u32 %v657_v56, %v653_v55  ;;  %v8405_v11 = vld [vmem:[%s11210_s1 + $0x20] ss:$16 sps:$4 sm:$0xff]   ;;  %v8470_v55 = vld [vmem:[%s11210_s1 + $0x184] ss:$16 sps:$4 sm:$0xff]   ;;  %v8491_v56 = vld [vmem:[%s11210_s1 + $0x14c] ss:$16 sps:$4 sm:$0xff]  }
  0x5f   : > { %1376 = vmatpush1.bf16.msra.mxu0 %v8336_v0  ;;  %v662_v0 = vrot.slane %v660_v57, 1  ;;  %v8468_v57 = vld [vmem:[%s11210_s1 + $0x180] ss:$16 sps:$4 sm:$0xff]  }
  0x60   : > { %1377 = vmatprep.subr.bf16.mxu0 %v8344_v3  ;;  %1462 = vmatpush1.bf16.msra.mxu1 %v8369_v19  ;;  %v8416_v3 = vld [vmem:[%s11210_s1 + $0x7cc] ss:$16 sps:$4 sm:$0xff]   ;;  %v8417_v19 = vld [vmem:[%s11210_s1 + $0x60] ss:$16 sps:$4 sm:$0xff]  }
  0x61   : > { %1463 = vmatprep.subr.bf16.mxu1 %v8377_v22  ;;  %v663_v5 = vsel %vm627_vm1, %v658_v63, %v662_v0  ;;  %v8443_v22 = vld [vmem:[%s11210_s1 + $0x4c] ss:$16 sps:$4 sm:$0xff]   ;;  %v8495_v63 = vld [vmem:[%s11210_s1 + $0x168] ss:$16 sps:$4 sm:$0xff]   ;;  %v8482_v0 = vld [vmem:[%s11210_s1 + $0x1c4] ss:$16 sps:$4 sm:$0xff]  }
  0x63   : > { %1378 = vmatpush1.bf16.msra.mxu0 %v8342_v7  ;;  %v8414_v7 = vld [vmem:[%s11210_s1 + $0x7c8] ss:$16 sps:$4 sm:$0xff]  }
  0x64   : > { %1379 = vmatprep.subr.bf16.mxu0 %v8350_v10  ;;  %1464 = vmatpush1.bf16.msra.mxu1 %v8375_v28  ;;  %v351_v10 = vpack.c.bf16 %v9156_v45, %v343_v8  ;;  %v8431_v45 = vld [vmem:[%s11210_s1 + $0xc] ss:$16 sps:$4 sm:$0xff]   ;;  %v8426_v28 = vld [vmem:[%s11210_s1 + $0xa0] ss:$16 sps:$4 sm:$0xff]   ;;  %v8507_v8 = vld [vmem:[%s11210_s1 + $0x1a8] ss:$16 sps:$4 sm:$0xff]  }
  0x65   : > { %1465 = vmatprep.subr.bf16.mxu1 %v8383_v30  ;;  %v8447_v30 = vld [vmem:[%s11210_s1 + $0x68] ss:$16 sps:$4 sm:$0xff]  }
  0x67   : > { %1380 = vmatpush1.bf16.msra.mxu0 %v8348_v18  ;;  %v8437_v18 = vld [vmem:[%s11210_s1 + $0x2c] ss:$16 sps:$4 sm:$0xff]  }
  0x68   : > { %1381 = vmatprep.subr.bf16.mxu0 %v8356_v21  ;;  %1466 = vmatpush1.bf16.msra.mxu1 %v8381_v33  ;;  %v8435_v21 = vld [vmem:[%s11210_s1 + $0x28] ss:$16 sps:$4 sm:$0xff]   ;;  %v8440_v33 = vld [vmem:[%s11210_s1 + $0xe4] ss:$16 sps:$4 sm:$0xff]  }
  0x69   : > { %1467 = vmatprep.subr.bf16.mxu1 %v8389_v35  ;;  %v8461_v35 = vld [vmem:[%s11210_s1 + $0xac] ss:$16 sps:$4 sm:$0xff]  }
  0x6b   : > { %1382 = vmatpush1.bf16.msra.mxu0 %v8354_v26  ;;  %v8441_v26 = vld [vmem:[%s11210_s1 + $0x48] ss:$16 sps:$4 sm:$0xff]  }
  0x6c   : > { %1383 = vmatprep.subr.bf16.mxu0 %v8362_v29  ;;  %1468 = vmatpush1.bf16.msra.mxu1 %v8387_v38  ;;  %v8434_v29 = vld [vmem:[%s11210_s1 + $0xc4] ss:$16 sps:$4 sm:$0xff]   ;;  %v8459_v38 = vld [vmem:[%s11210_s1 + $0xa8] ss:$16 sps:$4 sm:$0xff]  }
  0x6d   : > { %1469 = vmatprep.subr.bf16.mxu1 %v8395_v39  ;;  %v8467_v39 = vld [vmem:[%s11210_s1 + $0xcc] ss:$16 sps:$4 sm:$0xff]  }
  0x6f   : > { %1384 = vmatpush1.bf16.msra.mxu0 %v8360_v32  ;;  %v8432_v32 = vld [vmem:[%s11210_s1 + $0xc0] ss:$16 sps:$4 sm:$0xff]  }
  0x70   : > { %1385 = vmatprep.subr.bf16.mxu0 %v8368_v34  ;;  %1470 = vmatpush1.bf16.msra.mxu1 %v8393_v43  ;;  %v8453_v34 = vld [vmem:[%s11210_s1 + $0x88] ss:$16 sps:$4 sm:$0xff]   ;;  %v8473_v43 = vld [vmem:[%s11210_s1 + $0xec] ss:$16 sps:$4 sm:$0xff]  }
  0x71   : > { %1471 = vmatprep.subr.bf16.mxu1 %v8398_v46  ;;  %v8458_v46 = vld [vmem:[%s11210_s1 + $0x144] ss:$16 sps:$4 sm:$0xff]  }
  0x73   : > { %1386 = vmatpush1.bf16.msra.mxu0 %v8366_v36  ;;  %v8438_v36 = vld [vmem:[%s11210_s1 + $0xe0] ss:$16 sps:$4 sm:$0xff]  }
  0x74   : > { %1387 = vmatprep.subr.bf16.mxu0 %v8374_v37  ;;  %1472 = vmatpush1.bf16.msra.mxu1 %v8396_v49  ;;  %v8446_v37 = vld [vmem:[%s11210_s1 + $0x104] ss:$16 sps:$4 sm:$0xff]   ;;  %v8456_v49 = vld [vmem:[%s11210_s1 + $0x140] ss:$16 sps:$4 sm:$0xff]  }
  0x75   : > { %1473 = vmatprep.subr.bf16.mxu1 %v8404_v53  ;;  %v8462_v53 = vld [vmem:[%s11210_s1 + $0x160] ss:$16 sps:$4 sm:$0xff]  }
  0x77   : > { %1388 = vmatpush1.bf16.msra.mxu0 %v8372_v41  ;;  %v8452_v41 = vld [vmem:[%s11210_s1 + $0x124] ss:$16 sps:$4 sm:$0xff]  }
  0x78   : > { %1389 = vmatprep.subr.bf16.mxu0 %v8380_v42  ;;  %1474 = vmatpush1.bf16.msra.mxu1 %v8402_v58  ;;  %v8465_v42 = vld [vmem:[%s11210_s1 + $0xc8] ss:$16 sps:$4 sm:$0xff]  }
  0x79   : > { %1475 = vmatprep.subr.bf16.mxu1 %v8410_v60  ;;  %v8489_v58 = vld [vmem:[%s11210_s1 + $0x148] ss:$16 sps:$4 sm:$0xff]   ;;  %v8497_v60 = vld [vmem:[%s11210_s1 + $0x16c] ss:$16 sps:$4 sm:$0xff]  }
  0x7b   : > { %1390 = vmatpush1.bf16.msra.mxu0 %v8378_v48  ;;  %v8479_v48 = vld [vmem:[%s11210_s1 + $0x10c] ss:$16 sps:$4 sm:$0xff]  }
  0x7c   : > { %1391 = vmatprep.subr.bf16.mxu0 %v8386_v52  ;;  %1476 = vmatpush1.bf16.msra.mxu1 %v8408_v1  ;;  %v8485_v52 = vld [vmem:[%s11210_s1 + $0x12c] ss:$16 sps:$4 sm:$0xff]  }
  0x7d   : > { %1477 = vmatprep.subr.bf16.mxu1 %v8416_v3  ;;  %v8503_v1 = vld [vmem:[%s11210_s1 + $0x18c] ss:$16 sps:$4 sm:$0xff]   ;;  %v8501_v3 = vld [vmem:[%s11210_s1 + $0x188] ss:$16 sps:$4 sm:$0xff]  }
  0x7f   : > { %1392 = vmatpush1.bf16.msra.mxu0 %v8384_v54  ;;  %v8483_v54 = vld [vmem:[%s11210_s1 + $0x128] ss:$16 sps:$4 sm:$0xff]  }
  0x80   : > { %1393 = vmatprep.subr.bf16.mxu0 %v8392_v59  ;;  %1478 = vmatpush1.bf16.msra.mxu1 %v8414_v7  ;;  %v8476_v59 = vld [vmem:[%s11210_s1 + $0x1a4] ss:$16 sps:$4 sm:$0xff]  }
  0x81   : > { %1479 = vmatprep.subr.bf16.mxu1 %v8422_v9  ;;  %v342_v7 = vld [vmem:[#allocation2] sm:$0xff] }
  0x82   : > { %v8494_v9 = vld [vmem:[%s11210_s1 + $0x204] ss:$16 sps:$4 sm:$0xff]  }
  0x83   : > { %1394 = vmatpush1.bf16.msra.mxu0 %v8390_v62  ;;  %v8474_v62 = vld [vmem:[%s11210_s1 + $0x1a0] ss:$16 sps:$4 sm:$0xff]  }
  0x84   : > { %2132 = vmatprep.subr.bf16.mxu0 %v8401_v2  ;;  %1480 = vmatpush1.bf16.msra.mxu1 %v8420_v13  ;;  %v8480_v2 = vld [vmem:[%s11210_s1 + $0x1c0] ss:$16 sps:$4 sm:$0xff]   ;;  %v345_v13 = vld [vmem:[#allocation2 + $0x18] sm:$0xff] }
  0x85   : > { %2218 = vmatprep.subr.bf16.mxu1 %v8431_v45  ;;  %v8492_v45 = vld [vmem:[%s11210_s1 + $0x200] ss:$16 sps:$4 sm:$0xff]  }
  0x86   : > { %1396 = vmatmul.mubr.bf16.vlgmr.msra.gmra.mrb[0].mxu0 %v663_v5 }
  0x87   : > { %2133 = vmatpush1.bf16.msra.mxu0 %v8399_v4  ;;  %2164 = vmatprep.mubr.bf16.mxu0 %v351_v10  ;;  %v8488_v4 = vld [vmem:[%s11210_s1 + $0x1e4] ss:$16 sps:$4 sm:$0xff]  }
  0x88   : > { %2134 = vmatprep.subr.bf16.mxu0 %v8407_v6  ;;  %1482 = vmatmul.mubr.bf16.vlgmr.msra.gmra.mrb[0].mxu1 %v663_v5  ;;  %v8509_v5 = vld [vmem:[%s11210_s1 + $0x1ac] ss:$16 sps:$4 sm:$0xff]   ;;  %v8486_v6 = vld [vmem:[%s11210_s1 + $0x1e0] ss:$16 sps:$4 sm:$0xff]  }
  0x89   : > { %2219 = vmatpush1.bf16.msra.mxu1 %v8429_v17  ;;  %2250 = vmatprep.mubr.bf16.mxu1 %v351_v10  ;;  %v8515_v10 = vld [vmem:[%s11210_s1 + $0x1cc] ss:$16 sps:$4 sm:$0xff]  }
  0x8a   : > { %2220 = vmatprep.subr.bf16.mxu1 %v8437_v18  ;;  %v8521_v17 = vld [vmem:[%s11210_s1 + $0x1ec] ss:$16 sps:$4 sm:$0xff]   ;;  %v353_v18 = vpack.c.bf16 %v9306_v61, %v345_v13 }
  0x8b   : > { %2135 = vmatpush1.bf16.msra.mxu0 %v8405_v11  ;;  %v9632_v11 = vld [vmem:[#allocation2 + $0x20] sm:$0xff]  ;;  %v8527_v61 = vld [vmem:[%s11210_s1 + $0x20c] ss:$16 sps:$4 sm:$0xff]  }
  0x8c   : > { %2136 = vmatprep.subr.bf16.mxu0 %v8413_v12  ;;  %v350_v12 = vpack.c.bf16 %v9632_v11, %v342_v7  ;;  %v8588_v7 = vld [vmem:[%s11210_s1 + $0x368] ss:$16 sps:$4 sm:$0xff]  }
  0x8d   : > { %2221 = vmatpush1.bf16.msra.mxu1 %v8435_v21  ;;  %v8506_v21 = vld [vmem:[%s11210_s1 + $0x244] ss:$16 sps:$4 sm:$0xff]   ;;  %v2305_v13 = vld [vmem:[#allocation2 + $0x8] sm:$0xfc] }
  0x8e   : > { %2222 = vmatprep.subr.bf16.mxu1 %v8443_v22  ;;  %v8504_v22 = vld [vmem:[%s11210_s1 + $0x240] ss:$16 sps:$4 sm:$0xff]  }
  0x8f   : > { %2137 = vmatpush1.bf16.msra.mxu0 %v8411_v14  ;;  %v8513_v14 = vld [vmem:[%s11210_s1 + $0x1c8] ss:$16 sps:$4 sm:$0xff]  }
  0x90   : > { %2138 = vmatprep.subr.bf16.mxu0 %v8419_v15  ;;  %v8500_v15 = vld [vmem:[%s11210_s1 + $0x224] ss:$16 sps:$4 sm:$0xff]  }
  0x91   : > { %2223 = vmatpush1.bf16.msra.mxu1 %v8441_v26  ;;  %v8533_v26 = vld [vmem:[%s11210_s1 + $0x22c] ss:$16 sps:$4 sm:$0xff]  }
  0x92   : > { %2224 = vmatprep.subr.bf16.mxu1 %v8449_v27  ;;  %v8510_v27 = vld [vmem:[%s11210_s1 + $0x260] ss:$16 sps:$4 sm:$0xff]  }
  0x93   : > { %2139 = vmatpush1.bf16.msra.mxu0 %v8417_v19  ;;  %v8498_v19 = vld [vmem:[%s11210_s1 + $0x220] ss:$16 sps:$4 sm:$0xff]  }
  0x94   : > { %2140 = vmatprep.subr.bf16.mxu0 %v8425_v20  ;;  %v8519_v20 = vld [vmem:[%s11210_s1 + $0x1e8] ss:$16 sps:$4 sm:$0xff]  }
  0x95   : > { %2225 = vmatpush1.bf16.msra.mxu1 %v8447_v30  ;;  %v8539_v30 = vld [vmem:[%s11210_s1 + $0x24c] ss:$16 sps:$4 sm:$0xff]  }
  0x96   : > { %2226 = vmatprep.subr.bf16.mxu1 %v8455_v31  ;;  %v8516_v31 = vld [vmem:[%s11210_s1 + $0x280] ss:$16 sps:$4 sm:$0xff]  }
  0x97   : > { %2141 = vmatpush1.bf16.msra.mxu0 %v8423_v23  ;;  %v8525_v23 = vld [vmem:[%s11210_s1 + $0x208] ss:$16 sps:$4 sm:$0xff]  }
  0x98   : > { %2142 = vmatprep.subr.bf16.mxu0 %v8428_v25  ;;  %v8512_v25 = vld [vmem:[%s11210_s1 + $0x264] ss:$16 sps:$4 sm:$0xff]  }
  0x99   : > { %2227 = vmatpush1.bf16.msra.mxu1 %v8453_v34  ;;  %v8545_v34 = vld [vmem:[%s11210_s1 + $0x26c] ss:$16 sps:$4 sm:$0xff]  }
  0x9a   : > { %2228 = vmatprep.subr.bf16.mxu1 %v8461_v35  ;;  %v8522_v35 = vld [vmem:[%s11210_s1 + $0x2a0] ss:$16 sps:$4 sm:$0xff]  }
  0x9b   : > { %2143 = vmatpush1.bf16.msra.mxu0 %v8426_v28  ;;  %v8531_v28 = vld [vmem:[%s11210_s1 + $0x228] ss:$16 sps:$4 sm:$0xff]  }
  0x9c   : > { %2144 = vmatprep.subr.bf16.mxu0 %v8434_v29  ;;  %v8518_v29 = vld [vmem:[%s11210_s1 + $0x284] ss:$16 sps:$4 sm:$0xff]  }
  0x9d   : > { %2229 = vmatpush1.bf16.msra.mxu1 %v8459_v38  ;;  %v8551_v38 = vld [vmem:[%s11210_s1 + $0x28c] ss:$16 sps:$4 sm:$0xff]  }
  0x9e   : > { %2230 = vmatprep.subr.bf16.mxu1 %v8467_v39  ;;  %v8528_v39 = vld [vmem:[%s11210_s1 + $0x2c0] ss:$16 sps:$4 sm:$0xff]  }
  0x9f   : > { %2145 = vmatpush1.bf16.msra.mxu0 %v8432_v32  ;;  %v8537_v32 = vld [vmem:[%s11210_s1 + $0x248] ss:$16 sps:$4 sm:$0xff]  }
  0xa0   : > { %2146 = vmatprep.subr.bf16.mxu0 %v8440_v33  ;;  %v8524_v33 = vld [vmem:[%s11210_s1 + $0x2a4] ss:$16 sps:$4 sm:$0xff]  }
  0xa1   : > { %2231 = vmatpush1.bf16.msra.mxu1 %v8465_v42  ;;  %v8557_v42 = vld [vmem:[%s11210_s1 + $0x2ac] ss:$16 sps:$4 sm:$0xff]  }
  0xa2   : > { %2232 = vmatprep.subr.bf16.mxu1 %v8473_v43  ;;  %v8534_v43 = vld [vmem:[%s11210_s1 + $0x2e0] ss:$16 sps:$4 sm:$0xff]  }
  0xa3   : > { %2147 = vmatpush1.bf16.msra.mxu0 %v8438_v36  ;;  %v8543_v36 = vld [vmem:[%s11210_s1 + $0x268] ss:$16 sps:$4 sm:$0xff]  }
  0xa4   : > { %2148 = vmatprep.subr.bf16.mxu0 %v8446_v37  ;;  %v8530_v37 = vld [vmem:[%s11210_s1 + $0x2c4] ss:$16 sps:$4 sm:$0xff]  }
  0xa5   : > { %2233 = vmatpush1.bf16.msra.mxu1 %v8471_v47  ;;  %v8563_v47 = vld [vmem:[%s11210_s1 + $0x2cc] ss:$16 sps:$4 sm:$0xff]  }
  0xa6   : > { %2234 = vmatprep.subr.bf16.mxu1 %v8479_v48  ;;  %v8540_v48 = vld [vmem:[%s11210_s1 + $0x300] ss:$16 sps:$4 sm:$0xff]  }
  0xa7   : > { %2149 = vmatpush1.bf16.msra.mxu0 %v8444_v40  ;;  %v8536_v40 = vld [vmem:[%s11210_s1 + $0x2e4] ss:$16 sps:$4 sm:$0xff]  }
  0xa8   : > { %2150 = vmatprep.subr.bf16.mxu0 %v8452_v41  ;;  %v8549_v41 = vld [vmem:[%s11210_s1 + $0x288] ss:$16 sps:$4 sm:$0xff]  }
  0xa9   : > { %2235 = vmatpush1.bf16.msra.mxu1 %v8477_v51  ;;  %v8569_v51 = vld [vmem:[%s11210_s1 + $0x2ec] ss:$16 sps:$4 sm:$0xff]  }
  0xaa   : > { %2236 = vmatprep.subr.bf16.mxu1 %v8485_v52  ;;  %v8546_v52 = vld [vmem:[%s11210_s1 + $0x320] ss:$16 sps:$4 sm:$0xff]  }
  0xab   : > { %2151 = vmatpush1.bf16.msra.mxu0 %v8450_v44  ;;  %v8542_v44 = vld [vmem:[%s11210_s1 + $0x304] ss:$16 sps:$4 sm:$0xff]  }
  0xac   : > { %2152 = vmatprep.subr.bf16.mxu0 %v8458_v46  ;;  %v8555_v46 = vld [vmem:[%s11210_s1 + $0x2a8] ss:$16 sps:$4 sm:$0xff]  }
  0xad   : > { %2237 = vmatpush1.bf16.msra.mxu1 %v8483_v54  ;;  %v8567_v54 = vld [vmem:[%s11210_s1 + $0x2e8] ss:$16 sps:$4 sm:$0xff]  }
  0xae   : > { %2238 = vmatprep.subr.bf16.mxu1 %v8491_v56  ;;  %v8552_v56 = vld [vmem:[%s11210_s1 + $0x340] ss:$16 sps:$4 sm:$0xff]  }
  0xaf   : > { %2153 = vmatpush1.bf16.msra.mxu0 %v8456_v49  ;;  %v8548_v49 = vld [vmem:[%s11210_s1 + $0x324] ss:$16 sps:$4 sm:$0xff]  }
  0xb0   : > { %2154 = vmatprep.subr.bf16.mxu0 %v8464_v50  ;;  %v8561_v50 = vld [vmem:[%s11210_s1 + $0x2c8] ss:$16 sps:$4 sm:$0xff]  }
  0xb1   : > { %2239 = vmatpush1.bf16.msra.mxu1 %v8489_v58  ;;  %v8573_v58 = vld [vmem:[%s11210_s1 + $0x308] ss:$16 sps:$4 sm:$0xff]  }
  0xb2   : > { %2240 = vmatprep.subr.bf16.mxu1 %v8497_v60  ;;  %v8558_v60 = vld [vmem:[%s11210_s1 + $0x360] ss:$16 sps:$4 sm:$0xff]  }
  0xb3   : > { %2155 = vmatpush1.bf16.msra.mxu0 %v8462_v53  ;;  %v8554_v53 = vld [vmem:[%s11210_s1 + $0x344] ss:$16 sps:$4 sm:$0xff]  }
  0xb4   : > { %2156 = vmatprep.subr.bf16.mxu0 %v8470_v55  ;;  %v8575_v55 = vld [vmem:[%s11210_s1 + $0x30c] ss:$16 sps:$4 sm:$0xff]  }
  0xb5   : > { %2241 = vmatpush1.bf16.msra.mxu1 %v8495_v63  ;;  %v8579_v63 = vld [vmem:[%s11210_s1 + $0x328] ss:$16 sps:$4 sm:$0xff]  }
  0xb6   : > { %2242 = vmatprep.subr.bf16.mxu1 %v8503_v1  ;;  %v8564_v1 = vld [vmem:[%s11210_s1 + $0x380] ss:$16 sps:$4 sm:$0xff]  }
  0xb7   : > { %2157 = vmatpush1.bf16.msra.mxu0 %v8468_v57  ;;  %v8560_v57 = vld [vmem:[%s11210_s1 + $0x364] ss:$16 sps:$4 sm:$0xff]  }
  0xb8   : > { %2158 = vmatprep.subr.bf16.mxu0 %v8476_v59  ;;  %v8581_v59 = vld [vmem:[%s11210_s1 + $0x32c] ss:$16 sps:$4 sm:$0xff]  }
  0xb9   : > { %2243 = vmatpush1.bf16.msra.mxu1 %v8501_v3  ;;  %v8585_v3 = vld [vmem:[%s11210_s1 + $0x348] ss:$16 sps:$4 sm:$0xff]  }
  0xba   : > { %2244 = vmatprep.subr.bf16.mxu1 %v8509_v5  ;;  %v8570_v5 = vld [vmem:[%s11210_s1 + $0x3a0] ss:$16 sps:$4 sm:$0xff]  }
  0xbb   : > { %2159 = vmatpush1.bf16.msra.mxu0 %v8474_v62  ;;  %v8566_v62 = vld [vmem:[%s11210_s1 + $0x384] ss:$16 sps:$4 sm:$0xff]  }
  0xbc   : > { %2160 = vmatprep.subr.bf16.mxu0 %v8482_v0  ;;  %v8587_v0 = vld [vmem:[%s11210_s1 + $0x34c] ss:$16 sps:$4 sm:$0xff]  }
  0xbd   : > { %2245 = vmatpush1.bf16.msra.mxu1 %v8507_v8  ;;  %v8596_v8 = vld [vmem:[%s11210_s1 + $0x38c] ss:$16 sps:$4 sm:$0xff]  }
  0xbe   : > { %2246 = vmatprep.subr.bf16.mxu1 %v8515_v10  ;;  %v8584_v10 = vld [vmem:[%s11210_s1 + $0x3e4] ss:$16 sps:$4 sm:$0xff]  }
  0xbf   : > { %2161 = vmatpush1.bf16.msra.mxu0 %v8480_v2  ;;  %v8572_v2 = vld [vmem:[%s11210_s1 + $0x3a4] ss:$16 sps:$4 sm:$0xff]  }
  0xc0   : > { %2162 = vmatprep.subr.bf16.mxu0 %v8488_v4  ;;  %v8590_v4 = vld [vmem:[%s11210_s1 + $0x36c] ss:$16 sps:$4 sm:$0xff]  }
  0xc1   : > { %2247 = vmatpush1.bf16.msra.mxu1 %v8513_v14  ;;  %v8602_v14 = vld [vmem:[%s11210_s1 + $0x3ac] ss:$16 sps:$4 sm:$0xff]  }
  0xc2   : > { %2248 = vmatprep.subr.bf16.mxu1 %v8521_v17  ;;  %v8593_v17 = vld [vmem:[%s11210_s1 + $0x804] ss:$16 sps:$4 sm:$0xff]  }
  0xc3   : > { %2163 = vmatpush1.bf16.msra.mxu0 %v8486_v6  ;;  %v8578_v6 = vld [vmem:[%s11210_s1 + $0x3c4] ss:$16 sps:$4 sm:$0xff]  }
  0xc4   : > { %2175 = vmatprep.subr.bf16.mxu0 %v8494_v9  ;;  %v8576_v9 = vld [vmem:[%s11210_s1 + $0x3c0] ss:$16 sps:$4 sm:$0xff]  }
  0xc5   : > { %2249 = vmatpush1.bf16.msra.mxu1 %v8519_v20 }
  0xc6   : > { %2165 = vmatmul.mubr.bf16.vlgmr.msra.gmra.mrb[0].mxu0 %v350_v12  ;;  %2261 = vmatprep.subr.bf16.mxu1 %v8527_v61  ;;  %v8600_v61 = vld [vmem:[%s11210_s1 + $0x3a8] ss:$16 sps:$4 sm:$0xff]  }
  0xc7   : > { %2176 = vmatpush1.bf16.msra.mxu0 %v8492_v45  ;;  %2207 = vmatprep.mubr.bf16.mxu0 %v353_v18  ;;  %v2309_v45 = vld [vmem:[#allocation2 + $0x48] sm:$0x3] }
  0xc8   : > { %2177 = vmatprep.subr.bf16.mxu0 %v8500_v15  ;;  %2251 = vmatmul.mubr.bf16.vlgmr.msra.gmra.mrb[0].mxu1 %v350_v12  ;;  %v8594_v12 = vld [vmem:[%s11210_s1 + $0x388] ss:$16 sps:$4 sm:$0xff]   ;;  %v8582_v15 = vld [vmem:[%s11210_s1 + $0x3e0] ss:$16 sps:$4 sm:$0xff]   ;;  %v2317_v20 = vpack.c.bf16 %v2309_v45, %v2309_v45  ;;  %v8644_v45 = vld [vmem:[%s11210_s1 + $0x924] ss:$16 sps:$4 sm:$0xff]  }
  0xc9   : > { %2262 = vmatpush1.bf16.msra.mxu1 %v8525_v23  ;;  %2293 = vmatprep.mubr.bf16.mxu1 %v353_v18  ;;  %v8944_v18 = vld [vmem:[#allocation2 + $0x28] sm:$0xff]  ;;  %v8591_v23 = vld [vmem:[%s11210_s1 + $0x800] ss:$16 sps:$4 sm:$0xff]  }
  0xca   : > { %2263 = vmatprep.subr.bf16.mxu1 %v8533_v26 }
  0xcb   : > { %2178 = vmatpush1.bf16.msra.mxu0 %v8498_v19  ;;  %v2313_v19 = vpack.c.bf16 %v8944_v18, %v2305_v13  ;;  %v8657_v13 = vld [vmem:[%s11210_s1 + $0x8c8] ss:$16 sps:$4 sm:$0xff]   ;;  %v8650_v18 = vld [vmem:[%s11210_s1 + $0x944] ss:$16 sps:$4 sm:$0xff]  }
  0xcc   : > { %2179 = vmatprep.subr.bf16.mxu0 %v8506_v21  ;;  %v344_v21 = vld [vmem:[#allocation2 + $0x10] sm:$0xff] }
  0xcd   : > { %2264 = vmatpush1.bf16.msra.mxu1 %v8531_v28  ;;  %v2462_v28 = vrot.slane %v2317_v20, 1  ;;  %v8648_v20 = vld [vmem:[%s11210_s1 + $0x940] ss:$16 sps:$4 sm:$0xff]  }
  0xce   : > { %2265 = vmatprep.subr.bf16.mxu1 %v8539_v30  ;;  %v8606_v30 = vld [vmem:[%s11210_s1 + $0x3c8] ss:$16 sps:$4 sm:$0xff]  }
  0xcf   : > { %2180 = vmatpush1.bf16.msra.mxu0 %v8504_v22  ;;  %v8608_v22 = vld [vmem:[%s11210_s1 + $0x3cc] ss:$16 sps:$4 sm:$0xff]  }
  0xd0   : > { %2181 = vmatprep.subr.bf16.mxu0 %v8512_v25  ;;  %v8945_v25 = vld [vmem:[#allocation2 + $0x30] sm:$0xff] }
  0xd1   : > { %2266 = vmatpush1.bf16.msra.mxu1 %v8537_v32  ;;  %v352_v26 = vpack.c.bf16 %v8945_v25, %v344_v21  ;;  %v8597_v32 = vld [vmem:[%s11210_s1 + $0x820] ss:$16 sps:$4 sm:$0xff]   ;;  %v8669_v21 = vld [vmem:[%s11210_s1 + $0x908] ss:$16 sps:$4 sm:$0xff]  }
  0xd2   : > { %2267 = vmatprep.subr.bf16.mxu1 %v8545_v34  ;;  %v8612_v34 = vld [vmem:[%s11210_s1 + $0x3e8] ss:$16 sps:$4 sm:$0xff]  }
  0xd3   : > { %2182 = vmatpush1.bf16.msra.mxu0 %v8510_v27  ;;  %v2461_v27 = vrot.slane %v2313_v19, 1  ;;  %v8671_v19 = vld [vmem:[%s11210_s1 + $0x90c] ss:$16 sps:$4 sm:$0xff]   ;;  %v8675_v25 = vld [vmem:[%s11210_s1 + $0x928] ss:$16 sps:$4 sm:$0xff]  }
  0xd4   : > { %2183 = vmatprep.subr.bf16.mxu0 %v8518_v29  ;;  %v8599_v29 = vld [vmem:[%s11210_s1 + $0x824] ss:$16 sps:$4 sm:$0xff]  }
  0xd5   : > { %2268 = vmatpush1.bf16.msra.mxu1 %v8543_v36  ;;  %v2304_v36 = vld [vmem:[#allocation2] sm:$0xfc] }
  0xd6   : > { %2269 = vmatprep.subr.bf16.mxu1 %v8551_v38  ;;  %v2307_v38 = vld [vmem:[#allocation2 + $0x18] sm:$0xfc] }
  0xd7   : > { %2184 = vmatpush1.bf16.msra.mxu0 %v8516_v31  ;;  %v8614_v31 = vld [vmem:[%s11210_s1 + $0x3ec] ss:$16 sps:$4 sm:$0xff]  }
  0xd8   : > { %2185 = vmatprep.subr.bf16.mxu0 %v8524_v33  ;;  %v8605_v33 = vld [vmem:[%s11210_s1 + $0x844] ss:$16 sps:$4 sm:$0xff]  }
  0xd9   : > { %2270 = vmatpush1.bf16.msra.mxu1 %v8549_v41  ;;  %v8603_v41 = vld [vmem:[%s11210_s1 + $0x840] ss:$16 sps:$4 sm:$0xff]  }
  0xda   : > { %2271 = vmatprep.subr.bf16.mxu1 %v8557_v42  ;;  %v2312_v42 = vpack.c.bf16 %v9632_v11, %v2304_v36  ;;  %v8629_v11 = vld [vmem:[%s11210_s1 + $0x82c] ss:$16 sps:$4 sm:$0xff]   ;;  %v8672_v36 = vld [vmem:[%s11210_s1 + $0x9c0] ss:$16 sps:$4 sm:$0xff]  }
  0xdb   : > { %2186 = vmatpush1.bf16.msra.mxu0 %v8522_v35  ;;  %v2463_v35 = vsel %vm2457_vm3, %v2461_v27, %v2462_v28  ;;  %v8683_v27 = vld [vmem:[%s11210_s1 + $0x94c] ss:$16 sps:$4 sm:$0xff]   ;;  %v8660_v28 = vld [vmem:[%s11210_s1 + $0x980] ss:$16 sps:$4 sm:$0xff]  }
  0xdc   : > { %2187 = vmatprep.subr.bf16.mxu0 %v8530_v37  ;;  %v2308_v37 = vld [vmem:[#allocation2 + $0x40] sm:$0x3] }
  0xdd   : > { %2272 = vmatpush1.bf16.msra.mxu1 %v8555_v46 }
  0xde   : > { %2273 = vmatprep.subr.bf16.mxu1 %v8563_v47 }
  0xdf   : > { %2188 = vmatpush1.bf16.msra.mxu0 %v8528_v39  ;;  %v2311_v39 = vld [vmem:[#allocation2 + $0x58] sm:$0x3] }
  0xe0   : > { %2189 = vmatprep.subr.bf16.mxu0 %v8536_v40  ;;  %v8623_v40 = vld [vmem:[%s11210_s1 + $0x80c] ss:$16 sps:$4 sm:$0xff]   ;;  %v2319_v47 = vpack.c.bf16 %v2311_v39, %v2311_v39 }
  0xe1   : > { %2274 = vmatpush1.bf16.msra.mxu1 %v8561_v50  ;;  %v8609_v50 = vld [vmem:[%s11210_s1 + $0x860] ss:$16 sps:$4 sm:$0xff]   ;;  %v8701_v39 = vld [vmem:[%s11210_s1 + $0x9ac] ss:$16 sps:$4 sm:$0xff]  }
  0xe2   : > { %2275 = vmatprep.subr.bf16.mxu1 %v8569_v51  ;;  %v8627_v51 = vld [vmem:[%s11210_s1 + $0x828] ss:$16 sps:$4 sm:$0xff]  }
  0xe3   : > { %2190 = vmatpush1.bf16.msra.mxu0 %v8534_v43  ;;  %v2316_v43 = vpack.c.bf16 %v2308_v37, %v2308_v37  ;;  %v8693_v37 = vld [vmem:[%s11210_s1 + $0x988] ss:$16 sps:$4 sm:$0xff]  }
  0xe4   : > { %2191 = vmatprep.subr.bf16.mxu0 %v8542_v44  ;;  %v8946_v44 = vld [vmem:[#allocation2 + $0x38] sm:$0xff] }
  0xe5   : > { %2276 = vmatpush1.bf16.msra.mxu1 %v8567_v54  ;;  %v2315_v46 = vpack.c.bf16 %v8946_v44, %v2307_v38  ;;  %v9878_v54 = vrot.slane %v2312_v42, 1  ;;  %v8680_v38 = vld [vmem:[%s11210_s1 + $0x9e4] ss:$16 sps:$4 sm:$0xff]   ;;  %v8684_v44 = vld [vmem:[%s11210_s1 + $0xa00] ss:$16 sps:$4 sm:$0xff]  }
  0xe6   : > { %2277 = vmatprep.subr.bf16.mxu1 %v8575_v55  ;;  %v9880_v55 = vrot.slane %v2316_v43, 1  ;;  %v8686_v42 = vld [vmem:[%s11210_s1 + $0xa04] ss:$16 sps:$4 sm:$0xff]   ;;  %v8707_v43 = vld [vmem:[%s11210_s1 + $0x9cc] ss:$16 sps:$4 sm:$0xff]  }
  0xe7   : > { %2192 = vmatpush1.bf16.msra.mxu0 %v8540_v48  ;;  %v8611_v48 = vld [vmem:[%s11210_s1 + $0x864] ss:$16 sps:$4 sm:$0xff]  }
  0xe8   : > { %2193 = vmatprep.subr.bf16.mxu0 %v8548_v49  ;;  %v8621_v49 = vld [vmem:[%s11210_s1 + $0x808] ss:$16 sps:$4 sm:$0xff]  }
  0xe9   : > { %2278 = vmatpush1.bf16.msra.mxu1 %v8573_v58  ;;  %v8615_v58 = vld [vmem:[%s11210_s1 + $0x880] ss:$16 sps:$4 sm:$0xff]  }
  0xea   : > { %2279 = vmatprep.subr.bf16.mxu1 %v8581_v59  ;;  %v8633_v59 = vld [vmem:[%s11210_s1 + $0x848] ss:$16 sps:$4 sm:$0xff]  }
  0xeb   : > { %2194 = vmatpush1.bf16.msra.mxu0 %v8546_v52  ;;  %v8617_v52 = vld [vmem:[%s11210_s1 + $0x884] ss:$16 sps:$4 sm:$0xff]  }
  0xec   : > { %2195 = vmatprep.subr.bf16.mxu0 %v8554_v53  ;;  %v8635_v53 = vld [vmem:[%s11210_s1 + $0x84c] ss:$16 sps:$4 sm:$0xff]  }
  0xed   : > { %2280 = vmatpush1.bf16.msra.mxu1 %v8579_v63  ;;  %v8618_v63 = vld [vmem:[%s11210_s1 + $0x8a0] ss:$16 sps:$4 sm:$0xff]  }
  0xee   : > { %2281 = vmatprep.subr.bf16.mxu1 %v8587_v0  ;;  %v8639_v0 = vld [vmem:[%s11210_s1 + $0x868] ss:$16 sps:$4 sm:$0xff]  }
  0xef   : > { %2196 = vmatpush1.bf16.msra.mxu0 %v8552_v56  ;;  %v9882_v56 = vrot.slane %v2315_v46, 1  ;;  %v8705_v46 = vld [vmem:[%s11210_s1 + $0x9c8] ss:$16 sps:$4 sm:$0xff]  }
  0xf0   : > { %2197 = vmatprep.subr.bf16.mxu0 %v8560_v57  ;;  %v9884_v57 = vrot.slane %v2319_v47, 1  ;;  %v8692_v47 = vld [vmem:[%s11210_s1 + $0xa24] ss:$16 sps:$4 sm:$0xff]  }
  0xf1   : > { %2282 = vmatpush1.bf16.msra.mxu1 %v8585_v3  ;;  %v8624_v3 = vld [vmem:[%s11210_s1 + $0x8c0] ss:$16 sps:$4 sm:$0xff]  }
  0xf2   : > { %2283 = vmatprep.subr.bf16.mxu1 %v8590_v4  ;;  %v8645_v4 = vld [vmem:[%s11210_s1 + $0x888] ss:$16 sps:$4 sm:$0xff]  }
  0xf3   : > { %2198 = vmatpush1.bf16.msra.mxu0 %v8558_v60  ;;  %v8620_v60 = vld [vmem:[%s11210_s1 + $0x8a4] ss:$16 sps:$4 sm:$0xff]  }
  0xf4   : > { %2199 = vmatprep.subr.bf16.mxu0 %v8566_v62  ;;  %v8641_v62 = vld [vmem:[%s11210_s1 + $0x86c] ss:$16 sps:$4 sm:$0xff]  }
  0xf5   : > { %2284 = vmatpush1.bf16.msra.mxu1 %v8588_v7  ;;  %v8630_v7 = vld [vmem:[%s11210_s1 + $0x8e0] ss:$16 sps:$4 sm:$0xff]  }
  0xf6   : > { %2285 = vmatprep.subr.bf16.mxu1 %v8596_v8  ;;  %v8651_v8 = vld [vmem:[%s11210_s1 + $0x8a8] ss:$16 sps:$4 sm:$0xff]  }
  0xf7   : > { %2200 = vmatpush1.bf16.msra.mxu0 %v8564_v1  ;;  %v8626_v1 = vld [vmem:[%s11210_s1 + $0x8c4] ss:$16 sps:$4 sm:$0xff]  }
  0xf8   : > { %2201 = vmatprep.subr.bf16.mxu0 %v8572_v2  ;;  %v8647_v2 = vld [vmem:[%s11210_s1 + $0x88c] ss:$16 sps:$4 sm:$0xff]  }
  0xf9   : > { %2286 = vmatpush1.bf16.msra.mxu1 %v8594_v12  ;;  %v8636_v12 = vld [vmem:[%s11210_s1 + $0x900] ss:$16 sps:$4 sm:$0xff]  }
  0xfa   : > { %2287 = vmatprep.subr.bf16.mxu1 %v8602_v14  ;;  %v8665_v14 = vld [vmem:[%s11210_s1 + $0x8ec] ss:$16 sps:$4 sm:$0xff]  }
  0xfb   : > { %2202 = vmatpush1.bf16.msra.mxu0 %v8570_v5  ;;  %v8632_v5 = vld [vmem:[%s11210_s1 + $0x8e4] ss:$16 sps:$4 sm:$0xff]  }
  0xfc   : > { %2203 = vmatprep.subr.bf16.mxu0 %v8578_v6  ;;  %v8653_v6 = vld [vmem:[%s11210_s1 + $0x8ac] ss:$16 sps:$4 sm:$0xff]  }
  0xfd   : > { %2288 = vmatpush1.bf16.msra.mxu1 %v8600_v61  ;;  %v8656_v61 = vld [vmem:[%s11210_s1 + $0x964] ss:$16 sps:$4 sm:$0xff]  }
  0xfe   : > { %2289 = vmatprep.subr.bf16.mxu1 %v8608_v22  ;;  %v8677_v22 = vld [vmem:[%s11210_s1 + $0x92c] ss:$16 sps:$4 sm:$0xff]  }
  0xff   : > { %2204 = vmatpush1.bf16.msra.mxu0 %v8576_v9  ;;  %v8638_v9 = vld [vmem:[%s11210_s1 + $0x904] ss:$16 sps:$4 sm:$0xff]  }
 0x100   : > { %2205 = vmatprep.subr.bf16.mxu0 %v8584_v10  ;;  %v8659_v10 = vld [vmem:[%s11210_s1 + $0x8cc] ss:$16 sps:$4 sm:$0xff]  }
 0x101   : > { %2290 = vmatpush1.bf16.msra.mxu1 %v8606_v30  ;;  %v8668_v30 = vld [vmem:[%s11210_s1 + $0x9a4] ss:$16 sps:$4 sm:$0xff]  }
 0x102   : > { %2291 = vmatprep.subr.bf16.mxu1 %v8614_v31  ;;  %v8689_v31 = vld [vmem:[%s11210_s1 + $0x96c] ss:$16 sps:$4 sm:$0xff]  }
 0x103   : > { %2206 = vmatpush1.bf16.msra.mxu0 %v8582_v15  ;;  %v8642_v15 = vld [vmem:[%s11210_s1 + $0x920] ss:$16 sps:$4 sm:$0xff]  }
 0x104   : > { %3114 = vmatprep.subr.bf16.mxu0 %v8593_v17  ;;  %v8663_v17 = vld [vmem:[%s11210_s1 + $0x8e8] ss:$16 sps:$4 sm:$0xff]  }
 0x105   : > { %2292 = vmatpush1.bf16.msra.mxu1 %v8612_v34  ;;  %v8674_v34 = vld [vmem:[%s11210_s1 + $0x9c4] ss:$16 sps:$4 sm:$0xff]  }
 0x106   : > { %2208 = vmatmul.mubr.bf16.vlgmr.msra.gmra.mrb[0].mxu0 %v352_v26  ;;  %3200 = vmatprep.subr.bf16.mxu1 %v8623_v40  ;;  %v8678_v40 = vld [vmem:[%s11210_s1 + $0x9e0] ss:$16 sps:$4 sm:$0xff]  }
 0x107   : > { %3115 = vmatpush1.bf16.msra.mxu0 %v8591_v23  ;;  %3146 = vmatprep.mubr.bf16.mxu0 %v2463_v35  ;;  %v8654_v23 = vld [vmem:[%s11210_s1 + $0x960] ss:$16 sps:$4 sm:$0xff]  }
 0x108   : > { %3116 = vmatprep.subr.bf16.mxu0 %v8599_v29  ;;  %2294 = vmatmul.mubr.bf16.vlgmr.msra.gmra.mrb[0].mxu1 %v352_v26  ;;  %v8662_v26 = vld [vmem:[%s11210_s1 + $0x984] ss:$16 sps:$4 sm:$0xff]   ;;  %v8681_v29 = vld [vmem:[%s11210_s1 + $0x948] ss:$16 sps:$4 sm:$0xff]  }
 0x109   : > { %3201 = vmatpush1.bf16.msra.mxu1 %v8621_v49  ;;  %3232 = vmatprep.mubr.bf16.mxu1 %v2463_v35  ;;  %v8695_v35 = vld [vmem:[%s11210_s1 + $0x98c] ss:$16 sps:$4 sm:$0xff]   ;;  %v2460_v49 = vsel %vm2457_vm3, %v9878_v54, %v9880_v55  ;;  %v8696_v54 = vld [vmem:[%s11210_s1 + $0xa40] ss:$16 sps:$4 sm:$0xff]   ;;  %v8717_v55 = vld [vmem:[%s11210_s1 + $0xa08] ss:$16 sps:$4 sm:$0xff]  }
 0x10a   : > { %3202 = vmatprep.subr.bf16.mxu1 %v8629_v11  ;;  %v8690_v11 = vld [vmem:[%s11210_s1 + $0xa20] ss:$16 sps:$4 sm:$0xff]  }
 0x10b   : > { %3117 = vmatpush1.bf16.msra.mxu0 %v8597_v32  ;;  %v8666_v32 = vld [vmem:[%s11210_s1 + $0x9a0] ss:$16 sps:$4 sm:$0xff]  }
 0x10c   : > { %3118 = vmatprep.subr.bf16.mxu0 %v8605_v33  ;;  %v8687_v33 = vld [vmem:[%s11210_s1 + $0x968] ss:$16 sps:$4 sm:$0xff]  }
 0x10d   : > { %3203 = vmatpush1.bf16.msra.mxu1 %v8627_v51  ;;  %v8698_v51 = vld [vmem:[%s11210_s1 + $0xa44] ss:$16 sps:$4 sm:$0xff]  }
 0x10e   : > { %3204 = vmatprep.subr.bf16.mxu1 %v8635_v53  ;;  %v2469_v53 = vsel %vm2457_vm3, %v9882_v56, %v9884_v57  ;;  %v8725_v56 = vld [vmem:[%s11210_s1 + $0xa2c] ss:$16 sps:$4 sm:$0xff]   ;;  %v8702_v57 = vld [vmem:[%s11210_s1 + $0xa60] ss:$16 sps:$4 sm:$0xff]  }
 0x10f   : > { %3119 = vmatpush1.bf16.msra.mxu0 %v8603_v41  ;;  %v8699_v41 = vld [vmem:[%s11210_s1 + $0x9a8] ss:$16 sps:$4 sm:$0xff]  }
 0x110   : > { %3120 = vmatprep.subr.bf16.mxu0 %v8611_v48  ;;  %v8713_v48 = vld [vmem:[%s11210_s1 + $0x9ec] ss:$16 sps:$4 sm:$0xff]  }
 0x111   : > { %3205 = vmatpush1.bf16.msra.mxu1 %v8633_v59  ;;  %v8723_v59 = vld [vmem:[%s11210_s1 + $0xa28] ss:$16 sps:$4 sm:$0xff]  }
 0x112   : > { %3206 = vmatprep.subr.bf16.mxu1 %v8641_v62  ;;  %v8731_v62 = vld [vmem:[%s11210_s1 + $0xa4c] ss:$16 sps:$4 sm:$0xff]  }
 0x113   : > { %3121 = vmatpush1.bf16.msra.mxu0 %v8609_v50  ;;  %v8711_v50 = vld [vmem:[%s11210_s1 + $0x9e8] ss:$16 sps:$4 sm:$0xff]  }
 0x114   : > { %3122 = vmatprep.subr.bf16.mxu0 %v8617_v52  ;;  %v8719_v52 = vld [vmem:[%s11210_s1 + $0xa0c] ss:$16 sps:$4 sm:$0xff]  }
 0x115   : > { %3207 = vmatpush1.bf16.msra.mxu1 %v8639_v0  ;;  %v8729_v0 = vld [vmem:[%s11210_s1 + $0xa48] ss:$16 sps:$4 sm:$0xff]  }
 0x116   : > { %3208 = vmatprep.subr.bf16.mxu1 %v8647_v2  ;;  %v8737_v2 = vld [vmem:[%s11210_s1 + $0xa6c] ss:$16 sps:$4 sm:$0xff]  }
 0x117   : > { %3123 = vmatpush1.bf16.msra.mxu0 %v8615_v58  ;;  %v8704_v58 = vld [vmem:[%s11210_s1 + $0xa64] ss:$16 sps:$4 sm:$0xff]  }
 0x118   : > { %3124 = vmatprep.subr.bf16.mxu0 %v8620_v60  ;;  %v8710_v60 = vld [vmem:[%s11210_s1 + $0xa84] ss:$16 sps:$4 sm:$0xff]  }
 0x119   : > { %3209 = vmatpush1.bf16.msra.mxu1 %v8645_v4  ;;  %v8735_v4 = vld [vmem:[%s11210_s1 + $0xa68] ss:$16 sps:$4 sm:$0xff]  }
 0x11a   : > { %3210 = vmatprep.subr.bf16.mxu1 %v8653_v6  ;;  %v8743_v6 = vld [vmem:[%s11210_s1 + $0xa8c] ss:$16 sps:$4 sm:$0xff]  }
 0x11b   : > { %3125 = vmatpush1.bf16.msra.mxu0 %v8618_v63  ;;  %v8708_v63 = vld [vmem:[%s11210_s1 + $0xa80] ss:$16 sps:$4 sm:$0xff]  }
 0x11c   : > { %3126 = vmatprep.subr.bf16.mxu0 %v8626_v1  ;;  %v8716_v1 = vld [vmem:[%s11210_s1 + $0xaa4] ss:$16 sps:$4 sm:$0xff]  }
 0x11d   : > { %3211 = vmatpush1.bf16.msra.mxu1 %v8651_v8  ;;  %v8741_v8 = vld [vmem:[%s11210_s1 + $0xa88] ss:$16 sps:$4 sm:$0xff]  }
 0x11e   : > { %3212 = vmatprep.subr.bf16.mxu1 %v8659_v10  ;;  %v8749_v10 = vld [vmem:[%s11210_s1 + $0xaac] ss:$16 sps:$4 sm:$0xff]  }
 0x11f   : > { %3127 = vmatpush1.bf16.msra.mxu0 %v8624_v3  ;;  %v8714_v3 = vld [vmem:[%s11210_s1 + $0xaa0] ss:$16 sps:$4 sm:$0xff]  }
 0x120   : > { %3128 = vmatprep.subr.bf16.mxu0 %v8632_v5  ;;  %v8722_v5 = vld [vmem:[%s11210_s1 + $0xac4] ss:$16 sps:$4 sm:$0xff]  }
 0x121   : > { %3213 = vmatpush1.bf16.msra.mxu1 %v8657_v13  ;;  %v8747_v13 = vld [vmem:[%s11210_s1 + $0xaa8] ss:$16 sps:$4 sm:$0xff]  }
 0x122   : > { %3214 = vmatprep.subr.bf16.mxu1 %v8665_v14  ;;  %v8755_v14 = vld [vmem:[%s11210_s1 + $0xacc] ss:$16 sps:$4 sm:$0xff]  }
 0x123   : > { %3129 = vmatpush1.bf16.msra.mxu0 %v8630_v7  ;;  %v8720_v7 = vld [vmem:[%s11210_s1 + $0xac0] ss:$16 sps:$4 sm:$0xff]  }
 0x124   : > { %3130 = vmatprep.subr.bf16.mxu0 %v8638_v9  ;;  %v8728_v9 = vld [vmem:[%s11210_s1 + $0xae4] ss:$16 sps:$4 sm:$0xff]  }
 0x125   : > { %3215 = vmatpush1.bf16.msra.mxu1 %v8663_v17  ;;  %v8753_v17 = vld [vmem:[%s11210_s1 + $0xac8] ss:$16 sps:$4 sm:$0xff]  }
 0x126   : > { %3216 = vmatprep.subr.bf16.mxu1 %v8671_v19  ;;  %v8761_v19 = vld [vmem:[%s11210_s1 + $0xaec] ss:$16 sps:$4 sm:$0xff]  }
 0x127   : > { %3131 = vmatpush1.bf16.msra.mxu0 %v8636_v12  ;;  %v8726_v12 = vld [vmem:[%s11210_s1 + $0xae0] ss:$16 sps:$4 sm:$0xff]  }
 0x128   : > { %3132 = vmatprep.subr.bf16.mxu0 %v8644_v45  ;;  %v8734_v45 = vld [vmem:[%s11210_s1 + $0xb04] ss:$16 sps:$4 sm:$0xff]  }
 0x129   : > { %3217 = vmatpush1.bf16.msra.mxu1 %v8669_v21  ;;  %v8759_v21 = vld [vmem:[%s11210_s1 + $0xae8] ss:$16 sps:$4 sm:$0xff]  }
 0x12a   : > { %3218 = vmatprep.subr.bf16.mxu1 %v8677_v22  ;;  %v8767_v22 = vld [vmem:[%s11210_s1 + $0xb0c] ss:$16 sps:$4 sm:$0xff]  }
 0x12b   : > { %3133 = vmatpush1.bf16.msra.mxu0 %v8642_v15  ;;  %v8732_v15 = vld [vmem:[%s11210_s1 + $0xb00] ss:$16 sps:$4 sm:$0xff]  }
 0x12c   : > { %3134 = vmatprep.subr.bf16.mxu0 %v8650_v18  ;;  %v8740_v18 = vld [vmem:[%s11210_s1 + $0xb24] ss:$16 sps:$4 sm:$0xff]  }
 0x12d   : > { %3219 = vmatpush1.bf16.msra.mxu1 %v8675_v25  ;;  %v8765_v25 = vld [vmem:[%s11210_s1 + $0xb08] ss:$16 sps:$4 sm:$0xff]  }
 0x12e   : > { %3220 = vmatprep.subr.bf16.mxu1 %v8683_v27  ;;  %v8773_v27 = vld [vmem:[%s11210_s1 + $0xb2c] ss:$16 sps:$4 sm:$0xff]  }
 0x12f   : > { %3135 = vmatpush1.bf16.msra.mxu0 %v8648_v20  ;;  %v8738_v20 = vld [vmem:[%s11210_s1 + $0xb20] ss:$16 sps:$4 sm:$0xff]  }
 0x130   : > { %3136 = vmatprep.subr.bf16.mxu0 %v8656_v61  ;;  %v8746_v61 = vld [vmem:[%s11210_s1 + $0xb44] ss:$16 sps:$4 sm:$0xff]  }
 0x131   : > { %3221 = vmatpush1.bf16.msra.mxu1 %v8681_v29  ;;  %v8771_v29 = vld [vmem:[%s11210_s1 + $0xb28] ss:$16 sps:$4 sm:$0xff]  }
 0x132   : > { %3222 = vmatprep.subr.bf16.mxu1 %v8689_v31  ;;  %v8779_v31 = vld [vmem:[%s11210_s1 + $0xb4c] ss:$16 sps:$4 sm:$0xff]  }
 0x133   : > { %3137 = vmatpush1.bf16.msra.mxu0 %v8654_v23  ;;  %v8744_v23 = vld [vmem:[%s11210_s1 + $0xb40] ss:$16 sps:$4 sm:$0xff]  }
 0x134   : > { %3138 = vmatprep.subr.bf16.mxu0 %v8662_v26  ;;  %v8752_v26 = vld [vmem:[%s11210_s1 + $0xb64] ss:$16 sps:$4 sm:$0xff]  }
 0x135   : > { %3223 = vmatpush1.bf16.msra.mxu1 %v8687_v33  ;;  %v8777_v33 = vld [vmem:[%s11210_s1 + $0xb48] ss:$16 sps:$4 sm:$0xff]  }
 0x136   : > { %3224 = vmatprep.subr.bf16.mxu1 %v8695_v35  ;;  %v8782_v35 = vld [vmem:[%s11210_s1 + $0xb6c] ss:$16 sps:$4 sm:$0xff]  }
 0x137   : > { %3139 = vmatpush1.bf16.msra.mxu0 %v8660_v28  ;;  %v8750_v28 = vld [vmem:[%s11210_s1 + $0xb60] ss:$16 sps:$4 sm:$0xff]  }
 0x138   : > { %3140 = vmatprep.subr.bf16.mxu0 %v8668_v30  ;;  %v8758_v30 = vld [vmem:[%s11210_s1 + $0xb84] ss:$16 sps:$4 sm:$0xff]  }
 0x139   : > { %3225 = vmatpush1.bf16.msra.mxu1 %v8693_v37  ;;  %v8770_v37 = vld [vmem:[%s11210_s1 + $0xbc4] ss:$16 sps:$4 sm:$0xff]  }
 0x13a   : > { %3226 = vmatprep.subr.bf16.mxu1 %v8701_v39  ;;  %v2306_v39 = vld [vmem:[#allocation2 + $0x10] sm:$0xfc] }
 0x13b   : > { %3141 = vmatpush1.bf16.msra.mxu0 %v8666_v32  ;;  %v8756_v32 = vld [vmem:[%s11210_s1 + $0xb80] ss:$16 sps:$4 sm:$0xff]  }
 0x13c   : > { %3142 = vmatprep.subr.bf16.mxu0 %v8674_v34  ;;  %v8764_v34 = vld [vmem:[%s11210_s1 + $0xba4] ss:$16 sps:$4 sm:$0xff]  }
 0x13d   : > { %3227 = vmatpush1.bf16.msra.mxu1 %v8699_v41  ;;  %v8785_v41 = vld [vmem:[%s11210_s1 + $0xb8c] ss:$16 sps:$4 sm:$0xff]  }
 0x13e   : > { %3228 = vmatprep.subr.bf16.mxu1 %v8707_v43  ;;  %v8947_v43 = vld [vmem:[#allocation2 + $0x30] sm:$0xff] }
 0x13f   : > { %3143 = vmatpush1.bf16.msra.mxu0 %v8672_v36  ;;  %v8762_v36 = vld [vmem:[%s11210_s1 + $0xba0] ss:$16 sps:$4 sm:$0xff]  }
 0x140   : > { %3144 = vmatprep.subr.bf16.mxu0 %v8680_v38  ;;  %v8780_v38 = vld [vmem:[%s11210_s1 + $0xb68] ss:$16 sps:$4 sm:$0xff]  }
 0x141   : > { %3229 = vmatpush1.bf16.msra.mxu1 %v8705_v46 }
 0x142   : > { %3230 = vmatprep.subr.bf16.mxu1 %v8713_v48  ;;  %v8776_v48 = vld [vmem:[%s11210_s1 + $0xbe4] ss:$16 sps:$4 sm:$0xff]  }
 0x143   : > { %3145 = vmatpush1.bf16.msra.mxu0 %v8678_v40  ;;  %v2310_v40 = vld [vmem:[#allocation2 + $0x50] sm:$0x3] }
 0x144   : > { %3157 = vmatprep.subr.bf16.mxu0 %v8686_v42  ;;  %v8768_v42 = vld [vmem:[%s11210_s1 + $0xbc0] ss:$16 sps:$4 sm:$0xff]   ;;  %v2318_v46 = vpack.c.bf16 %v2310_v40, %v2310_v40  ;;  %v8804_v40 = vld [vmem:[%s11211_s2 + $0x48] sm:$0xff]  }
 0x145   : > { %3231 = vmatpush1.bf16.msra.mxu1 %v8711_v50 }
 0x146   : > { %3147 = vmatmul.mubr.bf16.vlgmr.msra.gmra.mrb[0].mxu0 %v2460_v49  ;;  %3243 = vmatprep.subr.bf16.mxu1 %v8719_v52  ;;  %v8786_v52 = vld [vmem:[%s11210_s1 + $0xba8] ss:$16 sps:$4 sm:$0xff]  }
 0x147   : > { %3158 = vmatpush1.bf16.msra.mxu0 %v8684_v44  ;;  %3189 = vmatprep.mubr.bf16.mxu0 %v2469_v53  ;;  %v2314_v44 = vpack.c.bf16 %v8947_v43, %v2306_v39 }
 0x148   : > { %3159 = vmatprep.subr.bf16.mxu0 %v8692_v47  ;;  %3233 = vmatmul.mubr.bf16.vlgmr.msra.gmra.mrb[0].mxu1 %v2460_v49  ;;  %v8783_v47 = vld [vmem:[%s11210_s1 + $0xb88] ss:$16 sps:$4 sm:$0xff]   ;;  %v8788_v49 = vld [vmem:[%s11210_s1 + $0xbac] ss:$16 sps:$4 sm:$0xff]  }
 0x149   : > { %3244 = vmatpush1.bf16.msra.mxu1 %v8717_v55  ;;  %3275 = vmatprep.mubr.bf16.mxu1 %v2469_v53  ;;  %v2464_v50 = vrot.slane %v2314_v44, 1  ;;  %v8791_v53 = vld [vmem:[%s11210_s1 + $0xbcc] ss:$16 sps:$4 sm:$0xff]   ;;  %v8789_v55 = vld [vmem:[%s11210_s1 + $0xbc8] ss:$16 sps:$4 sm:$0xff]  }
 0x14a   : > { %3245 = vmatprep.subr.bf16.mxu1 %v8725_v56  ;;  %v8792_v56 = vld [vmem:[%s11210_s1 + $0xbe8] ss:$16 sps:$4 sm:$0xff]  }
 0x14b   : > { %3160 = vmatpush1.bf16.msra.mxu0 %v8690_v11  ;;  %v8774_v11 = vld [vmem:[%s11210_s1 + $0xbe0] ss:$16 sps:$4 sm:$0xff]  }
 0x14c   : > { %3161 = vmatprep.subr.bf16.mxu0 %v8698_v51  ;;  %v2465_v51 = vrot.slane %v2318_v46, 1 }
 0x14d   : > { %3246 = vmatpush1.bf16.msra.mxu1 %v8723_v59  ;;  %v8796_v59 = vld [vmem:[%s11211_s2] sm:$0xff]  }
 0x14e   : > { %3247 = vmatprep.subr.bf16.mxu1 %v8731_v62  ;;  %v8797_v62 = vld [vmem:[%s11211_s2 + $0x28] sm:$0xff]  }
 0x14f   : > { %3162 = vmatpush1.bf16.msra.mxu0 %v8696_v54  ;;  %v2466_v54 = vsel %vm2457_vm3, %v2464_v50, %v2465_v51  ;;  %v8811_v50 = vld [vmem:[%s11211_s2 + $0x90] sm:$0xff]  }
 0x150   : > { %3163 = vmatprep.subr.bf16.mxu0 %v8704_v58  ;;  %v8794_v58 = vld [vmem:[%s11210_s1 + $0xbec] ss:$16 sps:$4 sm:$0xff]   ;;  %v8812_v51 = vld [vmem:[%s11211_s2 + $0x70] sm:$0xff]  }
 0x151   : > { %3248 = vmatpush1.bf16.msra.mxu1 %v8729_v0 }
 0x152   : > { %3249 = vmatprep.subr.bf16.mxu1 %v8737_v2  ;;  %v8799_v2 = vld [vmem:[%s11211_s2 + $0x30] sm:$0xff]  }
 0x153   : > { %3164 = vmatpush1.bf16.msra.mxu0 %v8702_v57  ;;  %v8795_v57 = vld [vmem:[%s11211_s2 + $0x20] sm:$0xff]  }
 0x154   : > { %3165 = vmatprep.subr.bf16.mxu0 %v8710_v60  ;;  %v3297_v60 = vshrl.u32 %v288_v16, 7 }
 0x155   : > { %3250 = vmatpush1.bf16.msra.mxu1 %v8735_v4  ;;  %v8800_v4 = vld [vmem:[%s11211_s2 + $0x10] sm:$0xff]  }
 0x156   : > { %3251 = vmatprep.subr.bf16.mxu1 %v8743_v6  ;;  %v10254_v0 = vsub.s32 0, %v3297_v60  ;;  %v10259_v16 = vsub.s32 1, %v3297_v60 }
 0x157   : > { %3166 = vmatpush1.bf16.msra.mxu0 %v8708_v63  ;;  %v8798_v63 = vld [vmem:[%s11211_s2 + $0x8] sm:$0xff]  }
 0x158   : > { %3167 = vmatprep.subr.bf16.mxu0 %v8716_v1  ;;  %v3294_v1 = vld [vmem:[%s11213_s4] ss:$8 sm:$0xf] }
 0x159   : > { %3252 = vmatpush1.bf16.msra.mxu1 %v8741_v8 }
 0x15a   : > { %3253 = vmatprep.subr.bf16.mxu1 %v8749_v10  ;;  %v10276_v10 = vsub.s32 2, %v3297_v60 }
 0x15b   : > { %3168 = vmatpush1.bf16.msra.mxu0 %v8714_v3  ;;  %v3299_v3 = vrot.slane %v3294_v1, %v10254_v0 }
 0x15c   : > { %3169 = vmatprep.subr.bf16.mxu0 %v8722_v5  ;;  %v3303_v5 = vrot.slane %v3294_v1, %v10259_v16 }
 0x15d   : > { %3254 = vmatpush1.bf16.msra.mxu1 %v8747_v13 }
 0x15e   : > { %3255 = vmatprep.subr.bf16.mxu1 %v8755_v14  ;;  %v10283_v14 = vsub.s32 3, %v3297_v60 }
 0x15f   : > { %3170 = vmatpush1.bf16.msra.mxu0 %v8720_v7  ;;  %v8801_v7 = vld [vmem:[%s11211_s2 + $0x38] sm:$0xff]  }
 0x160   : > { %3171 = vmatprep.subr.bf16.mxu0 %v8728_v9 }
 0x161   : > { %3256 = vmatpush1.bf16.msra.mxu1 %v8753_v17 }
 0x162   : > { %3257 = vmatprep.subr.bf16.mxu1 %v8761_v19 }
 0x163   : > { %3172 = vmatpush1.bf16.msra.mxu0 %v8726_v12  ;;  %v8802_v12 = vld [vmem:[%s11211_s2 + $0x18] sm:$0xff]  }
 0x164   : > { %3173 = vmatprep.subr.bf16.mxu0 %v8734_v45 }
 0x165   : > { %3258 = vmatpush1.bf16.msra.mxu1 %v8759_v21  ;;  %v3307_v21 = vrot.slane %v3294_v1, %v10276_v10 }
 0x166   : > { %3259 = vmatprep.subr.bf16.mxu1 %v8767_v22 }
 0x167   : > { %3174 = vmatpush1.bf16.msra.mxu0 %v8732_v15 }
 0x168   : > { %3175 = vmatprep.subr.bf16.mxu0 %v8740_v18 }
 0x169   : > { %3260 = vmatpush1.bf16.msra.mxu1 %v8765_v25 }
 0x16a   : > { %3261 = vmatprep.subr.bf16.mxu1 %v8773_v27 }
 0x16b   : > { %3176 = vmatpush1.bf16.msra.mxu0 %v8738_v20 }
 0x16c   : > { %3177 = vmatprep.subr.bf16.mxu0 %v8746_v61  ;;  %v3311_v61 = vrot.slane %v3294_v1, %v10283_v14 }
 0x16d   : > { %3262 = vmatpush1.bf16.msra.mxu1 %v8771_v29 }
 0x16e   : > { %3263 = vmatprep.subr.bf16.mxu1 %v8779_v31 }
 0x16f   : > { %3178 = vmatpush1.bf16.msra.mxu0 %v8744_v23 }
 0x170   : > { %3179 = vmatprep.subr.bf16.mxu0 %v8752_v26 }
 0x171   : > { %3264 = vmatpush1.bf16.msra.mxu1 %v8777_v33 }
 0x172   : > { %3265 = vmatprep.subr.bf16.mxu1 %v8782_v35 }
 0x173   : > { %3180 = vmatpush1.bf16.msra.mxu0 %v8750_v28 }
 0x174   : > { %3181 = vmatprep.subr.bf16.mxu0 %v8758_v30 }
 0x175   : > { %3266 = vmatpush1.bf16.msra.mxu1 %v8780_v38 }
 0x176   : > { %3267 = vmatprep.subr.bf16.mxu1 %v8785_v41  ;;  %v8805_v41 = vld [vmem:[%s11211_s2 + $0x50] sm:$0xff]  }
 0x177   : > { %3182 = vmatpush1.bf16.msra.mxu0 %v8756_v32 }
 0x178   : > { %3183 = vmatprep.subr.bf16.mxu0 %v8764_v34  ;;  %v8803_v34 = vld [vmem:[%s11211_s2 + $0x40] sm:$0xff]  }
 0x179   : > { %3268 = vmatpush1.bf16.msra.mxu1 %v8783_v47  ;;  %v8807_v47 = vld [vmem:[%s11211_s2 + $0x80] sm:$0xff]  }
 0x17a   : > { %3269 = vmatprep.subr.bf16.mxu1 %v8788_v49  ;;  %v8809_v49 = vld [vmem:[%s11211_s2 + $0x88] sm:$0xff]  }
 0x17b   : > { %3184 = vmatpush1.bf16.msra.mxu0 %v8762_v36 }
 0x17c   : > { %3185 = vmatprep.subr.bf16.mxu0 %v8770_v37 }
 0x17d   : > { %3270 = vmatpush1.bf16.msra.mxu1 %v8786_v52  ;;  %v8813_v52 = vld [vmem:[%s11211_s2 + $0x98] sm:$0xff]  }
 0x17e   : > { %3271 = vmatprep.subr.bf16.mxu1 %v8791_v53  ;;  %v8814_v53 = vld [vmem:[%s11211_s2 + $0x78] sm:$0xff]  }
 0x17f   : > { %3186 = vmatpush1.bf16.msra.mxu0 %v8768_v42  ;;  %v8806_v42 = vld [vmem:[%s11211_s2 + $0x58] sm:$0xff]  }
 0x180   : > { %3187 = vmatprep.subr.bf16.mxu0 %v8776_v48  ;;  %v8808_v48 = vld [vmem:[%s11211_s2 + $0x60] sm:$0xff]  }
 0x181   : > { %3272 = vmatpush1.bf16.msra.mxu1 %v8789_v55 }
 0x182   : > { %3273 = vmatprep.subr.bf16.mxu1 %v8794_v58 }
 0x183   : > { %3188 = vmatpush1.bf16.msra.mxu0 %v8774_v11  ;;  %v8810_v11 = vld [vmem:[%s11211_s2 + $0x68] sm:$0xff]  }
 0x184   : > { %7769 = vmatprep.subr.bf16.mxu0 %v8964_v24 }
 0x185   : > { %3274 = vmatpush1.bf16.msra.mxu1 %v8792_v56 }
 0x186   : > { %3190 = vmatmul.mubr.bf16.vlgmr.msra.gmra.mrb[0].mxu0 %v2466_v54  ;;  %7781 = vmatprep.subr.bf16.mxu1 %v8964_v24 }
 0x187   : > { %7770 = vmatpush3.bf16.msra.mxu0 %v8795_v57  ;;  %7777 = vmatprep.mubr.msk.bf16.mxu0 %vm8965_vm6, %v8964_v24 }
 0x188   : > { %3276 = vmatmul.mubr.bf16.vlgmr.msra.gmra.mrb[0].mxu1 %v2466_v54  ;;  %7771 = vmatprep.subr.bf16.mxu0 %v8964_v24 }
 0x189   : > { %7782 = vmatpush3.bf16.msra.mxu1 %v8796_v59  ;;  %7789 = vmatprep.mubr.msk.bf16.mxu1 %vm8965_vm6, %v8964_v24 }
 0x18a   : > { %7783 = vmatprep.subr.bf16.mxu1 %v8964_v24 }
 0x18b   : > { %7772 = vmatpush3.bf16.msra.mxu0 %v8797_v62 }
 0x18c   : > { %7773 = vmatprep.subr.bf16.mxu0 %v8964_v24 }
 0x18d   : > { %7784 = vmatpush3.bf16.msra.mxu1 %v8798_v63 }
 0x18e   : > { %7785 = vmatprep.subr.bf16.mxu1 %v8964_v24 }
 0x18f   : > { %7774 = vmatpush3.bf16.msra.mxu0 %v8799_v2  ;;  %v7204_v2 = vld [vmem:[%s11214_s5] ss:$0 sm:$0xff] }
 0x190   : > { %7775 = vmatprep.subr.bf16.mxu0 %v8964_v24 }
 0x191   : > { %7786 = vmatpush3.bf16.msra.mxu1 %v8800_v4 }
 0x192   : > { %7787 = vmatprep.subr.bf16.mxu1 %v8964_v24 }
 0x193   : > { %7776 = vmatpush3.bf16.msra.mxu0 %v8801_v7 }
 0x194   : > { %7793 = vmatprep.subr.bf16.mxu0 %v8964_v24 }
 0x195   : > { %7788 = vmatpush3.bf16.msra.mxu1 %v8802_v12 }
 0x196   : > { %7805 = vmatprep.subr.bf16.mxu1 %v8964_v24 }
 0x259   : > { %v3191_v6 = vpop.f32.mrb[0].mxu0 }
 0x25a   : > { %v3316_v8 = vadd.f32 %v3299_v3, %v3191_v6  ;;  %v3193_v9 = vpop.f32.mrb[1].mxu0 }
 0x25b   : > { %v10281_v13 = vadd.f32 %v3303_v5, %v3193_v9  ;;  %v3195_v45 = vpop.f32.mrb[2].mxu0  ;;  %v3277_v22 = vpop.f32.mrb[0].mxu1 }
 0x25c   : > { %v3324_v15 = vmax.f32 %v3316_v8, 0.0  ;;  %v3320_v17 = vadd.f32 %v3299_v3, %v3195_v45  ;;  %v3197_v18 = vpop.f32.mrb[3].mxu0  ;;  %v10299_v23 = vadd.f32 %v3307_v21, %v3277_v22  ;;  %v3279_v25 = vpop.f32.mrb[1].mxu1  ;;  %v8815_v22 = vld [vmem:[%s11211_s2 + $0xa0] sm:$0xff]  }
 0x25d   : > { %v10286_v19 = vadd.f32 %v3303_v5, %v3197_v18  ;;  %v10301_v26 = vadd.f32 %v3311_v61, %v3279_v25  ;;  %v3281_v27 = vpop.f32.mrb[2].mxu1  ;;  %v3325_v12 = vmax.f32 %v10281_v13, 0.0 }
 0x25e   : > { %3336 = vst.msk [vmem:[#allocation4] sm:$0xff] %vm3335_vm5, %v3324_v15  ;;  %v3328_v20 = vmax.f32 %v3320_v17, 0.0  ;;  %3341 = vrot.lane.b32.xlu0 %v3324_v15, %s8966_s30  ;;  %v10303_v28 = vadd.f32 %v3307_v21, %v3281_v27  ;;  %v3283_v29 = vpop.f32.mrb[3].mxu1 }
 0x25f   : > { %v10305_v30 = vadd.f32 %v3311_v61, %v3283_v29  ;;  %v3329_v17 = vmax.f32 %v10286_v19, 0.0 }
 0x260   : > { %3337 = vst.msk [vmem:[#allocation4 + $0x20] sm:$0xff] %vm3335_vm5, %v3328_v20  ;;  %v3330_v13 = vmax.f32 %v10303_v28, 0.0 }
 0x262   : > { %3343 = vrot.lane.b32.xlu0 %v3328_v20, %s8966_s30 }
 0x2d0   : > { %v3342_v31 = vpop.permute.xlu0 %3341 }
 0x2d1   : > { %3347 = vst.msk [vmem:[#allocation3 + $0x4] sm:$0xff] %vm3335_vm5, %v3342_v31 }
 0x2d4   : > { %v3344_v32 = vpop.permute.xlu0 %3343 }
 0x2d5   : > { %3348 = vst.msk [vmem:[#allocation3 + $0xc] sm:$0xff] %vm3335_vm5, %v3344_v32 }
 0x2d8   : > { %v3360_v33 = vld [vmem:[#allocation3 + $0x4] sm:$0xff] }
 0x2d9   : > { %v3349_v37 = vld [vmem:[#allocation3 + $0x3] sm:$0xff] }
 0x2dc   : > { %v3350_v35 = vld [vmem:[#allocation3 + $0xb] sm:$0xff] }
 0x2dd   : > { %v3361_v36 = vld [vmem:[#allocation3 + $0xc] sm:$0xff]  ;;  %v3351_v39 = vpack.c.bf16 %v3350_v35, %v3349_v37  ;;  %v8818_v35 = vld [vmem:[%s11211_s2 + $0xb8] sm:$0xff]  }
 0x2de   : > { %v3362_v38 = vpack.c.bf16 %v3361_v36, %v3360_v33  ;;  %v3508_v43 = vld [vmem:[#allocation3 + $0x5] sm:$0xff]  ;;  %v3509_v44 = vld [vmem:[#allocation3 + $0xd] sm:$0xff] }
 0x2df   : > { %7790 = vmatmul.mubr.msk.bf16.vlgmr.msra.gmra.mrb[4].mxu1 %vm3335_vm5, %v3351_v39  ;;  %v3510_v46 = vpack.c.bf16 %v3509_v44, %v3508_v43  ;;  %v8816_v33 = vld [vmem:[%s11211_s2 + $0xa8] sm:$0xff]  }
 0x2e0   : > { %7778 = vmatmul.mubr.msk.bf16.vlgmr.msra.gmra.mrb[4].mxu0 %vm3335_vm5, %v3362_v38  ;;  %7813 = vmatprep.mubr.msk.bf16.mxu1 %vm8965_vm6, %v8964_v24 }
 0x2e1   : > { %7794 = vmatpush3.bf16.msra.mxu0 %v8803_v34  ;;  %7801 = vmatprep.mubr.msk.bf16.mxu0 %vm8965_vm6, %v8964_v24  ;;  %v8817_v34 = vld [vmem:[%s11211_s2 + $0xb0] sm:$0xff]  }
 0x2e2   : > { %7795 = vmatprep.subr.bf16.mxu0 %v8964_v24  ;;  %7806 = vmatpush3.bf16.msra.mxu1 %v8807_v47 }
 0x2e3   : > { %7807 = vmatprep.subr.bf16.mxu1 %v8964_v24 }
 0x2e5   : > { %7796 = vmatpush3.bf16.msra.mxu0 %v8804_v40 }
 0x2e6   : > { %7797 = vmatprep.subr.bf16.mxu0 %v8964_v24  ;;  %7808 = vmatpush3.bf16.msra.mxu1 %v8809_v49 }
 0x2e7   : > { %7809 = vmatprep.subr.bf16.mxu1 %v8964_v24 }
 0x2e9   : > { %7798 = vmatpush3.bf16.msra.mxu0 %v8805_v41 }
 0x2ea   : > { %7799 = vmatprep.subr.bf16.mxu0 %v8964_v24  ;;  %7810 = vmatpush3.bf16.msra.mxu1 %v8811_v50  ;;  %v7244_v50 = vld [vmem:[%s11214_s5 + $0x1] ss:$0 sm:$0xff] }
 0x2eb   : > { %7811 = vmatprep.subr.bf16.mxu1 %v8964_v24 }
 0x2ed   : > { %7800 = vmatpush3.bf16.msra.mxu0 %v8806_v42 }
 0x2ee   : > { %7817 = vmatprep.subr.bf16.mxu0 %v8964_v24  ;;  %7812 = vmatpush3.bf16.msra.mxu1 %v8813_v52 }
 0x2ef   : > { %7829 = vmatprep.subr.bf16.mxu1 %v8964_v24 }
 0x2f0   : > { %7802 = vmatmul.mubr.msk.bf16.vlgmr.msra.gmra.mrb[8].mxu0 %vm3335_vm5, %v3510_v46 }
 0x2f1   : > { %7825 = vmatprep.mubr.msk.bf16.mxu0 %vm8965_vm6, %v8964_v24  ;;  %7818 = vmatpush3.bf16.msra.mxu0 %v8808_v48 }
 0x2f2   : > { %7819 = vmatprep.subr.bf16.mxu0 %v8964_v24 }
 0x2f5   : > { %7820 = vmatpush3.bf16.msra.mxu0 %v8810_v11 }
 0x2f6   : > { %7821 = vmatprep.subr.bf16.mxu0 %v8964_v24 }
 0x2f9   : > { %7822 = vmatpush3.bf16.msra.mxu0 %v8812_v51 }
 0x2fa   : > { %7823 = vmatprep.subr.bf16.mxu0 %v8964_v24 }
 0x2fd   : > { %7824 = vmatpush3.bf16.msra.mxu0 %v8814_v53 }
 0x2fe   : > { %7841 = vmatprep.subr.bf16.mxu0 %v8964_v24 }
 0x3b2   : > { %v3501_v55 = vpop.f32.mrb[4].mxu1 }
 0x3b3   : > { %v3433_v54 = vpop.f32.mrb[4].mxu0  ;;  %v7791_v57 = vpop.f32.mrb[5].mxu1 }
 0x3b4   : > { %v3502_v58 = vadd.f32 %v3501_v55, %v3433_v54  ;;  %v7779_v56 = vpop.f32.mrb[5].mxu0  ;;  %v3504_v60 = vpop.f32.mrb[6].mxu1 }
 0x3b5   : > { %v3436_v59 = vpop.f32.mrb[6].mxu0  ;;  %v7792_v1 = vpop.f32.mrb[7].mxu1 }
 0x3b6   : > { %v3505_v62 = vadd.f32 %v3504_v60, %v3436_v59  ;;  %v7780_v63 = vpop.f32.mrb[7].mxu0  ;;  %v8819_v60 = vld [vmem:[%s11211_s2 + $0xe0] sm:$0xff]   ;;  %v8822_v1 = vld [vmem:[%s11211_s2 + $0xc8] sm:$0xff]  }
 0x3b7   : > { %v8821_v63 = vld [vmem:[%s11211_s2 + $0xe8] sm:$0xff]  }
 0x3c3   : > { %v3581_v3 = vpop.f32.mrb[8].mxu0 }
 0x3c4   : > { %v3588_v4 = vadd.f32 %v3581_v3, %v3502_v58  ;;  %v7803_v5 = vpop.f32.mrb[9].mxu0  ;;  %v8824_v3 = vld [vmem:[%s11211_s2 + $0xd0] sm:$0xff]  }
 0x3c5   : > { %v3584_v6 = vpop.f32.mrb[10].mxu0  ;;  %v8826_v5 = vld [vmem:[%s11211_s2 + $0xd8] sm:$0xff]  }
 0x3c6   : > { %v10369_v7 = vadd.f32 %v7204_v2, %v3588_v4  ;;  %v3589_v8 = vadd.f32 %v3584_v6, %v3505_v62  ;;  %v7804_v9 = vpop.f32.mrb[11].mxu0  ;;  %v8820_v62 = vld [vmem:[%s11211_s2 + $0xc0] sm:$0xff]   ;;  %v8825_v4 = vld [vmem:[%s11211_s2 + $0xf8] sm:$0xff]  }
 0x3c8   : > { %v3596_v45 = vmax.f32 %v10369_v7, 0.0  ;;  %v10373_v15 = vadd.f32 %v7204_v2, %v3589_v8  ;;  %v8823_v2 = vld [vmem:[%s11211_s2 + $0xf0] sm:$0xff]   ;;  %v8827_v7 = vld [vmem:[%s11211_s2 + $0x100] sm:$0xff]  }
 0x3ca   : > { %v3609_v18 = vadd.f32 %v3596_v45, %v3325_v12  ;;  %v3597_v20 = vmax.f32 %v10373_v15, 0.0  ;;  %v8828_v15 = vld [vmem:[%s11212_s3 + $0x20] sm:$0xff]  }
 0x3cc   : > { %3612 = vst.msk [vmem:[#allocation3 + $0x4] sm:$0xff] %vm3335_vm5, %v3609_v18  ;;  %v3610_v21 = vadd.f32 %v3597_v20, %v3329_v17  ;;  %v3326_v18 = vmax.f32 %v10299_v23, 0.0 }
 0x3ce   : > { %3613 = vst.msk [vmem:[#allocation3 + $0xc] sm:$0xff] %vm3335_vm5, %v3610_v21 }
 0x3d3   : > { %v3626_v61 = vld [vmem:[#allocation3 + $0x4] sm:$0xff] }
 0x3d4   : > { %v3614_v27 = vld [vmem:[#allocation3 + $0x3] sm:$0xff] }
 0x3d5   : > { %v3627_v25 = vld [vmem:[#allocation3 + $0xc] sm:$0xff] }
 0x3d6   : > { %v3615_v29 = vld [vmem:[#allocation3 + $0xb] sm:$0xff]  ;;  %v3628_v31 = vpack.c.bf16 %v3627_v25, %v3626_v61  ;;  %v3327_v61 = vmax.f32 %v10301_v26, 0.0 }
 0x3d7   : > { %v3616_v32 = vpack.c.bf16 %v3615_v29, %v3614_v27  ;;  %v3774_v36 = vld [vmem:[#allocation3 + $0x5] sm:$0xff]  ;;  %v3775_v37 = vld [vmem:[#allocation3 + $0xd] sm:$0xff] }
 0x3d8   : > { %7814 = vmatmul.mubr.msk.bf16.vlgmr.msra.gmra.mrb[8].mxu1 %vm3335_vm5, %v3628_v31  ;;  %v3776_v38 = vpack.c.bf16 %v3775_v37, %v3774_v36  ;;  %v8829_v37 = vld [vmem:[%s11211_s2 + $0x108] sm:$0xff]   ;;  %v8839_v26 = vld [vmem:[%s11212_s3 + $0x10] sm:$0xff]  }
 0x3d9   : > { %7826 = vmatmul.mubr.msk.bf16.vlgmr.msra.gmra.mrb[12].mxu0 %vm3335_vm5, %v3616_v32  ;;  %7830 = vmatpush3.bf16.msra.mxu1 %v8815_v22 }
 0x3da   : > { %7837 = vmatprep.mubr.msk.bf16.mxu1 %vm8965_vm6, %v8964_v24  ;;  %7831 = vmatprep.subr.bf16.mxu1 %v8964_v24 }
 0x3db   : > { %7849 = vmatprep.mubr.msk.bf16.mxu0 %vm8965_vm6, %v8964_v24  ;;  %7842 = vmatpush3.bf16.msra.mxu0 %v8819_v60 }
 0x3dc   : > { %7843 = vmatprep.subr.bf16.mxu0 %v8964_v24 }
 0x3dd   : > { %7832 = vmatpush3.bf16.msra.mxu1 %v8816_v33 }
 0x3de   : > { %7833 = vmatprep.subr.bf16.mxu1 %v8964_v24 }
 0x3df   : > { %7844 = vmatpush3.bf16.msra.mxu0 %v8821_v63  ;;  %v8837_v63 = vld [vmem:[%s11212_s3 + $0x8] sm:$0xff]  }
 0x3e0   : > { %7845 = vmatprep.subr.bf16.mxu0 %v8964_v24 }
 0x3e1   : > { %7834 = vmatpush3.bf16.msra.mxu1 %v8817_v34 }
 0x3e2   : > { %7835 = vmatprep.subr.bf16.mxu1 %v8964_v24 }
 0x3e3   : > { %7846 = vmatpush3.bf16.msra.mxu0 %v8823_v2 }
 0x3e4   : > { %7847 = vmatprep.subr.bf16.mxu0 %v8964_v24 }
 0x3e5   : > { %7836 = vmatpush3.bf16.msra.mxu1 %v8818_v35 }
 0x3e6   : > { %7853 = vmatprep.subr.bf16.mxu1 %v8964_v24 }
 0x3e7   : > { %7848 = vmatpush3.bf16.msra.mxu0 %v8825_v4  ;;  %v8842_v4 = vld [vmem:[%s11212_s3 + $0x58] sm:$0xff]  }
 0x3e8   : > { %7838 = vmatmul.mubr.msk.bf16.vlgmr.msra.gmra.mrb[12].mxu1 %vm3335_vm5, %v3776_v38  ;;  %7865 = vmatprep.subr.bf16.mxu0 %v8964_v24  ;;  %v8830_v38 = vld [vmem:[%s11212_s3 + $0x28] sm:$0xff]  }
 0x3e9   : > { %7861 = vmatprep.mubr.msk.bf16.mxu1 %vm8965_vm6, %v8964_v24  ;;  %7854 = vmatpush3.bf16.msra.mxu1 %v8820_v62 }
 0x3ea   : > { %7855 = vmatprep.subr.bf16.mxu1 %v8964_v24 }
 0x3ed   : > { %7856 = vmatpush3.bf16.msra.mxu1 %v8822_v1  ;;  %v8838_v1 = vld [vmem:[%s11212_s3 + $0x48] sm:$0xff]  }
 0x3ee   : > { %7857 = vmatprep.subr.bf16.mxu1 %v8964_v24 }
 0x3f1   : > { %7858 = vmatpush3.bf16.msra.mxu1 %v8824_v3  ;;  %v8840_v3 = vld [vmem:[%s11212_s3 + $0x50] sm:$0xff]  }
 0x3f2   : > { %7859 = vmatprep.subr.bf16.mxu1 %v8964_v24 }
 0x3f5   : > { %7860 = vmatpush3.bf16.msra.mxu1 %v8826_v5 }
 0x3f6   : > { %7877 = vmatprep.subr.bf16.mxu1 %v8964_v24 }
 0x4ab   : > { %v3699_v39 = vpop.f32.mrb[8].mxu1 }
 0x4ac   : > { %v3767_v40 = vpop.f32.mrb[12].mxu0  ;;  %v7815_v42 = vpop.f32.mrb[9].mxu1 }
 0x4ad   : > { %v3768_v41 = vadd.f32 %v3767_v40, %v3699_v39  ;;  %v7827_v43 = vpop.f32.mrb[13].mxu0  ;;  %v3702_v44 = vpop.f32.mrb[10].mxu1  ;;  %v8831_v39 = vld [vmem:[%s11211_s2 + $0x110] sm:$0xff]  }
 0x4ae   : > { %v3770_v46 = vpop.f32.mrb[14].mxu0  ;;  %v7816_v48 = vpop.f32.mrb[11].mxu1  ;;  %v8832_v40 = vld [vmem:[%s11212_s3 + $0x30] sm:$0xff]  }
 0x4af   : > { %v3771_v47 = vadd.f32 %v3770_v46, %v3702_v44  ;;  %v7828_v49 = vpop.f32.mrb[15].mxu0  ;;  %v8833_v48 = vld [vmem:[%s11211_s2 + $0x118] sm:$0xff]  }
 0x4b0   : > { %v8834_v49 = vld [vmem:[%s11212_s3 + $0x38] sm:$0xff]  }
 0x4bb   : > { %v3847_v11 = vpop.f32.mrb[12].mxu1 }
 0x4bc   : > { %v3854_v51 = vadd.f32 %v3847_v11, %v3768_v41  ;;  %v7839_v52 = vpop.f32.mrb[13].mxu1  ;;  %v8835_v11 = vld [vmem:[%s11212_s3] sm:$0xff]  }
 0x4bd   : > { %v3850_v53 = vpop.f32.mrb[14].mxu1 }
 0x4be   : > { %v3855_v54 = vadd.f32 %v3850_v53, %v3771_v47  ;;  %v7840_v55 = vpop.f32.mrb[15].mxu1  ;;  %v3860_v58 = vadd.f32 %v7244_v50, %v3854_v51 }
 0x4c0   : > { %v3861_v56 = vadd.f32 %v7244_v50, %v3855_v54  ;;  %v3862_v57 = vmax.f32 %v3860_v58, 0.0  ;;  %v8836_v50 = vld [vmem:[%s11212_s3 + $0x40] sm:$0xff]  }
 0x4c2   : > { %v3863_v59 = vmax.f32 %v3861_v56, 0.0  ;;  %3868 = vrot.lane.b32.xlu1 %v3862_v57, %s8966_s30  ;;  %3864 = vst.msk [vmem:[#allocation4 + $0x8] sm:$0xff] %vm3335_vm5, %v3862_v57 }
 0x4c4   : > { %3865 = vst.msk [vmem:[#allocation4 + $0x28] sm:$0xff] %vm3335_vm5, %v3863_v59 }
 0x4c6   : > { %3870 = vrot.lane.b32.xlu1 %v3863_v59, %s8966_s30 }
 0x534   : > { %v3869_v6 = vpop.permute.xlu1 %3868 }
 0x535   : > { %v3874_v8 = vadd.f32 %v3869_v6, %v3325_v12  ;;  %v3331_v12 = vmax.f32 %v10305_v30, 0.0  ;;  %v8841_v30 = vld [vmem:[%s11212_s3 + $0x18] sm:$0xff]  }
 0x537   : > { %3879 = vrot.lane.b32.xlu0 %v3874_v8, %s8966_s30 }
 0x538   : > { %v3871_v9 = vpop.permute.xlu1 %3870 }
 0x539   : > { %v3875_v21 = vadd.f32 %v3871_v9, %v3329_v17 }
 0x53b   : > { %4404 = vrot.lane.b32.xlu0 %v3326_v18, %s8966_s30  ;;  %3881 = vrot.lane.b32.xlu1 %v3875_v21, %s8966_s30 }
 0x53f   : > { %5422 = vrot.lane.b32.xlu0 %v3327_v61, %s8966_s30  ;;  %4406 = vrot.lane.b32.xlu1 %v3330_v13, %s8966_s30 }
 0x543   : > { %3600 = vrot.lane.b32.xlu0 %v3596_v45, %s8966_s30  ;;  %5424 = vrot.lane.b32.xlu1 %v3331_v12, %s8966_s30 }
 0x547   : > { %3602 = vrot.lane.b32.xlu1 %v3597_v20, %s8966_s30 }
 0x5a9   : > { %v3880_v19 = vpop.permute.xlu0 %3879 }
 0x5aa   : > { %3885 = vst.msk [vmem:[#allocation3 + $0x4] sm:$0xff] %vm3335_vm5, %v3880_v19 }
 0x5ad   : > { %v4405_v23 = vpop.permute.xlu0 %4404  ;;  %v3882_v28 = vpop.permute.xlu1 %3881 }
 0x5ae   : > { %3886 = vst.msk [vmem:[#allocation3 + $0xc] sm:$0xff] %vm3335_vm5, %v3882_v28 }
 0x5b1   : > { %v10477_v17 = vpop.permute.xlu0 %5422  ;;  %v4407_v22 = vpop.permute.xlu1 %4406  ;;  %v3899_v45 = vld [vmem:[#allocation3 + $0x4] sm:$0xff] }
 0x5b2   : > { %v3887_v25 = vld [vmem:[#allocation3 + $0x3] sm:$0xff] }
 0x5b5   : > { %v3601_v20 = vpop.permute.xlu0 %3600  ;;  %v10485_v27 = vpop.permute.xlu1 %5424  ;;  %v3900_v29 = vld [vmem:[#allocation3 + $0xc] sm:$0xff] }
 0x5b6   : > { %v3888_v31 = vld [vmem:[#allocation3 + $0xb] sm:$0xff]  ;;  %3607 = vst.msk [vmem:[#allocation4] sm:$0xff] %vm3606_vm7, %v3601_v20  ;;  %v3901_v33 = vpack.c.bf16 %v3900_v29, %v3899_v45 }
 0x5b7   : > { %v4047_v32 = vld [vmem:[#allocation3 + $0x5] sm:$0xff]  ;;  %v3889_v34 = vpack.c.bf16 %v3888_v31, %v3887_v25  ;;  %v4048_v35 = vld [vmem:[#allocation3 + $0xd] sm:$0xff] }
 0x5b8   : > { %4148 = vst.msk [vmem:[#allocation3 + $0x4] sm:$0xff] %vm3335_vm5, %v3326_v18  ;;  %4149 = vst.msk [vmem:[#allocation3 + $0xc] sm:$0xff] %vm3335_vm5, %v3330_v13  ;;  %7850 = vmatmul.mubr.msk.bf16.vlgmr.msra.gmra.mrb[16].mxu0 %vm3335_vm5, %v3901_v33  ;;  %v4049_v51 = vpack.c.bf16 %v4048_v35, %v4047_v32  ;;  %v8843_v31 = vld [vmem:[%s11212_s3 + $0x80] sm:$0xff]  }
 0x5b9   : > { %7862 = vmatmul.mubr.msk.bf16.vlgmr.msra.gmra.mrb[16].mxu1 %vm3335_vm5, %v3889_v34  ;;  %7866 = vmatpush3.bf16.msra.mxu0 %v8827_v7  ;;  %v3603_v36 = vpop.permute.xlu1 %3602  ;;  %v8844_v32 = vld [vmem:[%s11212_s3 + $0x60] sm:$0xff]  }
 0x5ba   : > { %7878 = vmatpush3.bf16.msra.mxu1 %v8828_v15  ;;  %3608 = vst.msk [vmem:[#allocation4 + $0x20] sm:$0xff] %vm3606_vm7, %v3603_v36  ;;  %7867 = vmatprep.subr.bf16.mxu0 %v8964_v24  ;;  %v8847_v36 = vld [vmem:[%s11212_s3 + $0x90] sm:$0xff]  }
 0x5bb   : > { %7879 = vmatprep.subr.bf16.mxu1 %v8964_v24  ;;  %7873 = vmatprep.mubr.msk.bf16.mxu0 %vm8965_vm6, %v8964_v24 }
 0x5bc   : > { %7885 = vmatprep.mubr.msk.bf16.mxu1 %vm8965_vm6, %v8964_v24 }
 0x5bd   : > { %7868 = vmatpush3.bf16.msra.mxu0 %v8829_v37  ;;  %v8848_v37 = vld [vmem:[%s11212_s3 + $0x70] sm:$0xff]  }
 0x5be   : > { %7880 = vmatpush3.bf16.msra.mxu1 %v8830_v38  ;;  %7869 = vmatprep.subr.bf16.mxu0 %v8964_v24  ;;  %v8849_v38 = vld [vmem:[%s11212_s3 + $0x98] sm:$0xff]  }
 0x5bf   : > { %v4161_v41 = vld [vmem:[#allocation3 + $0x4] sm:$0xff]  ;;  %7881 = vmatprep.subr.bf16.mxu1 %v8964_v24  ;;  %v4162_v43 = vld [vmem:[#allocation3 + $0xc] sm:$0xff] }
 0x5c0   : > { %v10511_v42 = vld [vmem:[#allocation3 + $0x3] sm:$0xff]  ;;  %v10515_v44 = vld [vmem:[#allocation3 + $0xb] sm:$0xff]  ;;  %v4163_v52 = vpack.c.bf16 %v4162_v43, %v4161_v41 }
 0x5c1   : > { %v10517_v46 = vld [vmem:[#allocation3 + $0x5] sm:$0xff]  ;;  %v10519_v47 = vld [vmem:[#allocation3 + $0xd] sm:$0xff]  ;;  %7870 = vmatpush3.bf16.msra.mxu0 %v8831_v39  ;;  %v4152_v34 = vpack.c.bf16 %v10515_v44, %v10511_v42  ;;  %v8850_v39 = vld [vmem:[%s11212_s3 + $0x78] sm:$0xff]  }
 0x5c2   : > { %4410 = vst.msk [vmem:[#allocation3 + $0x4] sm:$0xff] %vm3335_vm5, %v4405_v23  ;;  %4411 = vst.msk [vmem:[#allocation3 + $0xc] sm:$0xff] %vm3335_vm5, %v4407_v22  ;;  %7882 = vmatpush3.bf16.msra.mxu1 %v8832_v40  ;;  %7871 = vmatprep.subr.bf16.mxu0 %v8964_v24  ;;  %v4311_v35 = vpack.c.bf16 %v10519_v47, %v10517_v46  ;;  %v8851_v40 = vld [vmem:[%s11212_s3 + $0xa0] sm:$0xff]   ;;  %v8853_v44 = vld [vmem:[%s11212_s3 + $0xa8] sm:$0xff]  }
 0x5c3   : > { %7883 = vmatprep.subr.bf16.mxu1 %v8964_v24  ;;  %v8852_v41 = vld [vmem:[%s11212_s3 + $0xc0] sm:$0xff]   ;;  %v8854_v46 = vld [vmem:[%s11212_s3 + $0xc8] sm:$0xff]   ;;  %v8855_v47 = vld [vmem:[%s11212_s3 + $0xb0] sm:$0xff]  }
 0x5c5   : > { %7872 = vmatpush3.bf16.msra.mxu0 %v8833_v48  ;;  %v8856_v48 = vld [vmem:[%s11212_s3 + $0xd0] sm:$0xff]  }
 0x5c6   : > { %7884 = vmatpush3.bf16.msra.mxu1 %v8834_v49  ;;  %7889 = vmatprep.subr.bf16.mxu0 %v8964_v24  ;;  %v8857_v49 = vld [vmem:[%s11212_s3 + $0xb8] sm:$0xff]  }
 0x5c7   : > { %7901 = vmatprep.subr.bf16.mxu1 %v8964_v24 }
 0x5c8   : > { %7874 = vmatmul.mubr.msk.bf16.vlgmr.msra.gmra.mrb[20].mxu0 %vm3335_vm5, %v4049_v51  ;;  %v8860_v51 = vld [vmem:[%s11212_s3 + $0x120] sm:$0xff]  }
 0x5c9   : > { %v10539_v53 = vld [vmem:[#allocation3 + $0x3] sm:$0xff]  ;;  %v10545_v58 = vld [vmem:[#allocation3 + $0xb] sm:$0xff]  ;;  %7886 = vmatmul.mubr.msk.bf16.vlgmr.msra.gmra.mrb[20].mxu1 %vm3335_vm5, %v4163_v52  ;;  %7890 = vmatpush3.bf16.msra.mxu0 %v8835_v11  ;;  %v8858_v11 = vld [vmem:[%s11212_s3 + $0xd8] sm:$0xff]  }
 0x5ca   : > { %v10541_v54 = vld [vmem:[#allocation3 + $0x2] sm:$0xff]  ;;  %v10547_v56 = vld [vmem:[#allocation3 + $0xa] sm:$0xff]  ;;  %7902 = vmatpush3.bf16.msra.mxu1 %v8836_v50  ;;  %7891 = vmatprep.subr.bf16.mxu0 %v8964_v24  ;;  %v4426_v42 = vpack.c.bf16 %v10545_v58, %v10539_v53 }
 0x5cb   : > { %v10543_v55 = vld [vmem:[#allocation3 + $0x4] sm:$0xff]  ;;  %v10549_v57 = vld [vmem:[#allocation3 + $0xc] sm:$0xff]  ;;  %7903 = vmatprep.subr.bf16.mxu1 %v8964_v24  ;;  %7897 = vmatprep.mubr.msk.bf16.mxu0 %vm8965_vm6, %v8964_v24  ;;  %v4414_v43 = vpack.c.bf16 %v10547_v56, %v10541_v54 }
 0x5cc   : > { %v10553_v59 = vld [vmem:[#allocation3 + $0x5] sm:$0xff]  ;;  %v10555_v60 = vld [vmem:[#allocation3 + $0xd] sm:$0xff]  ;;  %7909 = vmatprep.mubr.msk.bf16.mxu1 %vm8965_vm6, %v8964_v24  ;;  %v4574_v52 = vpack.c.bf16 %v10549_v57, %v10543_v55  ;;  %v8865_v57 = vld [vmem:[%s11212_s3 + $0xf8] sm:$0xff]  }
 0x5cd   : > { %v10557_v62 = vld [vmem:[#allocation3 + $0x6] sm:$0xff]  ;;  %v10565_v2 = vld [vmem:[#allocation3 + $0xe] sm:$0xff]  ;;  %7892 = vmatpush3.bf16.msra.mxu0 %v8837_v63  ;;  %v4656_v53 = vpack.c.bf16 %v10555_v60, %v10553_v59  ;;  %v8866_v59 = vld [vmem:[%s11212_s3 + $0x138] sm:$0xff]  }
 0x5ce   : > { %4837 = vst.msk [vmem:[#allocation3 + $0x4] sm:$0xff] %vm3335_vm5, %v3327_v61  ;;  %4838 = vst.msk [vmem:[#allocation3 + $0xc] sm:$0xff] %vm3335_vm5, %v3331_v12  ;;  %7904 = vmatpush3.bf16.msra.mxu1 %v8838_v1  ;;  %7893 = vmatprep.subr.bf16.mxu0 %v8964_v24  ;;  %v8859_v50 = vld [vmem:[%s11212_s3 + $0xe0] sm:$0xff]   ;;  %v8861_v54 = vld [vmem:[%s11212_s3 + $0xe8] sm:$0xff]   ;;  %v4738_v1 = vpack.c.bf16 %v10565_v2, %v10557_v62 }
 0x5cf   : > { %7905 = vmatprep.subr.bf16.mxu1 %v8964_v24  ;;  %v8862_v55 = vld [vmem:[%s11212_s3 + $0x128] sm:$0xff]   ;;  %v8863_v58 = vld [vmem:[%s11212_s3 + $0xf0] sm:$0xff]   ;;  %v8867_v60 = vld [vmem:[%s11212_s3 + $0x100] sm:$0xff]  }
 0x5d0   : > { %v8864_v56 = vld [vmem:[%s11212_s3 + $0x130] sm:$0xff]   ;;  %v8868_v63 = vld [vmem:[%s11212_s3 + $0x140] sm:$0xff]   ;;  %v8870_v62 = vld [vmem:[%s11212_s3 + $0x148] sm:$0xff]  }
 0x5d1   : > { %7894 = vmatpush3.bf16.msra.mxu0 %v8839_v26  ;;  %v8871_v2 = vld [vmem:[%s11212_s3 + $0x110] sm:$0xff]  }
 0x5d2   : > { %7906 = vmatpush3.bf16.msra.mxu1 %v8840_v3  ;;  %7895 = vmatprep.subr.bf16.mxu0 %v8964_v24  ;;  %v8869_v3 = vld [vmem:[%s11212_s3 + $0x108] sm:$0xff]  }
 0x5d3   : > { %7907 = vmatprep.subr.bf16.mxu1 %v8964_v24 }
 0x5d5   : > { %v10593_v5 = vld [vmem:[#allocation3 + $0x2] sm:$0xff]  ;;  %v10599_v9 = vld [vmem:[#allocation3 + $0xa] sm:$0xff]  ;;  %7896 = vmatpush3.bf16.msra.mxu0 %v8841_v30 }
 0x5d6   : > { %v10595_v6 = vld [vmem:[#allocation3 + $0x1] sm:$0xff]  ;;  %v10601_v18 = vld [vmem:[#allocation3 + $0x9] sm:$0xff]  ;;  %7908 = vmatpush3.bf16.msra.mxu1 %v8842_v4  ;;  %7913 = vmatprep.subr.bf16.mxu0 %v8964_v24  ;;  %v4853_v26 = vpack.c.bf16 %v10599_v9, %v10593_v5  ;;  %v8873_v4 = vld [vmem:[%s11212_s3 + $0x118] sm:$0xff]  }
 0x5d7   : > { %v10597_v8 = vld [vmem:[#allocation3 + $0x3] sm:$0xff]  ;;  %v10603_v21 = vld [vmem:[#allocation3 + $0xb] sm:$0xff]  ;;  %v4841_v61 = vpack.c.bf16 %v10601_v18, %v10595_v6  ;;  %7925 = vmatprep.subr.bf16.mxu1 %v8964_v24  ;;  %v8874_v5 = vld [vmem:[%s11212_s3 + $0x158] sm:$0xff]  }
 0x5d8   : > { %v5001_v13 = vpack.c.bf16 %v10603_v21, %v10597_v8  ;;  %v10611_v12 = vld [vmem:[#allocation3 + $0x4] sm:$0xff]  ;;  %v10613_v19 = vld [vmem:[#allocation3 + $0xc] sm:$0xff]  ;;  %7898 = vmatmul.mubr.msk.bf16.vlgmr.msra.gmra.mrb[24].mxu0 %vm3335_vm5, %v4152_v34  ;;  %v8881_v18 = vld [vmem:[%s11212_s3 + $0x178] sm:$0xff]  }
 0x5d9   : > { %v10615_v23 = vld [vmem:[#allocation3 + $0x5] sm:$0xff]  ;;  %v5083_v28 = vpack.c.bf16 %v10613_v19, %v10611_v12  ;;  %v10619_v22 = vld [vmem:[#allocation3 + $0xd] sm:$0xff]  ;;  %7910 = vmatmul.mubr.msk.bf16.vlgmr.msra.gmra.mrb[24].mxu1 %vm3335_vm5, %v4311_v35  ;;  %7914 = vmatpush3.bf16.msra.mxu0 %v8843_v31  ;;  %v8882_v21 = vld [vmem:[%s11212_s3 + $0x198] sm:$0xff]  }
 0x5da   : > { %v10621_v7 = vld [vmem:[#allocation3 + $0x6] sm:$0xff]  ;;  %v10623_v45 = vld [vmem:[#allocation3 + $0xe] sm:$0xff]  ;;  %v5165_v25 = vpack.c.bf16 %v10619_v22, %v10615_v23  ;;  %7926 = vmatpush3.bf16.msra.mxu1 %v8844_v32  ;;  %7915 = vmatprep.subr.bf16.mxu0 %v8964_v24  ;;  %v8889_v23 = vld [vmem:[%s11212_s3 + $0x1b8] sm:$0xff]  }
 0x5db   : > { %v5247_v15 = vpack.c.bf16 %v10623_v45, %v10621_v7  ;;  %v10629_v20 = vld [vmem:[#allocation3 + $0x7] sm:$0xff]  ;;  %v10631_v29 = vld [vmem:[#allocation3 + $0xf] sm:$0xff]  ;;  %7927 = vmatprep.subr.bf16.mxu1 %v8964_v24  ;;  %7921 = vmatprep.mubr.msk.bf16.mxu0 %vm8965_vm6, %v8964_v24 }
 0x5dc   : > { %v5329_v33 = vpack.c.bf16 %v10631_v29, %v10629_v20  ;;  %5428 = vst.msk [vmem:[#allocation3 + $0x4] sm:$0xff] %vm3335_vm5, %v10477_v17  ;;  %5429 = vst.msk [vmem:[#allocation3 + $0xc] sm:$0xff] %vm3335_vm5, %v10485_v27  ;;  %v8845_v17 = vld [vmem:[%s11212_s3 + $0x88] sm:$0xff]   ;;  %7933 = vmatprep.mubr.msk.bf16.mxu1 %vm8965_vm6, %v8964_v24  ;;  %v8872_v30 = vld [vmem:[%s11212_s3 + $0x150] sm:$0xff]  }
 0x5dd   : > { %v8846_v27 = vld [vmem:[%s11212_s3 + $0x68] sm:$0xff]   ;;  %7916 = vmatpush3.bf16.msra.mxu0 %v8845_v17  ;;  %v8875_v9 = vld [vmem:[%s11212_s3 + $0x160] sm:$0xff]   ;;  %v8879_v6 = vld [vmem:[%s11212_s3 + $0x170] sm:$0xff]  }
 0x5de   : > { %7928 = vmatpush3.bf16.msra.mxu1 %v8846_v27  ;;  %7917 = vmatprep.subr.bf16.mxu0 %v8964_v24  ;;  %v8876_v31 = vld [vmem:[%s11212_s3 + $0x180] sm:$0xff]   ;;  %v8877_v32 = vld [vmem:[%s11212_s3 + $0x168] sm:$0xff]   ;;  %v8880_v8 = vld [vmem:[%s11212_s3 + $0x190] sm:$0xff]  }
 0x5df   : > { %7929 = vmatprep.subr.bf16.mxu1 %v8964_v24  ;;  %v8878_v34 = vld [vmem:[%s11212_s3 + $0x188] sm:$0xff]   ;;  %v8887_v12 = vld [vmem:[%s11212_s3 + $0x1b0] sm:$0xff]   ;;  %v8891_v22 = vld [vmem:[%s11212_s3 + $0x200] sm:$0xff]  }
 0x5e0   : > { %v8885_v35 = vld [vmem:[%s11212_s3 + $0x1a8] sm:$0xff]   ;;  %v8888_v19 = vld [vmem:[%s11212_s3 + $0x1d0] sm:$0xff]   ;;  %v8898_v20 = vld [vmem:[%s11212_s3 + $0x1f8] sm:$0xff]  }
 0x5e1   : > { %7918 = vmatpush3.bf16.msra.mxu0 %v8847_v36  ;;  %v8886_v17 = vld [vmem:[%s11212_s3 + $0x1c8] sm:$0xff]   ;;  %v8895_v7 = vld [vmem:[%s11212_s3 + $0x210] sm:$0xff]  }
 0x5e2   : > { %7930 = vmatpush3.bf16.msra.mxu1 %v8848_v37  ;;  %7919 = vmatprep.subr.bf16.mxu0 %v8964_v24  ;;  %v8893_v27 = vld [vmem:[%s11212_s3 + $0x208] sm:$0xff]   ;;  %v8896_v45 = vld [vmem:[%s11212_s3 + $0x1f0] sm:$0xff]  }
 0x5e3   : > { %7931 = vmatprep.subr.bf16.mxu1 %v8964_v24  ;;  %v8894_v36 = vld [vmem:[%s11212_s3 + $0x1e8] sm:$0xff]   ;;  %v5430_v37 = vld [vmem:[#allocation3] sm:$0xff] }
 0x5e4   : > { %v5442_v29 = vld [vmem:[#allocation3 + $0x1] sm:$0xff] }
 0x5e5   : > { %7920 = vmatpush3.bf16.msra.mxu0 %v8849_v38  ;;  %v10939_v38 = vld [vmem:[#allocation3 + $0x8] sm:$0xff] }
 0x5e6   : > { %7932 = vmatpush3.bf16.msra.mxu1 %v8850_v39  ;;  %7937 = vmatprep.subr.bf16.mxu0 %v8964_v24  ;;  %v8899_v39 = vld [vmem:[%s11212_s3 + $0x220] sm:$0xff]  }
 0x5e7   : > { %7949 = vmatprep.subr.bf16.mxu1 %v8964_v24 }
 0x5e8   : > { %7922 = vmatmul.mubr.msk.bf16.vlgmr.msra.gmra.mrb[28].mxu0 %vm3335_vm5, %v4426_v42  ;;  %v5432_v42 = vpack.c.bf16 %v10939_v38, %v5430_v37 }
 0x5e9   : > { %7934 = vmatmul.mubr.msk.bf16.vlgmr.msra.gmra.mrb[28].mxu1 %vm3335_vm5, %v4414_v43  ;;  %7938 = vmatpush3.bf16.msra.mxu0 %v8851_v40  ;;  %v8900_v40 = vld [vmem:[%s11212_s3 + $0x240] sm:$0xff]   ;;  %v8901_v43 = vld [vmem:[%s11212_s3 + $0x228] sm:$0xff]  }
 0x5ea   : > { %7950 = vmatpush3.bf16.msra.mxu1 %v8852_v41  ;;  %7939 = vmatprep.subr.bf16.mxu0 %v8964_v24 }
 0x5eb   : > { %7951 = vmatprep.subr.bf16.mxu1 %v8964_v24  ;;  %7945 = vmatprep.mubr.msk.bf16.mxu0 %vm8965_vm6, %v8964_v24 }
 0x5ec   : > { %7957 = vmatprep.mubr.msk.bf16.mxu1 %vm8965_vm6, %v8964_v24 }
 0x5ed   : > { %7940 = vmatpush3.bf16.msra.mxu0 %v8853_v44  ;;  %v8902_v44 = vld [vmem:[%s11212_s3 + $0x248] sm:$0xff]  }
 0x5ee   : > { %7952 = vmatpush3.bf16.msra.mxu1 %v8854_v46  ;;  %7941 = vmatprep.subr.bf16.mxu0 %v8964_v24  ;;  %v8903_v46 = vld [vmem:[%s11212_s3 + $0x230] sm:$0xff]  }
 0x5ef   : > { %7953 = vmatprep.subr.bf16.mxu1 %v8964_v24 }
 0x5f1   : > { %7942 = vmatpush3.bf16.msra.mxu0 %v8855_v47  ;;  %v8904_v47 = vld [vmem:[%s11212_s3 + $0x250] sm:$0xff]  }
 0x5f2   : > { %7954 = vmatpush3.bf16.msra.mxu1 %v8856_v48  ;;  %7943 = vmatprep.subr.bf16.mxu0 %v8964_v24  ;;  %v8905_v48 = vld [vmem:[%s11212_s3 + $0x238] sm:$0xff]  }
 0x5f3   : > { %7955 = vmatprep.subr.bf16.mxu1 %v8964_v24 }
 0x5f5   : > { %7944 = vmatpush3.bf16.msra.mxu0 %v8857_v49  ;;  %v8906_v49 = vld [vmem:[%s11212_s3 + $0x258] sm:$0xff]  }
 0x5f6   : > { %7956 = vmatpush3.bf16.msra.mxu1 %v8858_v11  ;;  %7961 = vmatprep.subr.bf16.mxu0 %v8964_v24  ;;  %v5590_v11 = vld [vmem:[#allocation3 + $0x2] sm:$0xff] }
 0x5f7   : > { %7973 = vmatprep.subr.bf16.mxu1 %v8964_v24 }
 0x5f8   : > { %7946 = vmatmul.mubr.msk.bf16.vlgmr.msra.gmra.mrb[32].mxu0 %vm3335_vm5, %v4574_v52  ;;  %v5673_v52 = vld [vmem:[#allocation3 + $0xb] sm:$0xff] }
 0x5f9   : > { %7958 = vmatmul.mubr.msk.bf16.vlgmr.msra.gmra.mrb[32].mxu1 %vm3335_vm5, %v4656_v53  ;;  %7962 = vmatpush3.bf16.msra.mxu0 %v8859_v50  ;;  %v5591_v50 = vld [vmem:[#allocation3 + $0xa] sm:$0xff]  ;;  %v8907_v53 = vld [vmem:[%s11212_s3 + $0x260] sm:$0xff]  }
 0x5fa   : > { %7974 = vmatpush3.bf16.msra.mxu1 %v8860_v51  ;;  %7963 = vmatprep.subr.bf16.mxu0 %v8964_v24  ;;  %v5672_v51 = vld [vmem:[#allocation3 + $0x3] sm:$0xff] }
 0x5fb   : > { %7975 = vmatprep.subr.bf16.mxu1 %v8964_v24  ;;  %7969 = vmatprep.mubr.msk.bf16.mxu0 %vm8965_vm6, %v8964_v24 }
 0x5fc   : > { %7981 = vmatprep.mubr.msk.bf16.mxu1 %vm8965_vm6, %v8964_v24 }
 0x5fd   : > { %7964 = vmatpush3.bf16.msra.mxu0 %v8861_v54  ;;  %v8908_v54 = vld [vmem:[%s11212_s3 + $0x280] sm:$0xff]  }
 0x5fe   : > { %7976 = vmatpush3.bf16.msra.mxu1 %v8862_v55  ;;  %7965 = vmatprep.subr.bf16.mxu0 %v8964_v24  ;;  %v5592_v55 = vpack.c.bf16 %v5591_v50, %v5590_v11 }
 0x5ff   : > { %7977 = vmatprep.subr.bf16.mxu1 %v8964_v24 }
 0x601   : > { %7966 = vmatpush3.bf16.msra.mxu0 %v8863_v58  ;;  %v5674_v58 = vpack.c.bf16 %v5673_v52, %v5672_v51 }
 0x602   : > { %7978 = vmatpush3.bf16.msra.mxu1 %v8864_v56  ;;  %7967 = vmatprep.subr.bf16.mxu0 %v8964_v24  ;;  %v8909_v56 = vld [vmem:[%s11212_s3 + $0x268] sm:$0xff]  }
 0x603   : > { %7979 = vmatprep.subr.bf16.mxu1 %v8964_v24 }
 0x605   : > { %7968 = vmatpush3.bf16.msra.mxu0 %v8865_v57  ;;  %v8910_v57 = vld [vmem:[%s11212_s3 + $0x288] sm:$0xff]  }
 0x606   : > { %7980 = vmatpush3.bf16.msra.mxu1 %v8866_v59  ;;  %7985 = vmatprep.subr.bf16.mxu0 %v8964_v24  ;;  %v8911_v59 = vld [vmem:[%s11212_s3 + $0x270] sm:$0xff]  }
 0x607   : > { %7997 = vmatprep.subr.bf16.mxu1 %v8964_v24 }
 0x608   : > { %7970 = vmatmul.mubr.msk.bf16.vlgmr.msra.gmra.mrb[36].mxu0 %vm3335_vm5, %v4738_v1  ;;  %v8914_v1 = vld [vmem:[%s11212_s3 + $0x298] sm:$0xff]  }
 0x609   : > { %7982 = vmatmul.mubr.msk.bf16.vlgmr.msra.gmra.mrb[36].mxu1 %vm3335_vm5, %v4853_v26  ;;  %7986 = vmatpush3.bf16.msra.mxu0 %v8867_v60  ;;  %v8912_v60 = vld [vmem:[%s11212_s3 + $0x290] sm:$0xff]   ;;  %v5754_v26 = vld [vmem:[#allocation3 + $0x4] sm:$0xff] }
 0x60a   : > { %7998 = vmatpush3.bf16.msra.mxu1 %v8868_v63  ;;  %7987 = vmatprep.subr.bf16.mxu0 %v8964_v24  ;;  %v8913_v63 = vld [vmem:[%s11212_s3 + $0x278] sm:$0xff]  }
 0x60b   : > { %7999 = vmatprep.subr.bf16.mxu1 %v8964_v24  ;;  %7993 = vmatprep.mubr.msk.bf16.mxu0 %vm8965_vm6, %v8964_v24 }
 0x60c   : > { %8005 = vmatprep.mubr.msk.bf16.mxu1 %vm8965_vm6, %v8964_v24 }
 0x60d   : > { %7988 = vmatpush3.bf16.msra.mxu0 %v8869_v3  ;;  %v5755_v3 = vld [vmem:[#allocation3 + $0xc] sm:$0xff] }
 0x60e   : > { %8000 = vmatpush3.bf16.msra.mxu1 %v8870_v62  ;;  %7989 = vmatprep.subr.bf16.mxu0 %v8964_v24  ;;  %v5836_v62 = vld [vmem:[#allocation3 + $0x5] sm:$0xff] }
 0x60f   : > { %8001 = vmatprep.subr.bf16.mxu1 %v8964_v24 }
 0x611   : > { %7990 = vmatpush3.bf16.msra.mxu0 %v8871_v2  ;;  %v5837_v2 = vld [vmem:[#allocation3 + $0xd] sm:$0xff] }
 0x612   : > { %8002 = vmatpush3.bf16.msra.mxu1 %v8872_v30  ;;  %7991 = vmatprep.subr.bf16.mxu0 %v8964_v24  ;;  %v8915_v30 = vld [vmem:[%s11212_s3 + $0x2a0] sm:$0xff]  }
 0x613   : > { %8003 = vmatprep.subr.bf16.mxu1 %v8964_v24 }
 0x615   : > { %7992 = vmatpush3.bf16.msra.mxu0 %v8873_v4  ;;  %v8916_v4 = vld [vmem:[%s11212_s3 + $0x2c0] sm:$0xff]  }
 0x616   : > { %8004 = vmatpush3.bf16.msra.mxu1 %v8874_v5  ;;  %8009 = vmatprep.subr.bf16.mxu0 %v8964_v24  ;;  %v5756_v5 = vpack.c.bf16 %v5755_v3, %v5754_v26 }
 0x617   : > { %8021 = vmatprep.subr.bf16.mxu1 %v8964_v24 }
 0x618   : > { %7994 = vmatmul.mubr.msk.bf16.vlgmr.msra.gmra.mrb[40].mxu0 %vm3335_vm5, %v4841_v61  ;;  %v8883_v61 = vld [vmem:[%s11212_s3 + $0x1a0] sm:$0xff]  }
 0x619   : > { %8006 = vmatmul.mubr.msk.bf16.vlgmr.msra.gmra.mrb[40].mxu1 %vm3335_vm5, %v5001_v13  ;;  %8010 = vmatpush3.bf16.msra.mxu0 %v8875_v9  ;;  %v8884_v13 = vld [vmem:[%s11212_s3 + $0x1c0] sm:$0xff]   ;;  %v5838_v9 = vpack.c.bf16 %v5837_v2, %v5836_v62 }
 0x61a   : > { %8022 = vmatpush3.bf16.msra.mxu1 %v8876_v31  ;;  %8011 = vmatprep.subr.bf16.mxu0 %v8964_v24  ;;  %v8917_v31 = vld [vmem:[%s11212_s3 + $0x2a8] sm:$0xff]  }
 0x61b   : > { %8023 = vmatprep.subr.bf16.mxu1 %v8964_v24  ;;  %8017 = vmatprep.mubr.msk.bf16.mxu0 %vm8965_vm6, %v8964_v24 }
 0x61c   : > { %8029 = vmatprep.mubr.msk.bf16.mxu1 %vm8965_vm6, %v8964_v24 }
 0x61d   : > { %8012 = vmatpush3.bf16.msra.mxu0 %v8877_v32  ;;  %v8918_v32 = vld [vmem:[%s11212_s3 + $0x2c8] sm:$0xff]  }
 0x61e   : > { %8024 = vmatpush3.bf16.msra.mxu1 %v8878_v34  ;;  %8013 = vmatprep.subr.bf16.mxu0 %v8964_v24  ;;  %v8919_v34 = vld [vmem:[%s11212_s3 + $0x2b0] sm:$0xff]  }
 0x61f   : > { %8025 = vmatprep.subr.bf16.mxu1 %v8964_v24 }
 0x621   : > { %8014 = vmatpush3.bf16.msra.mxu0 %v8879_v6  ;;  %v8920_v6 = vld [vmem:[%s11212_s3 + $0x2d0] sm:$0xff]  }
 0x622   : > { %8026 = vmatpush3.bf16.msra.mxu1 %v8880_v8  ;;  %8015 = vmatprep.subr.bf16.mxu0 %v8964_v24  ;;  %v8921_v8 = vld [vmem:[%s11212_s3 + $0x2b8] sm:$0xff]  }
 0x623   : > { %8027 = vmatprep.subr.bf16.mxu1 %v8964_v24 }
 0x625   : > { %8016 = vmatpush3.bf16.msra.mxu0 %v8881_v18  ;;  %v8922_v18 = vld [vmem:[%s11212_s3 + $0x2d8] sm:$0xff]  }
 0x626   : > { %8028 = vmatpush3.bf16.msra.mxu1 %v8882_v21  ;;  %8033 = vmatprep.subr.bf16.mxu0 %v8964_v24  ;;  %v5918_v21 = vld [vmem:[#allocation3 + $0x6] sm:$0xff] }
 0x627   : > { %8045 = vmatprep.subr.bf16.mxu1 %v8964_v24 }
 0x628   : > { %8018 = vmatmul.mubr.msk.bf16.vlgmr.msra.gmra.mrb[44].mxu0 %vm3335_vm5, %v5083_v28  ;;  %v8890_v28 = vld [vmem:[%s11212_s3 + $0x1d8] sm:$0xff]  }
 0x629   : > { %8030 = vmatmul.mubr.msk.bf16.vlgmr.msra.gmra.mrb[44].mxu1 %vm3335_vm5, %v5165_v25  ;;  %8034 = vmatpush3.bf16.msra.mxu0 %v8883_v61  ;;  %v8892_v25 = vld [vmem:[%s11212_s3 + $0x1e0] sm:$0xff]   ;;  %v5919_v61 = vld [vmem:[#allocation3 + $0xe] sm:$0xff] }
 0x62a   : > { %8046 = vmatpush3.bf16.msra.mxu1 %v8884_v13  ;;  %8035 = vmatprep.subr.bf16.mxu0 %v8964_v24  ;;  %v6000_v13 = vld [vmem:[#allocation3 + $0x7] sm:$0xff] }
 0x62b   : > { %8047 = vmatprep.subr.bf16.mxu1 %v8964_v24  ;;  %8041 = vmatprep.mubr.msk.bf16.mxu0 %vm8965_vm6, %v8964_v24 }
 0x62c   : > { %8053 = vmatprep.mubr.msk.bf16.mxu1 %vm8965_vm6, %v8964_v24 }
 0x62d   : > { %8036 = vmatpush3.bf16.msra.mxu0 %v8885_v35  ;;  %v6001_v35 = vld [vmem:[#allocation3 + $0xf] sm:$0xff] }
 0x62e   : > { %8048 = vmatpush3.bf16.msra.mxu1 %v8886_v17  ;;  %8037 = vmatprep.subr.bf16.mxu0 %v8964_v24  ;;  %v8923_v17 = vld [vmem:[%s11212_s3 + $0x2e0] sm:$0xff]  }
 0x62f   : > { %8049 = vmatprep.subr.bf16.mxu1 %v8964_v24 }
 0x631   : > { %8038 = vmatpush3.bf16.msra.mxu0 %v8887_v12  ;;  %v5920_v12 = vpack.c.bf16 %v5919_v61, %v5918_v21 }
 0x632   : > { %8050 = vmatpush3.bf16.msra.mxu1 %v8888_v19  ;;  %8039 = vmatprep.subr.bf16.mxu0 %v8964_v24  ;;  %v6002_v19 = vpack.c.bf16 %v6001_v35, %v6000_v13 }
 0x633   : > { %8051 = vmatprep.subr.bf16.mxu1 %v8964_v24 }
 0x635   : > { %8040 = vmatpush3.bf16.msra.mxu0 %v8889_v23  ;;  %v8924_v23 = vld [vmem:[%s11212_s3 + $0x2e8] sm:$0xff]  }
 0x636   : > { %8052 = vmatpush3.bf16.msra.mxu1 %v8890_v28  ;;  %8057 = vmatprep.subr.bf16.mxu0 %v8964_v24  ;;  %v8925_v28 = vld [vmem:[%s11212_s3 + $0x2f0] sm:$0xff]  }
 0x637   : > { %8069 = vmatprep.subr.bf16.mxu1 %v8964_v24 }
 0x638   : > { %8042 = vmatmul.mubr.msk.bf16.vlgmr.msra.gmra.mrb[48].mxu0 %vm3335_vm5, %v5247_v15  ;;  %v8897_v15 = vld [vmem:[%s11212_s3 + $0x218] sm:$0xff]  }
 0x639   : > { %8054 = vmatmul.mubr.msk.bf16.vlgmr.msra.gmra.mrb[48].mxu1 %vm3335_vm5, %v5329_v33  ;;  %8058 = vmatpush3.bf16.msra.mxu0 %v8891_v22  ;;  %v5443_v33 = vld [vmem:[#allocation3 + $0x9] sm:$0xff]  ;;  %v8926_v22 = vld [vmem:[%s11212_s3 + $0x2f8] sm:$0xff]  }
 0x63a   : > { %8070 = vmatpush3.bf16.msra.mxu1 %v8892_v25  ;;  %8059 = vmatprep.subr.bf16.mxu0 %v8964_v24  ;;  %v5444_v41 = vpack.c.bf16 %v5443_v33, %v5442_v29  ;;  %v6083_v25 = vld [vmem:[#allocation3 + $0x10] sm:$0xff] }
 0x63b   : > { %8071 = vmatprep.subr.bf16.mxu1 %v8964_v24  ;;  %8065 = vmatprep.mubr.msk.bf16.mxu0 %vm8965_vm6, %v8964_v24 }
 0x63c   : > { %8077 = vmatprep.mubr.msk.bf16.mxu1 %vm8965_vm6, %v8964_v24 }
 0x63d   : > { %8060 = vmatpush3.bf16.msra.mxu0 %v8893_v27  ;;  %v6084_v27 = vpack.c.bf16 %v6083_v25, %v10939_v38 }
 0x63e   : > { %8072 = vmatpush3.bf16.msra.mxu1 %v8894_v36  ;;  %8061 = vmatprep.subr.bf16.mxu0 %v8964_v24 }
 0x63f   : > { %8073 = vmatprep.subr.bf16.mxu1 %v8964_v24 }
 0x641   : > { %8062 = vmatpush3.bf16.msra.mxu0 %v8895_v7 }
 0x642   : > { %8074 = vmatpush3.bf16.msra.mxu1 %v8896_v45  ;;  %8063 = vmatprep.subr.bf16.mxu0 %v8964_v24 }
 0x643   : > { %8075 = vmatprep.subr.bf16.mxu1 %v8964_v24 }
 0x645   : > { %8064 = vmatpush3.bf16.msra.mxu0 %v8897_v15 }
 0x646   : > { %8076 = vmatpush3.bf16.msra.mxu1 %v8898_v20  ;;  %8081 = vmatprep.subr.bf16.mxu0 %v8964_v24 }
 0x647   : > { %8093 = vmatprep.subr.bf16.mxu1 %v8964_v24 }
 0x648   : > { %8066 = vmatmul.mubr.msk.bf16.vlgmr.msra.gmra.mrb[52].mxu0 %vm3335_vm5, %v5444_v41 }
 0x649   : > { %8078 = vmatmul.mubr.msk.bf16.vlgmr.msra.gmra.mrb[52].mxu1 %vm3335_vm5, %v5432_v42  ;;  %8082 = vmatpush3.bf16.msra.mxu0 %v8899_v39 }
 0x64a   : > { %8094 = vmatpush3.bf16.msra.mxu1 %v8900_v40  ;;  %8083 = vmatprep.subr.bf16.mxu0 %v8964_v24 }
 0x64b   : > { %8095 = vmatprep.subr.bf16.mxu1 %v8964_v24  ;;  %8089 = vmatprep.mubr.msk.bf16.mxu0 %vm8965_vm6, %v8964_v24 }
 0x64c   : > { %8101 = vmatprep.mubr.msk.bf16.mxu1 %vm8965_vm6, %v8964_v24 }
 0x64d   : > { %8084 = vmatpush3.bf16.msra.mxu0 %v8901_v43 }
 0x64e   : > { %8096 = vmatpush3.bf16.msra.mxu1 %v8902_v44  ;;  %8085 = vmatprep.subr.bf16.mxu0 %v8964_v24 }
 0x64f   : > { %8097 = vmatprep.subr.bf16.mxu1 %v8964_v24 }
 0x651   : > { %8086 = vmatpush3.bf16.msra.mxu0 %v8903_v46 }
 0x652   : > { %8098 = vmatpush3.bf16.msra.mxu1 %v8904_v47  ;;  %8087 = vmatprep.subr.bf16.mxu0 %v8964_v24 }
 0x653   : > { %8099 = vmatprep.subr.bf16.mxu1 %v8964_v24 }
 0x655   : > { %8088 = vmatpush3.bf16.msra.mxu0 %v8905_v48 }
 0x656   : > { %8100 = vmatpush3.bf16.msra.mxu1 %v8906_v49  ;;  %8105 = vmatprep.subr.bf16.mxu0 %v8964_v24 }
 0x657   : > { %8117 = vmatprep.subr.bf16.mxu1 %v8964_v24 }
 0x658   : > { %8090 = vmatmul.mubr.msk.bf16.vlgmr.msra.gmra.mrb[56].mxu0 %vm3335_vm5, %v5592_v55 }
 0x659   : > { %8102 = vmatmul.mubr.msk.bf16.vlgmr.msra.gmra.mrb[56].mxu1 %vm3335_vm5, %v5674_v58  ;;  %8106 = vmatpush3.bf16.msra.mxu0 %v8907_v53 }
 0x65a   : > { %8118 = vmatpush3.bf16.msra.mxu1 %v8908_v54  ;;  %8107 = vmatprep.subr.bf16.mxu0 %v8964_v24 }
 0x65b   : > { %8119 = vmatprep.subr.bf16.mxu1 %v8964_v24  ;;  %8113 = vmatprep.mubr.msk.bf16.mxu0 %vm8965_vm6, %v8964_v24 }
 0x65c   : > { %8125 = vmatprep.mubr.msk.bf16.mxu1 %vm8965_vm6, %v8964_v24 }
 0x65d   : > { %8108 = vmatpush3.bf16.msra.mxu0 %v8909_v56 }
 0x65e   : > { %8120 = vmatpush3.bf16.msra.mxu1 %v8910_v57  ;;  %8109 = vmatprep.subr.bf16.mxu0 %v8964_v24 }
 0x65f   : > { %8121 = vmatprep.subr.bf16.mxu1 %v8964_v24 }
 0x661   : > { %8110 = vmatpush3.bf16.msra.mxu0 %v8911_v59  ;;  %v7316_v59 = vld [vmem:[%s11214_s5 + $0x3] ss:$0 sm:$0xff] }
 0x662   : > { %8122 = vmatpush3.bf16.msra.mxu1 %v8912_v60  ;;  %8111 = vmatprep.subr.bf16.mxu0 %v8964_v24 }
 0x663   : > { %8123 = vmatprep.subr.bf16.mxu1 %v8964_v24 }
 0x665   : > { %8112 = vmatpush3.bf16.msra.mxu0 %v8913_v63 }
 0x666   : > { %8124 = vmatpush3.bf16.msra.mxu1 %v8914_v1  ;;  %8129 = vmatprep.subr.bf16.mxu0 %v8964_v24 }
 0x667   : > { %8141 = vmatprep.subr.bf16.mxu1 %v8964_v24 }
 0x668   : > { %8114 = vmatmul.mubr.msk.bf16.vlgmr.msra.gmra.mrb[60].mxu0 %vm3335_vm5, %v5756_v5 }
 0x669   : > { %8126 = vmatmul.mubr.msk.bf16.vlgmr.msra.gmra.mrb[60].mxu1 %vm3335_vm5, %v5838_v9  ;;  %8130 = vmatpush3.bf16.msra.mxu0 %v8915_v30 }
 0x66a   : > { %8142 = vmatpush3.bf16.msra.mxu1 %v8916_v4  ;;  %8131 = vmatprep.subr.bf16.mxu0 %v8964_v24 }
 0x66b   : > { %8143 = vmatprep.subr.bf16.mxu1 %v8964_v24  ;;  %8137 = vmatprep.mubr.msk.bf16.mxu0 %vm8965_vm6, %v8964_v24 }
 0x66c   : > { %8149 = vmatprep.mubr.msk.bf16.mxu1 %vm8965_vm6, %v8964_v24 }
 0x66d   : > { %8132 = vmatpush3.bf16.msra.mxu0 %v8917_v31 }
 0x66e   : > { %8144 = vmatpush3.bf16.msra.mxu1 %v8918_v32  ;;  %8133 = vmatprep.subr.bf16.mxu0 %v8964_v24 }
 0x66f   : > { %8145 = vmatprep.subr.bf16.mxu1 %v8964_v24 }
 0x671   : > { %8134 = vmatpush3.bf16.msra.mxu0 %v8919_v34 }
 0x672   : > { %8146 = vmatpush3.bf16.msra.mxu1 %v8920_v6  ;;  %8135 = vmatprep.subr.bf16.mxu0 %v8964_v24 }
 0x673   : > { %8147 = vmatprep.subr.bf16.mxu1 %v8964_v24 }
 0x675   : > { %8136 = vmatpush3.bf16.msra.mxu0 %v8921_v8 }
 0x676   : > { %8148 = vmatpush3.bf16.msra.mxu1 %v8922_v18  ;;  %8153 = vmatprep.subr.bf16.mxu0 %v8964_v24 }
 0x678   : > { %8138 = vmatmul.mubr.msk.bf16.vlgmr.msra.gmra.mrb[64].mxu0 %vm3335_vm5, %v5920_v12 }
 0x679   : > { %8150 = vmatmul.mubr.msk.bf16.vlgmr.msra.gmra.mrb[64].mxu1 %vm3335_vm5, %v6002_v19  ;;  %8154 = vmatpush3.bf16.msra.mxu0 %v8923_v17 }
 0x67a   : > { %8161 = vmatprep.mubr.msk.bf16.mxu0 %vm8965_vm6, %v8964_v24  ;;  %8155 = vmatprep.subr.bf16.mxu0 %v8964_v24 }
 0x67d   : > { %8156 = vmatpush3.bf16.msra.mxu0 %v8924_v23 }
 0x67e   : > { %8157 = vmatprep.subr.bf16.mxu0 %v8964_v24 }
 0x681   : > { %8158 = vmatpush3.bf16.msra.mxu0 %v8925_v28 }
 0x682   : > { %8159 = vmatprep.subr.bf16.mxu0 %v8964_v24  ;;  %v7284_v24 = vld [vmem:[%s11214_s5 + $0x2] ss:$0 sm:$0xff] }
 0x685   : > { %8160 = vmatpush3.bf16.msra.mxu0 %v8926_v22 }
 0x688   : > { %8162 = vmatmul.mubr.msk.bf16.vlgmr.msra.gmra.mrb[68].mxu0 %vm3335_vm5, %v6084_v27 }
 0x68b   : > { %v3972_v36 = vpop.f32.mrb[16].mxu0 }
 0x68c   : > { %v4040_v7 = vpop.f32.mrb[16].mxu1  ;;  %v7851_v15 = vpop.f32.mrb[17].mxu0 }
 0x68d   : > { %v4041_v45 = vadd.f32 %v4040_v7, %v3972_v36  ;;  %v7863_v20 = vpop.f32.mrb[17].mxu1  ;;  %v3975_v29 = vpop.f32.mrb[18].mxu0 }
 0x68e   : > { %v4043_v33 = vpop.f32.mrb[18].mxu1  ;;  %v7852_v39 = vpop.f32.mrb[19].mxu0  ;;  %v7382_v20 = vld [vmem:[%s11214_s5 + $0x4] ss:$0 sm:$0xff] }
 0x68f   : > { %v4044_v37 = vadd.f32 %v4043_v33, %v3975_v29  ;;  %v7864_v40 = vpop.f32.mrb[19].mxu1 }
 0x69b   : > { %v4120_v41 = vpop.f32.mrb[20].mxu0 }
 0x69c   : > { %v4234_v42 = vpop.f32.mrb[20].mxu1  ;;  %v4127_v43 = vadd.f32 %v4120_v41, %v4041_v45  ;;  %v7875_v38 = vpop.f32.mrb[21].mxu0 }
 0x69d   : > { %v7887_v44 = vpop.f32.mrb[21].mxu1  ;;  %v4123_v46 = vpop.f32.mrb[22].mxu0 }
 0x69e   : > { %v4237_v47 = vpop.f32.mrb[22].mxu1  ;;  %v4133_v48 = vadd.f32 %v7284_v24, %v4127_v43  ;;  %v4128_v49 = vadd.f32 %v4123_v46, %v4044_v37  ;;  %v7876_v11 = vpop.f32.mrb[23].mxu0 }
 0x69f   : > { %v7888_v50 = vpop.f32.mrb[23].mxu1 }
 0x6a0   : > { %v4135_v51 = vmax.f32 %v4133_v48, 0.0  ;;  %v4134_v52 = vadd.f32 %v7284_v24, %v4128_v49 }
 0x6a2   : > { %v4136_v53 = vmax.f32 %v4134_v52, 0.0  ;;  %4139 = vrot.lane.b32.xlu0 %v4135_v51, %s8966_s30 }
 0x6a4   : > { %4141 = vrot.lane.b32.xlu1 %v4136_v53, %s8966_s30 }
 0x6ab   : > { %v4302_v54 = vpop.f32.mrb[24].mxu0 }
 0x6ac   : > { %v4382_v55 = vpop.f32.mrb[24].mxu1  ;;  %v4303_v58 = vadd.f32 %v4302_v54, %v4234_v42  ;;  %v7899_v56 = vpop.f32.mrb[25].mxu0 }
 0x6ad   : > { %v7911_v57 = vpop.f32.mrb[25].mxu1  ;;  %v4305_v60 = vpop.f32.mrb[26].mxu0 }
 0x6ae   : > { %v4385_v63 = vpop.f32.mrb[26].mxu1  ;;  %v4389_v1 = vadd.f32 %v4382_v55, %v4303_v58  ;;  %v4306_v26 = vadd.f32 %v4305_v60, %v4237_v47  ;;  %v7900_v3 = vpop.f32.mrb[27].mxu0 }
 0x6af   : > { %v7912_v62 = vpop.f32.mrb[27].mxu1 }
 0x6b0   : > { %v4395_v2 = vadd.f32 %v7316_v59, %v4389_v1  ;;  %v4390_v30 = vadd.f32 %v4385_v63, %v4306_v26 }
 0x6b2   : > { %v4397_v4 = vmax.f32 %v4395_v2, 0.0  ;;  %v4396_v5 = vadd.f32 %v7316_v59, %v4390_v30 }
 0x6b4   : > { %4399 = vst.msk [vmem:[#allocation4 + $0x10] sm:$0xff] %vm3335_vm5, %v4397_v4  ;;  %v4398_v9 = vmax.f32 %v4396_v5, 0.0 }
 0x6b6   : > { %4400 = vst.msk [vmem:[#allocation4 + $0x30] sm:$0xff] %vm3335_vm5, %v4398_v9 }
 0x6bb   : > { %v4497_v31 = vpop.f32.mrb[28].mxu0 }
 0x6bc   : > { %v4565_v32 = vpop.f32.mrb[28].mxu1  ;;  %v7923_v6 = vpop.f32.mrb[29].mxu0 }
 0x6bd   : > { %v4566_v34 = vadd.f32 %v4565_v32, %v4497_v31  ;;  %v7935_v8 = vpop.f32.mrb[29].mxu1  ;;  %v4500_v18 = vpop.f32.mrb[30].mxu0 }
 0x6be   : > { %v4568_v21 = vpop.f32.mrb[30].mxu1  ;;  %v7924_v13 = vpop.f32.mrb[31].mxu0 }
 0x6bf   : > { %v4569_v61 = vadd.f32 %v4568_v21, %v4500_v18  ;;  %v7936_v35 = vpop.f32.mrb[31].mxu1  ;;  %v7474_v21 = vld [vmem:[%s11214_s5 + $0x5] ss:$0 sm:$0xff] }
 0x6cb   : > { %v4645_v17 = vpop.f32.mrb[32].mxu0 }
 0x6cc   : > { %v4727_v12 = vpop.f32.mrb[32].mxu1  ;;  %v4652_v19 = vadd.f32 %v4645_v17, %v4566_v34  ;;  %v7947_v23 = vpop.f32.mrb[33].mxu0 }
 0x6cd   : > { %v7959_v28 = vpop.f32.mrb[33].mxu1  ;;  %v4648_v22 = vpop.f32.mrb[34].mxu0 }
 0x6ce   : > { %v4730_v25 = vpop.f32.mrb[34].mxu1  ;;  %v4734_v27 = vadd.f32 %v4727_v12, %v4652_v19  ;;  %v4653_v36 = vadd.f32 %v4648_v22, %v4569_v61  ;;  %v7948_v7 = vpop.f32.mrb[35].mxu0 }
 0x6cf   : > { %v7960_v45 = vpop.f32.mrb[35].mxu1 }
 0x6d0   : > { %v4735_v15 = vadd.f32 %v4730_v25, %v4653_v36 }
 0x6db   : > { %v4809_v29 = vpop.f32.mrb[36].mxu0 }
 0x6dc   : > { %v4924_v33 = vpop.f32.mrb[36].mxu1  ;;  %v4816_v37 = vadd.f32 %v4809_v29, %v4734_v27  ;;  %v7971_v39 = vpop.f32.mrb[37].mxu0 }
 0x6dd   : > { %v7983_v40 = vpop.f32.mrb[37].mxu1  ;;  %v4812_v24 = vpop.f32.mrb[38].mxu0 }
 0x6de   : > { %v4927_v41 = vpop.f32.mrb[38].mxu1  ;;  %v4822_v42 = vadd.f32 %v7382_v20, %v4816_v37  ;;  %v4817_v43 = vadd.f32 %v4812_v24, %v4735_v15  ;;  %v7972_v38 = vpop.f32.mrb[39].mxu0 }
 0x6df   : > { %v7984_v44 = vpop.f32.mrb[39].mxu1 }
 0x6e0   : > { %v4824_v46 = vmax.f32 %v4822_v42, 0.0  ;;  %v4823_v47 = vadd.f32 %v7382_v20, %v4817_v43 }
 0x6e2   : > { %v4825_v48 = vmax.f32 %v4823_v47, 0.0  ;;  %4828 = vrot.lane.b32.xlu0 %v4824_v46, %s8966_s30 }
 0x6e4   : > { %4830 = vrot.lane.b32.xlu1 %v4825_v48, %s8966_s30 }
 0x6eb   : > { %v4992_v49 = vpop.f32.mrb[40].mxu0 }
 0x6ec   : > { %v5072_v11 = vpop.f32.mrb[40].mxu1  ;;  %v4993_v50 = vadd.f32 %v4992_v49, %v4924_v33  ;;  %v7995_v51 = vpop.f32.mrb[41].mxu0 }
 0x6ed   : > { %v8007_v52 = vpop.f32.mrb[41].mxu1  ;;  %v4995_v53 = vpop.f32.mrb[42].mxu0 }
 0x6ee   : > { %v5075_v54 = vpop.f32.mrb[42].mxu1  ;;  %v5079_v55 = vadd.f32 %v5072_v11, %v4993_v50  ;;  %v4996_v58 = vadd.f32 %v4995_v53, %v4927_v41  ;;  %v7996_v56 = vpop.f32.mrb[43].mxu0 }
 0x6ef   : > { %v8008_v57 = vpop.f32.mrb[43].mxu1 }
 0x6f0   : > { %v5080_v59 = vadd.f32 %v5075_v54, %v4996_v58 }
 0x6fb   : > { %v5154_v60 = vpop.f32.mrb[44].mxu0 }
 0x6fc   : > { %v5236_v63 = vpop.f32.mrb[44].mxu1  ;;  %v5161_v1 = vadd.f32 %v5154_v60, %v5079_v55  ;;  %v8019_v26 = vpop.f32.mrb[45].mxu0 }
 0x6fd   : > { %v8031_v3 = vpop.f32.mrb[45].mxu1  ;;  %v5157_v62 = vpop.f32.mrb[46].mxu0 }
 0x6fe   : > { %v5239_v2 = vpop.f32.mrb[46].mxu1  ;;  %v5243_v30 = vadd.f32 %v5236_v63, %v5161_v1  ;;  %v5162_v4 = vadd.f32 %v5157_v62, %v5080_v59  ;;  %v8020_v5 = vpop.f32.mrb[47].mxu0 }
 0x6ff   : > { %v8032_v9 = vpop.f32.mrb[47].mxu1 }
 0x700   : > { %v5244_v31 = vadd.f32 %v5239_v2, %v5162_v4 }
 0x70b   : > { %v5318_v32 = vpop.f32.mrb[48].mxu0 }
 0x70c   : > { %v5400_v34 = vpop.f32.mrb[48].mxu1  ;;  %v5325_v6 = vadd.f32 %v5318_v32, %v5243_v30  ;;  %v8043_v8 = vpop.f32.mrb[49].mxu0 }
 0x70d   : > { %v8055_v18 = vpop.f32.mrb[49].mxu1  ;;  %v5321_v61 = vpop.f32.mrb[50].mxu0 }
 0x70e   : > { %v5403_v13 = vpop.f32.mrb[50].mxu1  ;;  %v5407_v35 = vadd.f32 %v5400_v34, %v5325_v6  ;;  %v5326_v17 = vadd.f32 %v5321_v61, %v5244_v31  ;;  %v8044_v12 = vpop.f32.mrb[51].mxu0 }
 0x70f   : > { %v8056_v19 = vpop.f32.mrb[51].mxu1 }
 0x710   : > { %v5413_v23 = vadd.f32 %v7474_v21, %v5407_v35  ;;  %v5408_v28 = vadd.f32 %v5403_v13, %v5326_v17  ;;  %v7592_v13 = vld [vmem:[%s11214_s5 + $0x6] ss:$0 sm:$0xff] }
 0x712   : > { %v5415_v22 = vmax.f32 %v5413_v23, 0.0  ;;  %v5414_v25 = vadd.f32 %v7474_v21, %v5408_v28 }
 0x714   : > { %5417 = vst.msk [vmem:[#allocation4 + $0x18] sm:$0xff] %vm3335_vm5, %v5415_v22  ;;  %v5416_v27 = vmax.f32 %v5414_v25, 0.0  ;;  %v4140_v36 = vpop.permute.xlu0 %4139 }
 0x715   : > { %4145 = vst.msk [vmem:[#allocation4 + $0x8] sm:$0xff] %vm3606_vm7, %v4140_v36 }
 0x716   : > { %5418 = vst.msk [vmem:[#allocation4 + $0x38] sm:$0xff] %vm3335_vm5, %v5416_v27  ;;  %v4142_v7 = vpop.permute.xlu1 %4141 }
 0x717   : > { %4146 = vst.msk [vmem:[#allocation4 + $0x28] sm:$0xff] %vm3606_vm7, %v4142_v7  ;;  %v7593_v7 = vld [vmem:[%s11213_s4 + $0x1] ss:$8 sm:$0xf] }
 0x71b   : > { %v5515_v45 = vpop.f32.mrb[52].mxu0 }
 0x71c   : > { %v5583_v15 = vpop.f32.mrb[52].mxu1  ;;  %v8067_v29 = vpop.f32.mrb[53].mxu0 }
 0x71d   : > { %v5584_v20 = vadd.f32 %v5583_v15, %v5515_v45  ;;  %v8079_v33 = vpop.f32.mrb[53].mxu1  ;;  %v5518_v37 = vpop.f32.mrb[54].mxu0  ;;  %v6200_v15 = vrot.slane %v7593_v7, %v10259_v16  ;;  %v6186_v29 = vld [vmem:[#allocation4 + $0x20] sm:$0xff] }
 0x71e   : > { %v5586_v39 = vpop.f32.mrb[54].mxu1  ;;  %v8068_v24 = vpop.f32.mrb[55].mxu0  ;;  %v6187_v45 = vld [vmem:[#allocation4 + $0x28] sm:$0xff] }
 0x71f   : > { %v5587_v40 = vadd.f32 %v5586_v39, %v5518_v37  ;;  %v8080_v41 = vpop.f32.mrb[55].mxu1  ;;  %v7594_v37 = vld [vmem:[%s11213_s4 + $0x2] ss:$8 sm:$0xf]  ;;  %v6204_v39 = vrot.slane %v7593_v7, %v10276_v10  ;;  %v6218_v24 = vmul.f32 %v6200_v15, %v6187_v45  ;;  %v6280_v45 = vld [vmem:[%s11213_s4] sm:$0x30] }
 0x720   : > { %v6182_v41 = vld [vmem:[#allocation4] sm:$0xff] }
 0x72b   : > { %v5663_v42 = vpop.f32.mrb[56].mxu0 }
 0x72c   : > { %v5745_v43 = vpop.f32.mrb[56].mxu1  ;;  %v5670_v38 = vadd.f32 %v5663_v42, %v5584_v20  ;;  %v8091_v44 = vpop.f32.mrb[57].mxu0  ;;  %v6183_v20 = vld [vmem:[#allocation4 + $0x8] sm:$0xff] }
 0x72d   : > { %v8103_v46 = vpop.f32.mrb[57].mxu1  ;;  %v5666_v47 = vpop.f32.mrb[58].mxu0 }
 0x72e   : > { %v5748_v48 = vpop.f32.mrb[58].mxu1  ;;  %v5752_v49 = vadd.f32 %v5745_v43, %v5670_v38  ;;  %v5671_v11 = vadd.f32 %v5666_v47, %v5587_v40  ;;  %v8092_v50 = vpop.f32.mrb[59].mxu0  ;;  %v6196_v40 = vrot.slane %v7593_v7, %v10254_v0  ;;  %v6231_v43 = vrot.slane %v7594_v37, %v10259_v16 }
 0x72f   : > { %v8104_v51 = vpop.f32.mrb[59].mxu1  ;;  %v6214_v38 = vmul.f32 %v6200_v15, %v6183_v20  ;;  %v6227_v47 = vrot.slane %v7594_v37, %v10254_v0  ;;  %v6282_v15 = vld [vmem:[%s11213_s4 + $0x10] sm:$0x30] }
 0x730   : > { %v5753_v52 = vadd.f32 %v5748_v48, %v5671_v11  ;;  %v6217_v44 = vmul.f32 %v6196_v40, %v6186_v29  ;;  %v6213_v48 = vmul.f32 %v6196_v40, %v6182_v41  ;;  %v6235_v11 = vrot.slane %v7594_v37, %v10276_v10  ;;  %v6283_v41 = vld [vmem:[%s11213_s4 + $0x18] sm:$0x30] }
 0x731   : > { %v11119_v50 = vadd.f32 %v6231_v43, %v6218_v24  ;;  %v11121_v51 = vadd.f32 %v6231_v43, %v6214_v38 }
 0x73b   : > { %v5827_v53 = vpop.f32.mrb[60].mxu0 }
 0x73c   : > { %v5909_v54 = vpop.f32.mrb[60].mxu1  ;;  %v5834_v55 = vadd.f32 %v5827_v53, %v5752_v49  ;;  %v8115_v58 = vpop.f32.mrb[61].mxu0 }
 0x73d   : > { %v8127_v56 = vpop.f32.mrb[61].mxu1  ;;  %v5830_v57 = vpop.f32.mrb[62].mxu0  ;;  %v6259_v58 = vadd.f32 %v11119_v50, %v11121_v51 }
 0x73e   : > { %v5912_v59 = vpop.f32.mrb[62].mxu1  ;;  %v5916_v60 = vadd.f32 %v5909_v54, %v5834_v55  ;;  %v5835_v63 = vadd.f32 %v5830_v57, %v5753_v52  ;;  %v8116_v1 = vpop.f32.mrb[63].mxu0  ;;  %v11123_v52 = vadd.f32 %v6227_v47, %v6217_v44  ;;  %v11127_v54 = vadd.f32 %v6227_v47, %v6213_v48 }
 0x73f   : > { %v8128_v26 = vpop.f32.mrb[63].mxu1 }
 0x740   : > { %v5917_v3 = vadd.f32 %v5912_v59, %v5835_v63  ;;  %v6252_v56 = vadd.f32 %v11123_v52, %v11127_v54  ;;  %v6260_v59 = vrot.slane %v6259_v58, 4 }
 0x742   : > { %v6261_v26 = vadd.f32 %v6260_v59, %v6259_v58  ;;  %v6298_v58 = vld [vmem:[%s11215_s6] sm:$0x3] }
 0x74b   : > { %v5991_v62 = vpop.f32.mrb[64].mxu0 }
 0x74c   : > { %v6073_v2 = vpop.f32.mrb[64].mxu1  ;;  %v5998_v30 = vadd.f32 %v5991_v62, %v5916_v60  ;;  %v8139_v4 = vpop.f32.mrb[65].mxu0  ;;  %v6253_v60 = vrot.slane %v6252_v56, 4 }
 0x74d   : > { %v8151_v5 = vpop.f32.mrb[65].mxu1  ;;  %v5994_v9 = vpop.f32.mrb[66].mxu0  ;;  %v6262_v4 = vrot.slane %v6261_v26, 2 }
 0x74e   : > { %v6076_v31 = vpop.f32.mrb[66].mxu1  ;;  %v6080_v32 = vadd.f32 %v6073_v2, %v5998_v30  ;;  %v5999_v34 = vadd.f32 %v5994_v9, %v5917_v3  ;;  %v8140_v6 = vpop.f32.mrb[67].mxu0  ;;  %v6254_v62 = vadd.f32 %v6253_v60, %v6252_v56  ;;  %v6208_v30 = vrot.slane %v7593_v7, %v10283_v14 }
 0x74f   : > { %v8152_v8 = vpop.f32.mrb[67].mxu1  ;;  %v6263_v6 = vadd.f32 %v6262_v4, %v6261_v26  ;;  %v6300_v56 = vrot.slane %v6298_v58, 4  ;;  %v6306_v26 = vld [vmem:[%s11213_s4 + $0x10] sm:$0xc0] }
 0x750   : > { %v6081_v18 = vadd.f32 %v6076_v31, %v5999_v34  ;;  %v6255_v5 = vrot.slane %v6254_v62, 2  ;;  %v6239_v34 = vrot.slane %v7594_v37, %v10283_v14 }
 0x754   : > { %v4829_v21 = vpop.permute.xlu0 %4828 }
 0x755   : > { %4834 = vst.msk [vmem:[#allocation4 + $0x10] sm:$0xff] %vm3606_vm7, %v4829_v21  ;;  %v6256_v21 = vadd.f32 %v6255_v5, %v6254_v62 }
 0x756   : > { %v4831_v61 = vpop.permute.xlu1 %4830 }
 0x757   : > { %4835 = vst.msk [vmem:[#allocation4 + $0x30] sm:$0xff] %vm3606_vm7, %v4831_v61 }
 0x75b   : > { %v6155_v35 = vpop.f32.mrb[68].mxu0 }
 0x75c   : > { %v6162_v17 = vadd.f32 %v6155_v35, %v6080_v32  ;;  %v8163_v12 = vpop.f32.mrb[69].mxu0  ;;  %v6184_v42 = vld [vmem:[#allocation4 + $0x10] sm:$0xff] }
 0x75d   : > { %v6158_v19 = vpop.f32.mrb[70].mxu0  ;;  %v6215_v49 = vmul.f32 %v6204_v39, %v6184_v42  ;;  %v6257_v12 = vrot.slane %v6256_v21, 1 }
 0x75e   : > { %v6168_v23 = vadd.f32 %v7592_v13, %v6162_v17  ;;  %v6163_v28 = vadd.f32 %v6158_v19, %v6081_v18  ;;  %v8164_v22 = vpop.f32.mrb[71].mxu0  ;;  %v6188_v33 = vld [vmem:[#allocation4 + $0x30] sm:$0xff]  ;;  %v6264_v17 = vrot.slane %v6263_v6, 1 }
 0x75f   : > { %v6219_v46 = vmul.f32 %v6204_v39, %v6188_v33  ;;  %v11129_v55 = vadd.f32 %v6235_v11, %v6215_v49 }
 0x760   : > { %v6170_v25 = vmax.f32 %v6168_v23, 0.0  ;;  %v6169_v27 = vadd.f32 %v7592_v13, %v6163_v28  ;;  %v6265_v28 = vadd.f32 %v6264_v17, %v6263_v6 }
 0x761   : > { %v11125_v53 = vadd.f32 %v6235_v11, %v6219_v46  ;;  %v8967_v11 = vmov 0  }
 0x762   : > { %v6171_v36 = vmax.f32 %v6169_v27, 0.0  ;;  %6174 = vrot.lane.b32.xlu0 %v6170_v25, %s8966_s30  ;;  %v6281_v25 = vld [vmem:[%s11213_s4 + $0x8] sm:$0x30]  ;;  %v6258_v27 = vadd.f32 %v6257_v12, %v6256_v21  ;;  %8217 = vset.pattern.permute.xlu1 %v8967_v11 }
 0x763   : > { %v6266_v57 = vadd.f32 %v11125_v53, %v11129_v55  ;;  %v6285_v29 = vmul.f32 %v6281_v25, %v6265_v28  ;;  %8218 = vset.pattern.permute.xlu0 %v8967_v11 }
 0x764   : > { %6176 = vrot.lane.b32.xlu1 %v6171_v36, %s8966_s30  ;;  %v6284_v37 = vmul.f32 %v6280_v45, %v6258_v27 }
 0x765   : > { %v6267_v63 = vrot.slane %v6266_v57, 4  ;;  %v6290_v24 = vsel %vm6288_vm8, %v6285_v29, 0.0 }
 0x766   : > { %v6289_v43 = vsel %vm6288_vm8, %v6284_v37, 0.0 }
 0x767   : > { %v6268_v2 = vadd.f32 %v6267_v63, %v6266_v57  ;;  %v6291_v44 = vadd.f32 %v6290_v24, %v6289_v43  ;;  %v6304_v63 = vld [vmem:[%s11213_s4] sm:$0xc0] }
 0x768   : > { %v6317_v62 = vrot.slane %v6304_v63, 2 }
 0x769   : > { %v6269_v9 = vrot.slane %v6268_v2, 2 }
 0x76b   : > { %v6270_v61 = vadd.f32 %v6269_v9, %v6268_v2 }
 0x76d   : > { %v6271_v19 = vrot.slane %v6270_v61, 1 }
 0x76f   : > { %v6272_v36 = vadd.f32 %v6271_v19, %v6270_v61 }
 0x771   : > { %v6286_v39 = vmul.f32 %v6282_v15, %v6272_v36  ;;  %v7595_v15 = vld [vmem:[%s11213_s4 + $0x3] ss:$8 sm:$0xf] }
 0x772   : > { %v6380_v43 = vrot.slane %v7595_v15, %v10259_v16 }
 0x773   : > { %v6292_v38 = vsel %vm6288_vm8, %v6286_v39, 0.0 }
 0x774   : > { %v6293_v47 = vadd.f32 %v6292_v38, %v6291_v44  ;;  %v6384_v38 = vrot.slane %v7595_v15, %v10276_v10  ;;  %v6388_v44 = vrot.slane %v7595_v15, %v10283_v14 }
 0x7d4   : > { %v6175_v1 = vpop.permute.xlu0 %6174 }
 0x7d5   : > { %6180 = vst.msk [vmem:[#allocation4 + $0x18] sm:$0xff] %vm3606_vm7, %v6175_v1  ;;  %v6305_v1 = vld [vmem:[%s11213_s4 + $0x8] sm:$0xc0] }
 0x7d6   : > { %v6177_v3 = vpop.permute.xlu1 %6176  ;;  %v6318_v2 = vrot.slane %v6305_v1, 2 }
 0x7d7   : > { %6181 = vst.msk [vmem:[#allocation4 + $0x38] sm:$0xff] %vm3606_vm7, %v6177_v3  ;;  %v6307_v3 = vld [vmem:[%s11213_s4 + $0x18] sm:$0xc0] }
 0x7d8   : > { %v6320_v4 = vrot.slane %v6307_v3, 2 }
 0x7dc   : > { %v6185_v31 = vld [vmem:[#allocation4 + $0x18] sm:$0xff] }
 0x7dd   : > { %v6216_v32 = vmul.f32 %v6208_v30, %v6185_v31 }
 0x7de   : > { %v6189_v8 = vld [vmem:[#allocation4 + $0x38] sm:$0xff] }
 0x7df   : > { %v6220_v18 = vmul.f32 %v6208_v30, %v6189_v8  ;;  %v11141_v13 = vadd.f32 %v6239_v34, %v6216_v32  ;;  %v6319_v30 = vrot.slane %v6306_v26, 2 }
 0x7e1   : > { %v11143_v35 = vadd.f32 %v6239_v34, %v6220_v18 }
 0x7e3   : > { %v6273_v23 = vadd.f32 %v11143_v35, %v11141_v13 }
 0x7e5   : > { %v6274_v22 = vrot.slane %v6273_v23, 4 }
 0x7e7   : > { %v6275_v7 = vadd.f32 %v6274_v22, %v6273_v23 }
 0x7e9   : > { %v6276_v20 = vrot.slane %v6275_v7, 2 }
 0x7eb   : > { %v6277_v33 = vadd.f32 %v6276_v20, %v6275_v7 }
 0x7ed   : > { %v6278_v40 = vrot.slane %v6277_v33, 1 }
 0x7ef   : > { %v6279_v42 = vadd.f32 %v6278_v40, %v6277_v33 }
 0x7f1   : > { %v6287_v46 = vmul.f32 %v6283_v41, %v6279_v42  ;;  %v6376_v42 = vrot.slane %v7595_v15, %v10254_v0 }
 0x7f3   : > { %v6294_v48 = vsel %vm6288_vm8, %v6287_v46, 0.0 }
 0x7f4   : > { %v6295_v49 = vadd.f32 %v6294_v48, %v6293_v47 }
 0x7f6   : > { %6296 = vadd.xlane.f32.xlu0 %v6295_v49 }
 0x883   : > { %v6297_v57 = vpop.xlane.xlu0 %6296 }
 0x884   : > { %v6302_v59 = vadd.f32 %v6300_v56, %v6297_v57 }
 0x886   : > { %v6303_v60 = vmax.f32 %v6302_v59, 0.0 }
 0x888   : > { %6310 = vperm.xlu1 %8217, %v6303_v60  }
 0x907   : > { %v6311_v5 = vpop.permute.xlu1 %6310 }
 0x908   : > { %v6325_v9 = vmul.f32 %v6317_v62, %v6311_v5  ;;  %v6326_v31 = vmul.f32 %v6318_v2, %v6311_v5  ;;  %v6327_v32 = vmul.f32 %v6319_v30, %v6311_v5  ;;  %v6328_v34 = vmul.f32 %v6320_v4, %v6311_v5 }
 0x90a   : > { %v6333_v6 = vrot.slane %v6325_v9, 4  ;;  %v6334_v8 = vrot.slane %v6326_v31, 4  ;;  %v6335_v18 = vrot.slane %v6327_v32, 4  ;;  %v6336_v21 = vrot.slane %v6328_v34, 4 }
 0x90c   : > { %v6342_v61 = vsel %vm6341_vm9, %v6333_v6, 0.0  ;;  %v6349_v17 = vsel %vm6341_vm9, %v6334_v8, 0.0  ;;  %v6356_v12 = vsel %vm6341_vm9, %v6335_v18, 0.0  ;;  %v6363_v19 = vsel %vm6341_vm9, %v6336_v21, 0.0 }
 0x90d   : > { %v6343_v23 = vrot.slane %v6342_v61, 4  ;;  %v6350_v28 = vrot.slane %v6349_v17, 4  ;;  %v6357_v22 = vrot.slane %v6356_v12, 4  ;;  %v6364_v25 = vrot.slane %v6363_v19, 4 }
 0x90f   : > { %v6344_v27 = vadd.f32 %v6343_v23, %v6342_v61  ;;  %v6351_v36 = vadd.f32 %v6350_v28, %v6349_v17  ;;  %v6358_v7 = vadd.f32 %v6357_v22, %v6356_v12  ;;  %v6365_v45 = vadd.f32 %v6364_v25, %v6363_v19 }
 0x911   : > { %v6345_v20 = vrot.slane %v6344_v27, 2  ;;  %v6352_v29 = vrot.slane %v6351_v36, 2  ;;  %v6359_v33 = vrot.slane %v6358_v7, 2  ;;  %v6366_v37 = vrot.slane %v6365_v45, 2 }
 0x913   : > { %v6346_v39 = vadd.f32 %v6345_v20, %v6344_v27  ;;  %v6353_v40 = vadd.f32 %v6352_v29, %v6351_v36  ;;  %v6360_v24 = vadd.f32 %v6359_v33, %v6358_v7  ;;  %v6367_v41 = vadd.f32 %v6366_v37, %v6365_v45  ;;  %v8948_v27 = vld [vmem:[%s9130_s11] sm:$0xff]  ;;  %v8953_v20 = vld [vmem:[%s9130_s11 + $0x30] sm:$0xff] }
 0x914   : > { %v8949_v7 = vld [vmem:[%s9130_s11 + $0x20] sm:$0xff] }
 0x915   : > { %v6347_v46 = vrot.slane %v6346_v39, 1  ;;  %v6354_v47 = vrot.slane %v6353_v40, 1  ;;  %v6361_v48 = vrot.slane %v6360_v24, 1  ;;  %v6368_v49 = vrot.slane %v6367_v41, 1 }
 0x917   : > { %v6348_v11 = vadd.f32 %v6347_v46, %v6346_v39  ;;  %v6355_v58 = vadd.f32 %v6354_v47, %v6353_v40  ;;  %v6362_v56 = vadd.f32 %v6361_v48, %v6360_v24  ;;  %v6369_v57 = vadd.f32 %v6368_v49, %v6367_v41  ;;  %v8954_v39 = vld [vmem:[%s9130_s11 + $0x18] sm:$0xff] }
 0x918   : > { %v8955_v24 = vld [vmem:[%s9130_s11 + $0x38] sm:$0xff] }
 0x919   : > { %v6393_v59 = vadd.f32 %v6376_v42, %v6348_v11  ;;  %v6394_v60 = vadd.f32 %v6380_v43, %v6355_v58  ;;  %v6395_v63 = vadd.f32 %v6384_v38, %v6362_v56  ;;  %v6396_v1 = vadd.f32 %v6388_v44, %v6369_v57 }
 0x91b   : > { %v7596_v26 = vmul.f32 -1.442695, %v6393_v59  ;;  %v7597_v3 = vmul.f32 -1.442695, %v6394_v60  ;;  %v7598_v62 = vmul.f32 -1.442695, %v6395_v63 }
 0x91c   : > { %v7599_v16 = vmul.f32 -1.442695, %v6396_v1 }
 0x91d   : > { %8927 = vpow2.f32 %v7596_v26 }
 0x91e   : > { %8929 = vpow2.f32 %v7597_v3 }
 0x91f   : > { %8931 = vpow2.f32 %v7598_v62 }
 0x920   : > { %8933 = vpow2.f32 %v7599_v16 }
 0x927   : > { %v8928_v10 = vpop.eup %8927 }
 0x928   : > { %v8930_v14 = vpop.eup %8929  ;;  %v6409_v2 = vadd.f32 1.0, %v8928_v10 }
 0x929   : > { %v8932_v30 = vpop.eup %8931  ;;  %v6410_v4 = vadd.f32 1.0, %v8930_v14 }
 0x92a   : > { %v8934_v5 = vpop.eup %8933  ;;  %v6411_v9 = vadd.f32 1.0, %v8932_v30  ;;  %8935 = vrcp.f32 %v6409_v2 }
 0x92b   : > { %v6412_v31 = vadd.f32 1.0, %v8934_v5  ;;  %8937 = vrcp.f32 %v6410_v4 }
 0x92c   : > { %8939 = vrcp.f32 %v6411_v9 }
 0x92d   : > { %8941 = vrcp.f32 %v6412_v31 }
 0x934   : > { %v8936_v32 = vpop.eup %8935 }
 0x935   : > { %v8938_v34 = vpop.eup %8937  ;;  %v6424_v6 = vrot.slane %v8936_v32, %v10254_v0 }
 0x936   : > { %v8940_v8 = vpop.eup %8939  ;;  %v6428_v18 = vrot.slane %v8938_v34, %v10254_v0 }
 0x937   : > { %v8942_v21 = vpop.eup %8941  ;;  %v6432_v61 = vrot.slane %v8940_v8, %v10254_v0  ;;  %v6437_v17 = vmul.f32 %v6424_v6, %v11127_v54  ;;  %v6441_v12 = vmul.f32 %v6424_v6, %v11123_v52 }
 0x938   : > { %v6436_v19 = vrot.slane %v8942_v21, %v10254_v0  ;;  %v6438_v23 = vmul.f32 %v6428_v18, %v11121_v51  ;;  %v6442_v28 = vmul.f32 %v6428_v18, %v11119_v50  ;;  %v8950_v51 = vld [vmem:[%s9130_s11 + $0x8] sm:$0xff] }
 0x939   : > { %v6439_v22 = vmul.f32 %v6432_v61, %v11129_v55  ;;  %v6443_v25 = vmul.f32 %v6432_v61, %v11125_v53  ;;  %v6445_v36 = vadd.f32 %v8948_v27, %v6437_v17  ;;  %v6449_v54 = vadd.f32 %v8949_v7, %v6441_v12  ;;  %v8951_v55 = vld [vmem:[%s9130_s11 + $0x28] sm:$0xff]  ;;  %v8952_v53 = vld [vmem:[%s9130_s11 + $0x10] sm:$0xff] }
 0x93a   : > { %v6440_v0 = vmul.f32 %v6436_v19, %v11141_v13  ;;  %v6444_v50 = vmul.f32 %v6436_v19, %v11143_v35  ;;  %v6446_v52 = vadd.f32 %v8950_v51, %v6438_v23  ;;  %v6450_v45 = vadd.f32 %v8951_v55, %v6442_v28 }
 0x93b   : > { %v6447_v15 = vadd.f32 %v8952_v53, %v6439_v22  ;;  %v6451_v29 = vadd.f32 %v8953_v20, %v6443_v25  ;;  %v6453_v33 = vmax.f32 %v6445_v36, 0.0  ;;  %v6457_v37 = vmax.f32 %v6449_v54, 0.0 }
 0x93c   : > { %v6448_v40 = vadd.f32 %v8954_v39, %v6440_v0  ;;  %v6452_v41 = vadd.f32 %v8955_v24, %v6444_v50  ;;  %v6454_v42 = vmax.f32 %v6446_v52, 0.0  ;;  %v6458_v43 = vmax.f32 %v6450_v45, 0.0 }
 0x93d   : > { %v6455_v38 = vmax.f32 %v6447_v15, 0.0  ;;  %v6459_v13 = vmax.f32 %v6451_v29, 0.0  ;;  %6461 = vst [vmem:[%s278_s28] sm:$0xff] %v6453_v33  ;;  %6465 = vst [vmem:[%s278_s28 + $0x20] sm:$0xff] %v6457_v37 }
 0x93e   : > { %v6456_v35 = vmax.f32 %v6448_v40, 0.0  ;;  %v6460_v44 = vmax.f32 %v6452_v41, 0.0  ;;  %6462 = vst [vmem:[%s278_s28 + $0x8] sm:$0xff] %v6454_v42  ;;  %6466 = vst [vmem:[%s278_s28 + $0x28] sm:$0xff] %v6458_v43 }
 0x93f   : > { %6463 = vst [vmem:[%s278_s28 + $0x10] sm:$0xff] %v6455_v38  ;;  %6467 = vst [vmem:[%s278_s28 + $0x30] sm:$0xff] %v6459_v13 }
 0x940   : > { %6464 = vst [vmem:[%s278_s28 + $0x18] sm:$0xff] %v6456_v35  ;;  %6468 = vst [vmem:[%s278_s28 + $0x38] sm:$0xff] %v6460_v44 }
 0x941 PF: > { %s17_s24 = sadd.s32 1, %s8962_s24  }
 0x942   : > { %p14_p4 = scmp.ge.s32.totalorder %s17_s24, 4  }
 0x944   :  { %16 = sbr.rel (!%p14_p4) target bundleno = 1 (0x1), region = 115 }

</bundles_post_ra>
